<compile_context>
chip_gen: v5e
topology: v5e:2x2
jax: 0.10.0
libtpu: 0.0.40
codegen_flags: <defaults>
</compile_context>

<pallas_src>
import functools

import jax
import jax.numpy as jnp
from jax.experimental import pallas as pl
from jax.experimental.pallas import tpu as pltpu

BN_EPS = 1e-5


# ----------------------------------------------------------------------------
# align_corners=True bilinear interpolation matrix (n_out, n_in)
# ----------------------------------------------------------------------------
def _interp_matrix(n_in, n_out):
    if n_in == 1:
        return jnp.ones((n_out, 1), jnp.float32)
    if n_out == 1:
        return jnp.eye(1, n_in, dtype=jnp.float32)
    i = jnp.arange(n_out, dtype=jnp.float32)
    src = i * (n_in - 1) / (n_out - 1)
    i0 = jnp.clip(jnp.floor(src).astype(jnp.int32), 0, n_in - 1)
    i1 = jnp.minimum(i0 + 1, n_in - 1)
    w1 = src - i0.astype(jnp.float32)
    w0 = 1.0 - w1
    return (w0[:, None] * jax.nn.one_hot(i0, n_in, dtype=jnp.float32)
            + w1[:, None] * jax.nn.one_hot(i1, n_in, dtype=jnp.float32))


# ----------------------------------------------------------------------------
# Fused kernel builder (all shapes static / closed over)
# ----------------------------------------------------------------------------
def _make_kernel(N, C_in, planes, H2, W2):
    HW2 = H2 * W2
    RIN = N * C_in              # rows of the upsampled-input slab
    RP = N * planes             # rows of each conv-output slab
    RMAX = max(RIN, RP)
    PADL = ((W2 + 1 + 127) // 128) * 128   # flat halo (>= W2+1), lane aligned
    PADW = PADL + HW2 + PADL
    inv_cnt = 1.0 / float(N * HW2)
    taps = [(kh - 1, kw - 1, kh * 3 + kw) for kh in range(3) for kw in range(3)]

    def conv_taps(pad_ref, nrows, w_ref, mneg, mpos, out_rows):
        # 3x3 conv: 9 lane-shifted reads of the zero-haloed slab, a column
        # validity mask for dw != 0, and one (out_rows, nrows) channel-mixing
        # matmul per tap (MXU).  Flat halo handles the h-overflow for free.
        acc = jnp.zeros((out_rows, HW2), jnp.float32)
        for dh, dw, t in taps:
            s = dh * W2 + dw
            tap = pad_ref[0:nrows, PADL + s:PADL + s + HW2]     # (nrows, HW2)
            if dw == -1:
                tap = tap * mneg
            elif dw == 1:
                tap = tap * mpos
            acc = acc + jnp.dot(w_ref[t], tap,
                                preferred_element_type=jnp.float32)
        return acc

    def bn_fold(acc, g, gam, bet):
        # Train-mode BatchNorm (biased var) folded into one per-row FMA.
        # acc: (R, HW2); g: (R, R) channel-group indicator; gam/bet: (R, 1).
        gsum = jnp.dot(g, acc, preferred_element_type=jnp.float32)
        gsq = jnp.dot(g, acc * acc, preferred_element_type=jnp.float32)
        mean = jnp.sum(gsum, axis=1, keepdims=True) * inv_cnt
        msq = jnp.sum(gsq, axis=1, keepdims=True) * inv_cnt
        var = msq - mean * mean
        scale = gam * jax.lax.rsqrt(var + BN_EPS)     # EUP rsqrt
        shift = bet - mean * scale
        return acc * scale + shift

    def kernel(x_ref, kron_ref, wc_ref, w2_ref, mask_ref, g1_ref, ga1_ref,
               be1_ref, g2_ref, ga2_ref, be2_ref, o_ref, pad_ref):
        # Column-validity masks for the dw = -1 / +1 taps (hoisted).
        mneg = mask_ref[0:1, :]                       # zero where w == 0
        mpos = mask_ref[1:2, :]                       # zero where w == W2-1

        # Zero ONLY the halo strips (interior is fully overwritten below).
        zhalo = jnp.zeros((RMAX, PADL), jnp.float32)
        pad_ref[:, 0:PADL] = zhalo
        pad_ref[:, PADL + HW2:PADW] = zhalo

        # 1) Bilinear upsample (align_corners=True): ONE lane-dense MXU matmul
        #    (N*C_in, H*W) @ (H*W, H2*W2) -> (N*C_in, H2*W2).
        up = jnp.dot(x_ref[...], kron_ref[...],
                     preferred_element_type=jnp.float32)
        pad_ref[0:RIN, PADL:PADL + HW2] = up          # single aligned store

        # 2) conv1 and shortcut conv share one 9-tap pass (stacked weights),
        #    then train-mode BN for both branches at once.
        acc1u = conv_taps(pad_ref, RIN, wc_ref, mneg, mpos, 2 * RP)
        norm1u = bn_fold(acc1u, g1_ref[...], ga1_ref[...], be1_ref[...])
        out1 = jnp.maximum(norm1u[0:RP, :], 0.0)      # relu(bn1(conv1(x_up)))
        residual = norm1u[RP:2 * RP, :]               # bnU(convU(x_up))

        # 3) conv2 + bn2 on out1 (reuse the same zero-haloed scratch),
        #    then the residual add (no ReLU after the add, per the module).
        pad_ref[0:RP, PADL:PADL + HW2] = out1
        acc2 = conv_taps(pad_ref, RP, w2_ref, mneg, mpos, RP)
        out = bn_fold(acc2, g2_ref[...], ga2_ref[...], be2_ref[...]) + residual

        o_ref[...] = out.astype(o_ref.dtype)          # unmasked full-width vst

    return kernel, RMAX, PADW


# ----------------------------------------------------------------------------
# Wrapper
# ----------------------------------------------------------------------------
@functools.partial(jax.jit, static_argnames=("scale", "up_k"))
def upsample_basic_block_fwd(x_nchw, params, scale=2, up_k=3):
    N, C_in, H, W = x_nchw.shape
    planes = params["conv1_w"].shape[0]
    H2, W2 = int(H * scale), int(W * scale)
    HW2 = H2 * W2
    RIN, RP = N * C_in, N * planes

    # ---- shape-only constants (XLA constant-folds these) ----
    mh = _interp_matrix(H, H2)                        # (H2, H)
    mw = _interp_matrix(W, W2)                        # (W2, W)
    kron_t = jnp.kron(mh, mw).T                       # (H*W, H2*W2)

    w_idx = jnp.arange(HW2, dtype=jnp.int32) % W2
    mask = jnp.stack([(w_idx >= 1).astype(jnp.float32),
                      (w_idx <= W2 - 2).astype(jnp.float32)], axis=0)  # (2,HW2)

    def gmat(rows):          # 1 where (same half) and (same channel), n-major
        idx = jnp.arange(rows)
        same_c = (idx[:, None] % planes) == (idx[None, :] % planes)
        same_h = (idx[:, None] // RP) == (idx[None, :] // RP)
        return (same_c & same_h).astype(jnp.float32)

    g1, g2 = gmat(2 * RP), gmat(RP)

    # ---- runtime parameter packing (tiny XLA ops) ----
    eye_n = jnp.eye(N, dtype=jnp.float32)

    def blockdiag(w_oihw):   # (o, i, 3, 3) -> (9, N*o, N*i), n-major rows
        o, i = w_oihw.shape[0], w_oihw.shape[1]
        w9 = w_oihw.astype(jnp.float32).reshape(o, i, 9).transpose(2, 0, 1)
        return jnp.einsum("nm,toi->tnomi", eye_n, w9).reshape(9, N * o, N * i)

    wu = params["up_w"].astype(jnp.float32)
    if up_k == 1:            # 1x1 shortcut conv -> embed at the center tap
        wu = jnp.zeros((planes, C_in, 3, 3), jnp.float32).at[:, :, 1, 1].set(
            wu[:, :, 0, 0])
    wcomb = jnp.concatenate([blockdiag(params["conv1_w"]), blockdiag(wu)],
                            axis=1)                   # (9, 2*RP, RIN)
    w2bd = blockdiag(params["conv2_w"])               # (9, RP, RP)

    def per_row(v):          # per-channel vec -> per-row (n-major) column
        return jnp.tile(v.astype(jnp.float32).reshape(planes, 1), (N, 1))

    ga1 = jnp.concatenate([per_row(params["bn1_g"]), per_row(params["bnu_g"])],
                          axis=0)                     # (2*RP, 1)
    be1 = jnp.concatenate([per_row(params["bn1_b"]), per_row(params["bnu_b"])],
                          axis=0)
    ga2, be2 = per_row(params["bn2_g"]), per_row(params["bn2_b"])

    x_flat = x_nchw.astype(jnp.float32).reshape(RIN, H * W)   # free reshape

    kernel, RMAX, PADW = _make_kernel(N, C_in, planes, H2, W2)

    def vspec(shape):
        return pl.BlockSpec(shape, lambda: (0,) * len(shape))

    out = pl.pallas_call(
        kernel,
        out_shape=jax.ShapeDtypeStruct((RP, HW2), jnp.float32),
        in_specs=[vspec(x_flat.shape), vspec(kron_t.shape), vspec(wcomb.shape),
                  vspec(w2bd.shape), vspec(mask.shape), vspec(g1.shape),
                  vspec(ga1.shape), vspec(be1.shape), vspec(g2.shape),
                  vspec(ga2.shape), vspec(be2.shape)],
        out_specs=vspec((RP, HW2)),
        scratch_shapes=[pltpu.VMEM((RMAX, PADW), jnp.float32)],
    )(x_flat, kron_t, wcomb, w2bd, mask, g1, ga1, be1, g2, ga2, be2)

    # (RP, HW2) is n-major row-major -> free reshape back to NCHW.
    return out.reshape(N, planes, H2, W2)


# ----------------------------------------------------------------------------
# Parameter init (matches the PyTorch module's structure; BN affine defaults)
# ----------------------------------------------------------------------------
def init_params(key, inplanes, planes):
    k1, k2, k3 = jax.random.split(key, 3)
    up_k = 3 if inplanes == planes else 1
    return {
        "conv1_w": 0.1 * jax.random.normal(k1, (planes, inplanes, 3, 3), jnp.float32),
        "conv2_w": 0.1 * jax.random.normal(k2, (planes, planes, 3, 3), jnp.float32),
        "up_w": 0.1 * jax.random.normal(k3, (planes, inplanes, up_k, up_k), jnp.float32),
        "bn1_g": jnp.ones((planes,), jnp.float32),
        "bn1_b": jnp.zeros((planes,), jnp.float32),
        "bn2_g": jnp.ones((planes,), jnp.float32),
        "bn2_b": jnp.zeros((planes,), jnp.float32),
        "bnu_g": jnp.ones((planes,), jnp.float32),
        "bnu_b": jnp.zeros((planes,), jnp.float32),
    }


# ----------------------------------------------------------------------------
# Pure-JAX reference (for an in-script sanity check)
# ----------------------------------------------------------------------------
def _reference_fwd(x, p, scale, up_k):
    mh = _interp_matrix(x.shape[2], x.shape[2] * scale)
    mw = _interp_matrix(x.shape[3], x.shape[3] * scale)
    x_up = jnp.einsum("oh,nchw,pw->ncop", mh, x, mw)

    def conv(z, w, pad):
        return jax.lax.conv_general_dilated(
            z, w, window_strides=(1, 1), padding=[(pad, pad), (pad, pad)],
            dimension_numbers=("NCHW", "OIHW", "NCHW"))

    def bn(y, g, b):
        mean = jnp.mean(y, axis=(0, 2, 3), keepdims=True)
        var = jnp.mean((y - mean) ** 2, axis=(0, 2, 3), keepdims=True)
        return ((y - mean) * jax.lax.rsqrt(var + BN_EPS)
                * g.reshape(1, -1, 1, 1) + b.reshape(1, -1, 1, 1))

    residual = bn(conv(x_up, p["up_w"], 1 if up_k == 3 else 0),
                  p["bnu_g"], p["bnu_b"])
    out = jnp.maximum(bn(conv(x_up, p["conv1_w"], 1), p["bn1_g"], p["bn1_b"]), 0.0)
    out = bn(conv(out, p["conv2_w"], 1), p["bn2_g"], p["bn2_b"]) + residual
    return out


if __name__ == "__main__":
    key = jax.random.PRNGKey(0)
    kx, kp = jax.random.split(key)

    inplanes, planes = 4, 4                 # inplanes == planes -> 3x3 shortcut
    up_k = 3 if inplanes == planes else 1
    x = jax.random.normal(kx, (2, inplanes, 16, 16), jnp.float32)
    params = init_params(kp, inplanes, planes)

    out = upsample_basic_block_fwd(x, params, scale=2, up_k=up_k)
    out = jax.block_until_ready(out)

    assert out.shape == (2, planes, 32, 32), out.shape
    assert bool(jnp.all(jnp.isfinite(out)))

    ref = _reference_fwd(x, params, 2, up_k)
    max_err = float(jnp.max(jnp.abs(out - ref)))
    assert max_err < 2e-3, f"max abs err vs reference: {max_err}"

    print("KERNEL_OK")
</pallas_src>

<mosaic_0001>
module attributes {stable_mosaic.version = 11 : i64} {
  func.func @kernel(%arg0: memref<8x256xf32, #tpu.memory_space<vmem>>, %arg1: memref<256x1024xf32, #tpu.memory_space<vmem>>, %arg2: memref<9x16x8xf32, #tpu.memory_space<vmem>>, %arg3: memref<9x8x8xf32, #tpu.memory_space<vmem>>, %arg4: memref<2x1024xf32, #tpu.memory_space<vmem>>, %arg5: memref<16x16xf32, #tpu.memory_space<vmem>>, %arg6: memref<16x1xf32, #tpu.memory_space<vmem>>, %arg7: memref<16x1xf32, #tpu.memory_space<vmem>>, %arg8: memref<8x8xf32, #tpu.memory_space<vmem>>, %arg9: memref<8x1xf32, #tpu.memory_space<vmem>>, %arg10: memref<8x1xf32, #tpu.memory_space<vmem>>, %arg11: memref<8x1024xf32, #tpu.memory_space<vmem>>, %arg12: memref<8x1280xf32, #tpu.memory_space<vmem>>) attributes {dimension_semantics = [], scalar_prefetch = 0 : i64, scratch_operands = 1 : i64, tpu.core_type = #tpu.core_type<tc>} {
    %c0 = arith.constant 0 : index
    %c0_0 = arith.constant 0 : index
    %0 = vector.load %arg4[%c0, %c0_0] : memref<2x1024xf32, #tpu.memory_space<vmem>>, vector<1x1024xf32>
    %c1 = arith.constant 1 : index
    %c0_1 = arith.constant 0 : index
    %1 = vector.load %arg4[%c1, %c0_1] : memref<2x1024xf32, #tpu.memory_space<vmem>>, vector<1x1024xf32>
    %cst = arith.constant 0.000000e+00 : f32
    %2 = vector.broadcast %cst : f32 to vector<8x128xf32>
    %c0_2 = arith.constant 0 : index
    %c0_3 = arith.constant 0 : index
    %3 = vector.load %arg12[%c0_2, %c0_3] : memref<8x1280xf32, #tpu.memory_space<vmem>>, vector<8x128xf32>
    tpu.vector_store %arg12[%c0_2, %c0_3], %2 {strides = array<i32>} : memref<8x1280xf32, #tpu.memory_space<vmem>>, vector<8x128xf32>,
    %c0_4 = arith.constant 0 : index
    %c1152 = arith.constant 1152 : index
    %4 = vector.load %arg12[%c0_4, %c1152] : memref<8x1280xf32, #tpu.memory_space<vmem>>, vector<8x128xf32>
    tpu.vector_store %arg12[%c0_4, %c1152], %2 {strides = array<i32>} : memref<8x1280xf32, #tpu.memory_space<vmem>>, vector<8x128xf32>,
    %c0_5 = arith.constant 0 : index
    %c0_6 = arith.constant 0 : index
    %5 = vector.load %arg0[%c0_5, %c0_6] : memref<8x256xf32, #tpu.memory_space<vmem>>, vector<8x256xf32>
    %c0_7 = arith.constant 0 : index
    %c0_8 = arith.constant 0 : index
    %6 = vector.load %arg1[%c0_7, %c0_8] : memref<256x1024xf32, #tpu.memory_space<vmem>>, vector<256x1024xf32>
    %cst_9 = arith.constant dense<0.000000e+00> : vector<8x1024xf32>
    %7 = tpu.matmul %5, %6, %cst_9 {dimension_numbers = #tpu.dot_dimension_numbers<[1], [0], [0], [1], [0, 0, 1, 1], [], []>} : vector<8x256xf32>, vector<256x1024xf32>, vector<8x1024xf32> -> vector<8x1024xf32>
    %c0_10 = arith.constant 0 : index
    %c128 = arith.constant 128 : index
    %8 = vector.load %arg12[%c0_10, %c128] : memref<8x1280xf32, #tpu.memory_space<vmem>>, vector<8x1024xf32>
    tpu.vector_store %arg12[%c0_10, %c128], %7 {strides = array<i32>} : memref<8x1280xf32, #tpu.memory_space<vmem>>, vector<8x1024xf32>,
    %cst_11 = arith.constant 0.000000e+00 : f32
    %9 = vector.broadcast %cst_11 : f32 to vector<16x1024xf32>
    %c0_12 = arith.constant 0 : index
    %c95 = arith.constant 95 : index
    %10 = vector.load %arg12[%c0_12, %c95] : memref<8x1280xf32, #tpu.memory_space<vmem>>, vector<8x1024xf32>
    %11 = vector.broadcast %0 : vector<1x1024xf32> to vector<8x1024xf32>
    %12 = arith.mulf %10, %11 : vector<8x1024xf32>
    %c0_13 = arith.constant 0 : index
    %c0_14 = arith.constant 0 : index
    %c0_15 = arith.constant 0 : index
    %13 = vector.load %arg2[%c0_13, %c0_14, %c0_15] : memref<9x16x8xf32, #tpu.memory_space<vmem>>, vector<1x16x8xf32>
    %14 = vector.shape_cast %13 : vector<1x16x8xf32> to vector<16x8xf32>
    %cst_16 = arith.constant dense<0.000000e+00> : vector<16x1024xf32>
    %15 = tpu.matmul %14, %12, %cst_16 {dimension_numbers = #tpu.dot_dimension_numbers<[1], [0], [0], [1], [0, 0, 1, 1], [], []>} : vector<16x8xf32>, vector<8x1024xf32>, vector<16x1024xf32> -> vector<16x1024xf32>
    %16 = arith.addf %9, %15 : vector<16x1024xf32>
    %c0_17 = arith.constant 0 : index
    %c96 = arith.constant 96 : index
    %17 = vector.load %arg12[%c0_17, %c96] : memref<8x1280xf32, #tpu.memory_space<vmem>>, vector<8x1024xf32>
    %c1_18 = arith.constant 1 : index
    %c0_19 = arith.constant 0 : index
    %c0_20 = arith.constant 0 : index
    %18 = vector.load %arg2[%c1_18, %c0_19, %c0_20] : memref<9x16x8xf32, #tpu.memory_space<vmem>>, vector<1x16x8xf32>
    %19 = vector.shape_cast %18 : vector<1x16x8xf32> to vector<16x8xf32>
    %cst_21 = arith.constant dense<0.000000e+00> : vector<16x1024xf32>
    %20 = tpu.matmul %19, %17, %cst_21 {dimension_numbers = #tpu.dot_dimension_numbers<[1], [0], [0], [1], [0, 0, 1, 1], [], []>} : vector<16x8xf32>, vector<8x1024xf32>, vector<16x1024xf32> -> vector<16x1024xf32>
    %21 = arith.addf %16, %20 : vector<16x1024xf32>
    %c0_22 = arith.constant 0 : index
    %c97 = arith.constant 97 : index
    %22 = vector.load %arg12[%c0_22, %c97] : memref<8x1280xf32, #tpu.memory_space<vmem>>, vector<8x1024xf32>
    %23 = vector.broadcast %1 : vector<1x1024xf32> to vector<8x1024xf32>
    %24 = arith.mulf %22, %23 : vector<8x1024xf32>
    %c2 = arith.constant 2 : index
    %c0_23 = arith.constant 0 : index
    %c0_24 = arith.constant 0 : index
    %25 = vector.load %arg2[%c2, %c0_23, %c0_24] : memref<9x16x8xf32, #tpu.memory_space<vmem>>, vector<1x16x8xf32>
    %26 = vector.shape_cast %25 : vector<1x16x8xf32> to vector<16x8xf32>
    %cst_25 = arith.constant dense<0.000000e+00> : vector<16x1024xf32>
    %27 = tpu.matmul %26, %24, %cst_25 {dimension_numbers = #tpu.dot_dimension_numbers<[1], [0], [0], [1], [0, 0, 1, 1], [], []>} : vector<16x8xf32>, vector<8x1024xf32>, vector<16x1024xf32> -> vector<16x1024xf32>
    %28 = arith.addf %21, %27 : vector<16x1024xf32>
    %c0_26 = arith.constant 0 : index
    %c127 = arith.constant 127 : index
    %29 = vector.load %arg12[%c0_26, %c127] : memref<8x1280xf32, #tpu.memory_space<vmem>>, vector<8x1024xf32>
    %30 = vector.broadcast %0 : vector<1x1024xf32> to vector<8x1024xf32>
    %31 = arith.mulf %29, %30 : vector<8x1024xf32>
    %c3 = arith.constant 3 : index
    %c0_27 = arith.constant 0 : index
    %c0_28 = arith.constant 0 : index
    %32 = vector.load %arg2[%c3, %c0_27, %c0_28] : memref<9x16x8xf32, #tpu.memory_space<vmem>>, vector<1x16x8xf32>
    %33 = vector.shape_cast %32 : vector<1x16x8xf32> to vector<16x8xf32>
    %cst_29 = arith.constant dense<0.000000e+00> : vector<16x1024xf32>
    %34 = tpu.matmul %33, %31, %cst_29 {dimension_numbers = #tpu.dot_dimension_numbers<[1], [0], [0], [1], [0, 0, 1, 1], [], []>} : vector<16x8xf32>, vector<8x1024xf32>, vector<16x1024xf32> -> vector<16x1024xf32>
    %35 = arith.addf %28, %34 : vector<16x1024xf32>
    %c0_30 = arith.constant 0 : index
    %c128_31 = arith.constant 128 : index
    %36 = vector.load %arg12[%c0_30, %c128_31] : memref<8x1280xf32, #tpu.memory_space<vmem>>, vector<8x1024xf32>
    %c4 = arith.constant 4 : index
    %c0_32 = arith.constant 0 : index
    %c0_33 = arith.constant 0 : index
    %37 = vector.load %arg2[%c4, %c0_32, %c0_33] : memref<9x16x8xf32, #tpu.memory_space<vmem>>, vector<1x16x8xf32>
    %38 = vector.shape_cast %37 : vector<1x16x8xf32> to vector<16x8xf32>
    %cst_34 = arith.constant dense<0.000000e+00> : vector<16x1024xf32>
    %39 = tpu.matmul %38, %36, %cst_34 {dimension_numbers = #tpu.dot_dimension_numbers<[1], [0], [0], [1], [0, 0, 1, 1], [], []>} : vector<16x8xf32>, vector<8x1024xf32>, vector<16x1024xf32> -> vector<16x1024xf32>
    %40 = arith.addf %35, %39 : vector<16x1024xf32>
    %c0_35 = arith.constant 0 : index
    %c129 = arith.constant 129 : index
    %41 = vector.load %arg12[%c0_35, %c129] : memref<8x1280xf32, #tpu.memory_space<vmem>>, vector<8x1024xf32>
    %42 = vector.broadcast %1 : vector<1x1024xf32> to vector<8x1024xf32>
    %43 = arith.mulf %41, %42 : vector<8x1024xf32>
    %c5 = arith.constant 5 : index
    %c0_36 = arith.constant 0 : index
    %c0_37 = arith.constant 0 : index
    %44 = vector.load %arg2[%c5, %c0_36, %c0_37] : memref<9x16x8xf32, #tpu.memory_space<vmem>>, vector<1x16x8xf32>
    %45 = vector.shape_cast %44 : vector<1x16x8xf32> to vector<16x8xf32>
    %cst_38 = arith.constant dense<0.000000e+00> : vector<16x1024xf32>
    %46 = tpu.matmul %45, %43, %cst_38 {dimension_numbers = #tpu.dot_dimension_numbers<[1], [0], [0], [1], [0, 0, 1, 1], [], []>} : vector<16x8xf32>, vector<8x1024xf32>, vector<16x1024xf32> -> vector<16x1024xf32>
    %47 = arith.addf %40, %46 : vector<16x1024xf32>
    %c0_39 = arith.constant 0 : index
    %c159 = arith.constant 159 : index
    %48 = vector.load %arg12[%c0_39, %c159] : memref<8x1280xf32, #tpu.memory_space<vmem>>, vector<8x1024xf32>
    %49 = vector.broadcast %0 : vector<1x1024xf32> to vector<8x1024xf32>
    %50 = arith.mulf %48, %49 : vector<8x1024xf32>
    %c6 = arith.constant 6 : index
    %c0_40 = arith.constant 0 : index
    %c0_41 = arith.constant 0 : index
    %51 = vector.load %arg2[%c6, %c0_40, %c0_41] : memref<9x16x8xf32, #tpu.memory_space<vmem>>, vector<1x16x8xf32>
    %52 = vector.shape_cast %51 : vector<1x16x8xf32> to vector<16x8xf32>
    %cst_42 = arith.constant dense<0.000000e+00> : vector<16x1024xf32>
    %53 = tpu.matmul %52, %50, %cst_42 {dimension_numbers = #tpu.dot_dimension_numbers<[1], [0], [0], [1], [0, 0, 1, 1], [], []>} : vector<16x8xf32>, vector<8x1024xf32>, vector<16x1024xf32> -> vector<16x1024xf32>
    %54 = arith.addf %47, %53 : vector<16x1024xf32>
    %c0_43 = arith.constant 0 : index
    %c160 = arith.constant 160 : index
    %55 = vector.load %arg12[%c0_43, %c160] : memref<8x1280xf32, #tpu.memory_space<vmem>>, vector<8x1024xf32>
    %c7 = arith.constant 7 : index
    %c0_44 = arith.constant 0 : index
    %c0_45 = arith.constant 0 : index
    %56 = vector.load %arg2[%c7, %c0_44, %c0_45] : memref<9x16x8xf32, #tpu.memory_space<vmem>>, vector<1x16x8xf32>
    %57 = vector.shape_cast %56 : vector<1x16x8xf32> to vector<16x8xf32>
    %cst_46 = arith.constant dense<0.000000e+00> : vector<16x1024xf32>
    %58 = tpu.matmul %57, %55, %cst_46 {dimension_numbers = #tpu.dot_dimension_numbers<[1], [0], [0], [1], [0, 0, 1, 1], [], []>} : vector<16x8xf32>, vector<8x1024xf32>, vector<16x1024xf32> -> vector<16x1024xf32>
    %59 = arith.addf %54, %58 : vector<16x1024xf32>
    %c0_47 = arith.constant 0 : index
    %c161 = arith.constant 161 : index
    %60 = vector.load %arg12[%c0_47, %c161] : memref<8x1280xf32, #tpu.memory_space<vmem>>, vector<8x1024xf32>
    %61 = vector.broadcast %1 : vector<1x1024xf32> to vector<8x1024xf32>
    %62 = arith.mulf %60, %61 : vector<8x1024xf32>
    %c8 = arith.constant 8 : index
    %c0_48 = arith.constant 0 : index
    %c0_49 = arith.constant 0 : index
    %63 = vector.load %arg2[%c8, %c0_48, %c0_49] : memref<9x16x8xf32, #tpu.memory_space<vmem>>, vector<1x16x8xf32>
    %64 = vector.shape_cast %63 : vector<1x16x8xf32> to vector<16x8xf32>
    %cst_50 = arith.constant dense<0.000000e+00> : vector<16x1024xf32>
    %65 = tpu.matmul %64, %62, %cst_50 {dimension_numbers = #tpu.dot_dimension_numbers<[1], [0], [0], [1], [0, 0, 1, 1], [], []>} : vector<16x8xf32>, vector<8x1024xf32>, vector<16x1024xf32> -> vector<16x1024xf32>
    %66 = arith.addf %59, %65 : vector<16x1024xf32>
    %c0_51 = arith.constant 0 : index
    %c0_52 = arith.constant 0 : index
    %67 = vector.load %arg5[%c0_51, %c0_52] : memref<16x16xf32, #tpu.memory_space<vmem>>, vector<16x16xf32>
    %c0_53 = arith.constant 0 : index
    %c0_54 = arith.constant 0 : index
    %68 = vector.load %arg6[%c0_53, %c0_54] : memref<16x1xf32, #tpu.memory_space<vmem>>, vector<16x1xf32>
    %c0_55 = arith.constant 0 : index
    %c0_56 = arith.constant 0 : index
    %69 = vector.load %arg7[%c0_55, %c0_56] : memref<16x1xf32, #tpu.memory_space<vmem>>, vector<16x1xf32>
    %cst_57 = arith.constant dense<0.000000e+00> : vector<16x1024xf32>
    %70 = tpu.matmul %67, %66, %cst_57 {dimension_numbers = #tpu.dot_dimension_numbers<[1], [0], [0], [1], [0, 0, 1, 1], [], []>} : vector<16x16xf32>, vector<16x1024xf32>, vector<16x1024xf32> -> vector<16x1024xf32>
    %71 = arith.mulf %66, %66 : vector<16x1024xf32>
    %cst_58 = arith.constant dense<0.000000e+00> : vector<16x1024xf32>
    %72 = tpu.matmul %67, %71, %cst_58 {dimension_numbers = #tpu.dot_dimension_numbers<[1], [0], [0], [1], [0, 0, 1, 1], [], []>} : vector<16x16xf32>, vector<16x1024xf32>, vector<16x1024xf32> -> vector<16x1024xf32>
    %cst_59 = arith.constant dense<0.000000e+00> : vector<16xf32>
    %73 = vector.multi_reduction <add>, %70, %cst_59 [1] : vector<16x1024xf32> to vector<16xf32>
    %74 = vector.shape_cast %73 : vector<16xf32> to vector<16x1xf32>
    %cst_60 = arith.constant 4.8828125E-4 : f32
    %75 = vector.broadcast %cst_60 : f32 to vector<16x1xf32>
    %76 = arith.mulf %74, %75 : vector<16x1xf32>
    %cst_61 = arith.constant dense<0.000000e+00> : vector<16xf32>
    %77 = vector.multi_reduction <add>, %72, %cst_61 [1] : vector<16x1024xf32> to vector<16xf32>
    %78 = vector.shape_cast %77 : vector<16xf32> to vector<16x1xf32>
    %cst_62 = arith.constant 4.8828125E-4 : f32
    %79 = vector.broadcast %cst_62 : f32 to vector<16x1xf32>
    %80 = arith.mulf %78, %79 : vector<16x1xf32>
    %81 = arith.mulf %76, %76 : vector<16x1xf32>
    %82 = arith.subf %80, %81 : vector<16x1xf32>
    %cst_63 = arith.constant 9.99999974E-6 : f32
    %83 = vector.broadcast %cst_63 : f32 to vector<16x1xf32>
    %84 = arith.addf %82, %83 : vector<16x1xf32>
    %85 = math.rsqrt %84 : vector<16x1xf32>
    %86 = arith.mulf %68, %85 : vector<16x1xf32>
    %87 = arith.mulf %76, %86 : vector<16x1xf32>
    %88 = arith.subf %69, %87 : vector<16x1xf32>
    %89 = vector.broadcast %86 : vector<16x1xf32> to vector<16x1024xf32>
    %90 = arith.mulf %66, %89 : vector<16x1024xf32>
    %91 = vector.broadcast %88 : vector<16x1xf32> to vector<16x1024xf32>
    %92 = arith.addf %90, %91 : vector<16x1024xf32>
    %93 = vector.extract_strided_slice %92 {offsets = [0, 0], sizes = [8, 1024], strides = [1, 1]} : vector<16x1024xf32> to vector<8x1024xf32>
    %cst_64 = arith.constant 0.000000e+00 : f32
    %94 = vector.broadcast %cst_64 : f32 to vector<8x1024xf32>
    %95 = arith.maximumf %93, %94 : vector<8x1024xf32>
    %96 = vector.extract_strided_slice %92 {offsets = [8, 0], sizes = [8, 1024], strides = [1, 1]} : vector<16x1024xf32> to vector<8x1024xf32>
    %c0_65 = arith.constant 0 : index
    %c128_66 = arith.constant 128 : index
    %97 = vector.load %arg12[%c0_65, %c128_66] : memref<8x1280xf32, #tpu.memory_space<vmem>>, vector<8x1024xf32>
    tpu.vector_store %arg12[%c0_65, %c128_66], %95 {strides = array<i32>} : memref<8x1280xf32, #tpu.memory_space<vmem>>, vector<8x1024xf32>,
    %cst_67 = arith.constant 0.000000e+00 : f32
    %98 = vector.broadcast %cst_67 : f32 to vector<8x1024xf32>
    %c0_68 = arith.constant 0 : index
    %c95_69 = arith.constant 95 : index
    %99 = vector.load %arg12[%c0_68, %c95_69] : memref<8x1280xf32, #tpu.memory_space<vmem>>, vector<8x1024xf32>
    %100 = vector.broadcast %0 : vector<1x1024xf32> to vector<8x1024xf32>
    %101 = arith.mulf %99, %100 : vector<8x1024xf32>
    %c0_70 = arith.constant 0 : index
    %c0_71 = arith.constant 0 : index
    %c0_72 = arith.constant 0 : index
    %102 = vector.load %arg3[%c0_70, %c0_71, %c0_72] : memref<9x8x8xf32, #tpu.memory_space<vmem>>, vector<1x8x8xf32>
    %103 = vector.shape_cast %102 : vector<1x8x8xf32> to vector<8x8xf32>
    %cst_73 = arith.constant dense<0.000000e+00> : vector<8x1024xf32>
    %104 = tpu.matmul %103, %101, %cst_73 {dimension_numbers = #tpu.dot_dimension_numbers<[1], [0], [0], [1], [0, 0, 1, 1], [], []>} : vector<8x8xf32>, vector<8x1024xf32>, vector<8x1024xf32> -> vector<8x1024xf32>
    %105 = arith.addf %98, %104 : vector<8x1024xf32>
    %c0_74 = arith.constant 0 : index
    %c96_75 = arith.constant 96 : index
    %106 = vector.load %arg12[%c0_74, %c96_75] : memref<8x1280xf32, #tpu.memory_space<vmem>>, vector<8x1024xf32>
    %c1_76 = arith.constant 1 : index
    %c0_77 = arith.constant 0 : index
    %c0_78 = arith.constant 0 : index
    %107 = vector.load %arg3[%c1_76, %c0_77, %c0_78] : memref<9x8x8xf32, #tpu.memory_space<vmem>>, vector<1x8x8xf32>
    %108 = vector.shape_cast %107 : vector<1x8x8xf32> to vector<8x8xf32>
    %cst_79 = arith.constant dense<0.000000e+00> : vector<8x1024xf32>
    %109 = tpu.matmul %108, %106, %cst_79 {dimension_numbers = #tpu.dot_dimension_numbers<[1], [0], [0], [1], [0, 0, 1, 1], [], []>} : vector<8x8xf32>, vector<8x1024xf32>, vector<8x1024xf32> -> vector<8x1024xf32>
    %110 = arith.addf %105, %109 : vector<8x1024xf32>
    %c0_80 = arith.constant 0 : index
    %c97_81 = arith.constant 97 : index
    %111 = vector.load %arg12[%c0_80, %c97_81] : memref<8x1280xf32, #tpu.memory_space<vmem>>, vector<8x1024xf32>
    %112 = vector.broadcast %1 : vector<1x1024xf32> to vector<8x1024xf32>
    %113 = arith.mulf %111, %112 : vector<8x1024xf32>
    %c2_82 = arith.constant 2 : index
    %c0_83 = arith.constant 0 : index
    %c0_84 = arith.constant 0 : index
    %114 = vector.load %arg3[%c2_82, %c0_83, %c0_84] : memref<9x8x8xf32, #tpu.memory_space<vmem>>, vector<1x8x8xf32>
    %115 = vector.shape_cast %114 : vector<1x8x8xf32> to vector<8x8xf32>
    %cst_85 = arith.constant dense<0.000000e+00> : vector<8x1024xf32>
    %116 = tpu.matmul %115, %113, %cst_85 {dimension_numbers = #tpu.dot_dimension_numbers<[1], [0], [0], [1], [0, 0, 1, 1], [], []>} : vector<8x8xf32>, vector<8x1024xf32>, vector<8x1024xf32> -> vector<8x1024xf32>
    %117 = arith.addf %110, %116 : vector<8x1024xf32>
    %c0_86 = arith.constant 0 : index
    %c127_87 = arith.constant 127 : index
    %118 = vector.load %arg12[%c0_86, %c127_87] : memref<8x1280xf32, #tpu.memory_space<vmem>>, vector<8x1024xf32>
    %119 = vector.broadcast %0 : vector<1x1024xf32> to vector<8x1024xf32>
    %120 = arith.mulf %118, %119 : vector<8x1024xf32>
    %c3_88 = arith.constant 3 : index
    %c0_89 = arith.constant 0 : index
    %c0_90 = arith.constant 0 : index
    %121 = vector.load %arg3[%c3_88, %c0_89, %c0_90] : memref<9x8x8xf32, #tpu.memory_space<vmem>>, vector<1x8x8xf32>
    %122 = vector.shape_cast %121 : vector<1x8x8xf32> to vector<8x8xf32>
    %cst_91 = arith.constant dense<0.000000e+00> : vector<8x1024xf32>
    %123 = tpu.matmul %122, %120, %cst_91 {dimension_numbers = #tpu.dot_dimension_numbers<[1], [0], [0], [1], [0, 0, 1, 1], [], []>} : vector<8x8xf32>, vector<8x1024xf32>, vector<8x1024xf32> -> vector<8x1024xf32>
    %124 = arith.addf %117, %123 : vector<8x1024xf32>
    %c0_92 = arith.constant 0 : index
    %c128_93 = arith.constant 128 : index
    %125 = vector.load %arg12[%c0_92, %c128_93] : memref<8x1280xf32, #tpu.memory_space<vmem>>, vector<8x1024xf32>
    %c4_94 = arith.constant 4 : index
    %c0_95 = arith.constant 0 : index
    %c0_96 = arith.constant 0 : index
    %126 = vector.load %arg3[%c4_94, %c0_95, %c0_96] : memref<9x8x8xf32, #tpu.memory_space<vmem>>, vector<1x8x8xf32>
    %127 = vector.shape_cast %126 : vector<1x8x8xf32> to vector<8x8xf32>
    %cst_97 = arith.constant dense<0.000000e+00> : vector<8x1024xf32>
    %128 = tpu.matmul %127, %125, %cst_97 {dimension_numbers = #tpu.dot_dimension_numbers<[1], [0], [0], [1], [0, 0, 1, 1], [], []>} : vector<8x8xf32>, vector<8x1024xf32>, vector<8x1024xf32> -> vector<8x1024xf32>
    %129 = arith.addf %124, %128 : vector<8x1024xf32>
    %c0_98 = arith.constant 0 : index
    %c129_99 = arith.constant 129 : index
    %130 = vector.load %arg12[%c0_98, %c129_99] : memref<8x1280xf32, #tpu.memory_space<vmem>>, vector<8x1024xf32>
    %131 = vector.broadcast %1 : vector<1x1024xf32> to vector<8x1024xf32>
    %132 = arith.mulf %130, %131 : vector<8x1024xf32>
    %c5_100 = arith.constant 5 : index
    %c0_101 = arith.constant 0 : index
    %c0_102 = arith.constant 0 : index
    %133 = vector.load %arg3[%c5_100, %c0_101, %c0_102] : memref<9x8x8xf32, #tpu.memory_space<vmem>>, vector<1x8x8xf32>
    %134 = vector.shape_cast %133 : vector<1x8x8xf32> to vector<8x8xf32>
    %cst_103 = arith.constant dense<0.000000e+00> : vector<8x1024xf32>
    %135 = tpu.matmul %134, %132, %cst_103 {dimension_numbers = #tpu.dot_dimension_numbers<[1], [0], [0], [1], [0, 0, 1, 1], [], []>} : vector<8x8xf32>, vector<8x1024xf32>, vector<8x1024xf32> -> vector<8x1024xf32>
    %136 = arith.addf %129, %135 : vector<8x1024xf32>
    %c0_104 = arith.constant 0 : index
    %c159_105 = arith.constant 159 : index
    %137 = vector.load %arg12[%c0_104, %c159_105] : memref<8x1280xf32, #tpu.memory_space<vmem>>, vector<8x1024xf32>
    %138 = vector.broadcast %0 : vector<1x1024xf32> to vector<8x1024xf32>
    %139 = arith.mulf %137, %138 : vector<8x1024xf32>
    %c6_106 = arith.constant 6 : index
    %c0_107 = arith.constant 0 : index
    %c0_108 = arith.constant 0 : index
    %140 = vector.load %arg3[%c6_106, %c0_107, %c0_108] : memref<9x8x8xf32, #tpu.memory_space<vmem>>, vector<1x8x8xf32>
    %141 = vector.shape_cast %140 : vector<1x8x8xf32> to vector<8x8xf32>
    %cst_109 = arith.constant dense<0.000000e+00> : vector<8x1024xf32>
    %142 = tpu.matmul %141, %139, %cst_109 {dimension_numbers = #tpu.dot_dimension_numbers<[1], [0], [0], [1], [0, 0, 1, 1], [], []>} : vector<8x8xf32>, vector<8x1024xf32>, vector<8x1024xf32> -> vector<8x1024xf32>
    %143 = arith.addf %136, %142 : vector<8x1024xf32>
    %c0_110 = arith.constant 0 : index
    %c160_111 = arith.constant 160 : index
    %144 = vector.load %arg12[%c0_110, %c160_111] : memref<8x1280xf32, #tpu.memory_space<vmem>>, vector<8x1024xf32>
    %c7_112 = arith.constant 7 : index
    %c0_113 = arith.constant 0 : index
    %c0_114 = arith.constant 0 : index
    %145 = vector.load %arg3[%c7_112, %c0_113, %c0_114] : memref<9x8x8xf32, #tpu.memory_space<vmem>>, vector<1x8x8xf32>
    %146 = vector.shape_cast %145 : vector<1x8x8xf32> to vector<8x8xf32>
    %cst_115 = arith.constant dense<0.000000e+00> : vector<8x1024xf32>
    %147 = tpu.matmul %146, %144, %cst_115 {dimension_numbers = #tpu.dot_dimension_numbers<[1], [0], [0], [1], [0, 0, 1, 1], [], []>} : vector<8x8xf32>, vector<8x1024xf32>, vector<8x1024xf32> -> vector<8x1024xf32>
    %148 = arith.addf %143, %147 : vector<8x1024xf32>
    %c0_116 = arith.constant 0 : index
    %c161_117 = arith.constant 161 : index
    %149 = vector.load %arg12[%c0_116, %c161_117] : memref<8x1280xf32, #tpu.memory_space<vmem>>, vector<8x1024xf32>
    %150 = vector.broadcast %1 : vector<1x1024xf32> to vector<8x1024xf32>
    %151 = arith.mulf %149, %150 : vector<8x1024xf32>
    %c8_118 = arith.constant 8 : index
    %c0_119 = arith.constant 0 : index
    %c0_120 = arith.constant 0 : index
    %152 = vector.load %arg3[%c8_118, %c0_119, %c0_120] : memref<9x8x8xf32, #tpu.memory_space<vmem>>, vector<1x8x8xf32>
    %153 = vector.shape_cast %152 : vector<1x8x8xf32> to vector<8x8xf32>
    %cst_121 = arith.constant dense<0.000000e+00> : vector<8x1024xf32>
    %154 = tpu.matmul %153, %151, %cst_121 {dimension_numbers = #tpu.dot_dimension_numbers<[1], [0], [0], [1], [0, 0, 1, 1], [], []>} : vector<8x8xf32>, vector<8x1024xf32>, vector<8x1024xf32> -> vector<8x1024xf32>
    %155 = arith.addf %148, %154 : vector<8x1024xf32>
    %c0_122 = arith.constant 0 : index
    %c0_123 = arith.constant 0 : index
    %156 = vector.load %arg8[%c0_122, %c0_123] : memref<8x8xf32, #tpu.memory_space<vmem>>, vector<8x8xf32>
    %c0_124 = arith.constant 0 : index
    %c0_125 = arith.constant 0 : index
    %157 = vector.load %arg9[%c0_124, %c0_125] : memref<8x1xf32, #tpu.memory_space<vmem>>, vector<8x1xf32>
    %c0_126 = arith.constant 0 : index
    %c0_127 = arith.constant 0 : index
    %158 = vector.load %arg10[%c0_126, %c0_127] : memref<8x1xf32, #tpu.memory_space<vmem>>, vector<8x1xf32>
    %cst_128 = arith.constant dense<0.000000e+00> : vector<8x1024xf32>
    %159 = tpu.matmul %156, %155, %cst_128 {dimension_numbers = #tpu.dot_dimension_numbers<[1], [0], [0], [1], [0, 0, 1, 1], [], []>} : vector<8x8xf32>, vector<8x1024xf32>, vector<8x1024xf32> -> vector<8x1024xf32>
    %160 = arith.mulf %155, %155 : vector<8x1024xf32>
    %cst_129 = arith.constant dense<0.000000e+00> : vector<8x1024xf32>
    %161 = tpu.matmul %156, %160, %cst_129 {dimension_numbers = #tpu.dot_dimension_numbers<[1], [0], [0], [1], [0, 0, 1, 1], [], []>} : vector<8x8xf32>, vector<8x1024xf32>, vector<8x1024xf32> -> vector<8x1024xf32>
    %cst_130 = arith.constant dense<0.000000e+00> : vector<8xf32>
    %162 = vector.multi_reduction <add>, %159, %cst_130 [1] : vector<8x1024xf32> to vector<8xf32>
    %163 = vector.shape_cast %162 : vector<8xf32> to vector<8x1xf32>
    %cst_131 = arith.constant 4.8828125E-4 : f32
    %164 = vector.broadcast %cst_131 : f32 to vector<8x1xf32>
    %165 = arith.mulf %163, %164 : vector<8x1xf32>
    %cst_132 = arith.constant dense<0.000000e+00> : vector<8xf32>
    %166 = vector.multi_reduction <add>, %161, %cst_132 [1] : vector<8x1024xf32> to vector<8xf32>
    %167 = vector.shape_cast %166 : vector<8xf32> to vector<8x1xf32>
    %cst_133 = arith.constant 4.8828125E-4 : f32
    %168 = vector.broadcast %cst_133 : f32 to vector<8x1xf32>
    %169 = arith.mulf %167, %168 : vector<8x1xf32>
    %170 = arith.mulf %165, %165 : vector<8x1xf32>
    %171 = arith.subf %169, %170 : vector<8x1xf32>
    %cst_134 = arith.constant 9.99999974E-6 : f32
    %172 = vector.broadcast %cst_134 : f32 to vector<8x1xf32>
    %173 = arith.addf %171, %172 : vector<8x1xf32>
    %174 = math.rsqrt %173 : vector<8x1xf32>
    %175 = arith.mulf %157, %174 : vector<8x1xf32>
    %176 = arith.mulf %165, %175 : vector<8x1xf32>
    %177 = arith.subf %158, %176 : vector<8x1xf32>
    %178 = vector.broadcast %175 : vector<8x1xf32> to vector<8x1024xf32>
    %179 = arith.mulf %155, %178 : vector<8x1024xf32>
    %180 = vector.broadcast %177 : vector<8x1xf32> to vector<8x1024xf32>
    %181 = arith.addf %179, %180 : vector<8x1024xf32>
    %182 = arith.addf %181, %96 : vector<8x1024xf32>
    %c0_135 = arith.constant 0 : index
    %c0_136 = arith.constant 0 : index
    %183 = vector.load %arg11[%c0_135, %c0_136] : memref<8x1024xf32, #tpu.memory_space<vmem>>, vector<8x1024xf32>
    tpu.vector_store %arg11[%c0_135, %c0_136], %182 {strides = array<i32>} : memref<8x1024xf32, #tpu.memory_space<vmem>>, vector<8x1024xf32>,
    return
  }
}

</mosaic_0001>

<bundles_post_ra>
// kernel: upsample_basic_block_fwd.1
= control target key start
LH: loop header
LB: loop body
LE: loop exit
PB: predicated region body
PF: predicated region fallthrough
CT: control target
= control target key end

     0   :  { %s6639_s21 = smov 95   ;;  %s6641_s20 = smov 97   ;;  %vm663_vm0 = vcmask 777216   ;;  %vm721_vm1 = vcmask 261120   ;;  %vm738_vm2 = vcmask 64512   ;;  %vm1188_vm3 = vcmask 793600   ;;  %s9445_s1 = inlined_call_operand.vmem [shape: f32[256,1024], index: 1, kind: input, shape index: {}]   ;;  %s9446_s0 = inlined_call_operand.vmem [shape: f32[8,256], index: 0, kind: input, shape index: {}]   ;;  %s9447_s4 = inlined_call_operand.vmem [shape: f32[2,1024], index: 4, kind: input, shape index: {}]   ;;  %s9448_s2 = inlined_call_operand.vmem [shape: f32[9,16,8], index: 2, kind: input, shape index: {}]   ;;  %s9449_s5 = inlined_call_operand.vmem [shape: f32[16,16], index: 5, kind: input, shape index: {}]   ;;  %s9450_s6 = inlined_call_operand.vmem [shape: f32[16,1], index: 6, kind: input, shape index: {}]   ;;  %s9451_s7 = inlined_call_operand.vmem [shape: f32[16,1], index: 7, kind: input, shape index: {}]   ;;  %s9452_s3 = inlined_call_operand.vmem [shape: f32[9,8,8], index: 3, kind: input, shape index: {}]   ;;  %s9453_s8 = inlined_call_operand.vmem [shape: f32[8,8], index: 8, kind: input, shape index: {}]   ;;  %s9454_s9 = inlined_call_operand.vmem [shape: f32[8,1], index: 9, kind: input, shape index: {}]   ;;  %s9455_s10 = inlined_call_operand.vmem [shape: f32[8,1], index: 10, kind: input, shape index: {}]   ;;  %s9456_s11 = inlined_call_operand.vmem [shape: f32[8,1024], index: 11, kind: output, shape index: {}]  }
   0x1   :  { %v165_v0 = vld [vmem:[%s9445_s1 + $0x3c0] sm:$0xff]  ;;  %v166_v2 = vld [vmem:[%s9445_s1 + $0x3c8] sm:$0xff]  ;;  %s6643_s22 = smov 127   ;;  %vm956_vm4 = vcmask 269312   ;;  %s6644_s26 = smov 31   ;;  %vm1483_vm5 = vcmask 1039360  }
   0x2   :  { %v293_v1 = vld [vmem:[%s9445_s1 + $0x7c0] sm:$0xff]  ;;  %301 = vmatpush.msra.mxu0 %v165_v0  ;;  %v294_v3 = vld [vmem:[%s9445_s1 + $0x7c8] sm:$0xff]  ;;  %341 = vmatpush.msra.mxu2 %v166_v2  ;;  %v167_v0 = vld [vmem:[%s9445_s1 + $0x3d0] sm:$0xff]  ;;  %s6645_s27 = smov 1   ;;  %vm1244_vm6 = vcmask 252928   ;;  %vm1539_vm7 = vcmask 7168  }
   0x3   :  { %321 = vmatpush.msra.mxu1 %v293_v1  ;;  %v157_v4 = vld [vmem:[%s9445_s1 + $0x380] sm:$0xff]  ;;  %361 = vmatpush.msra.mxu3 %v294_v3  ;;  %v158_v6 = vld [vmem:[%s9445_s1 + $0x388] sm:$0xff]  ;;  %v295_v1 = vld [vmem:[%s9445_s1 + $0x7d0] sm:$0xff]  ;;  %s6646_s29 = smov 96   ;;  %vm2596_vm8 = vcmask 785408   ;;  %vm3118_vm9 = vcmask 130048  }
   0x4   :  { %v285_v5 = vld [vmem:[%s9445_s1 + $0x780] sm:$0xff]  ;;  %v286_v7 = vld [vmem:[%s9445_s1 + $0x788] sm:$0xff]  ;;  %302 = vmatpush.msra.mxu0 %v157_v4  ;;  %342 = vmatpush.msra.mxu2 %v158_v6  ;;  %v168_v2 = vld [vmem:[%s9445_s1 + $0x3d8] sm:$0xff] }
   0x5   :  { %v149_v8 = vld [vmem:[%s9445_s1 + $0x340] sm:$0xff]  ;;  %322 = vmatpush.msra.mxu1 %v285_v5  ;;  %v150_v10 = vld [vmem:[%s9445_s1 + $0x348] sm:$0xff]  ;;  %362 = vmatpush.msra.mxu3 %v286_v7  ;;  %v296_v3 = vld [vmem:[%s9445_s1 + $0x7d8] sm:$0xff] }
   0x6   :  { %v277_v9 = vld [vmem:[%s9445_s1 + $0x740] sm:$0xff]  ;;  %v278_v11 = vld [vmem:[%s9445_s1 + $0x748] sm:$0xff]  ;;  %303 = vmatpush.msra.mxu0 %v149_v8  ;;  %343 = vmatpush.msra.mxu2 %v150_v10  ;;  %v159_v4 = vld [vmem:[%s9445_s1 + $0x390] sm:$0xff] }
   0x7   :  { %v141_v12 = vld [vmem:[%s9445_s1 + $0x300] sm:$0xff]  ;;  %323 = vmatpush.msra.mxu1 %v277_v9  ;;  %v142_v14 = vld [vmem:[%s9445_s1 + $0x308] sm:$0xff]  ;;  %363 = vmatpush.msra.mxu3 %v278_v11  ;;  %v287_v5 = vld [vmem:[%s9445_s1 + $0x790] sm:$0xff] }
   0x8   :  { %v269_v13 = vld [vmem:[%s9445_s1 + $0x700] sm:$0xff]  ;;  %v270_v15 = vld [vmem:[%s9445_s1 + $0x708] sm:$0xff]  ;;  %304 = vmatpush.msra.mxu0 %v141_v12  ;;  %344 = vmatpush.msra.mxu2 %v142_v14  ;;  %v160_v6 = vld [vmem:[%s9445_s1 + $0x398] sm:$0xff] }
   0x9   :  { %v133_v16 = vld [vmem:[%s9445_s1 + $0x2c0] sm:$0xff]  ;;  %324 = vmatpush.msra.mxu1 %v269_v13  ;;  %v134_v18 = vld [vmem:[%s9445_s1 + $0x2c8] sm:$0xff]  ;;  %364 = vmatpush.msra.mxu3 %v270_v15  ;;  %v288_v7 = vld [vmem:[%s9445_s1 + $0x798] sm:$0xff] }
   0xa   :  { %v261_v17 = vld [vmem:[%s9445_s1 + $0x6c0] sm:$0xff]  ;;  %v262_v19 = vld [vmem:[%s9445_s1 + $0x6c8] sm:$0xff]  ;;  %305 = vmatpush.msra.mxu0 %v133_v16  ;;  %345 = vmatpush.msra.mxu2 %v134_v18  ;;  %v151_v8 = vld [vmem:[%s9445_s1 + $0x350] sm:$0xff] }
   0xb   :  { %v125_v20 = vld [vmem:[%s9445_s1 + $0x280] sm:$0xff]  ;;  %325 = vmatpush.msra.mxu1 %v261_v17  ;;  %v126_v22 = vld [vmem:[%s9445_s1 + $0x288] sm:$0xff]  ;;  %365 = vmatpush.msra.mxu3 %v262_v19  ;;  %v279_v9 = vld [vmem:[%s9445_s1 + $0x750] sm:$0xff] }
   0xc   :  { %v253_v21 = vld [vmem:[%s9445_s1 + $0x680] sm:$0xff]  ;;  %v254_v23 = vld [vmem:[%s9445_s1 + $0x688] sm:$0xff]  ;;  %306 = vmatpush.msra.mxu0 %v125_v20  ;;  %346 = vmatpush.msra.mxu2 %v126_v22  ;;  %v152_v10 = vld [vmem:[%s9445_s1 + $0x358] sm:$0xff] }
   0xd   :  { %v117_v24 = vld [vmem:[%s9445_s1 + $0x240] sm:$0xff]  ;;  %326 = vmatpush.msra.mxu1 %v253_v21  ;;  %v118_v26 = vld [vmem:[%s9445_s1 + $0x248] sm:$0xff]  ;;  %366 = vmatpush.msra.mxu3 %v254_v23  ;;  %v280_v11 = vld [vmem:[%s9445_s1 + $0x758] sm:$0xff] }
   0xe   :  { %v245_v25 = vld [vmem:[%s9445_s1 + $0x640] sm:$0xff]  ;;  %v246_v27 = vld [vmem:[%s9445_s1 + $0x648] sm:$0xff]  ;;  %307 = vmatpush.msra.mxu0 %v117_v24  ;;  %347 = vmatpush.msra.mxu2 %v118_v26  ;;  %v143_v12 = vld [vmem:[%s9445_s1 + $0x310] sm:$0xff] }
   0xf   :  { %v109_v28 = vld [vmem:[%s9445_s1 + $0x200] sm:$0xff]  ;;  %327 = vmatpush.msra.mxu1 %v245_v25  ;;  %v110_v30 = vld [vmem:[%s9445_s1 + $0x208] sm:$0xff]  ;;  %367 = vmatpush.msra.mxu3 %v246_v27  ;;  %v271_v13 = vld [vmem:[%s9445_s1 + $0x710] sm:$0xff] }
  0x10   :  { %v237_v29 = vld [vmem:[%s9445_s1 + $0x600] sm:$0xff]  ;;  %v238_v31 = vld [vmem:[%s9445_s1 + $0x608] sm:$0xff]  ;;  %308 = vmatpush.msra.mxu0 %v109_v28  ;;  %348 = vmatpush.msra.mxu2 %v110_v30  ;;  %v144_v14 = vld [vmem:[%s9445_s1 + $0x318] sm:$0xff] }
  0x11   :  { %v101_v32 = vld [vmem:[%s9445_s1 + $0x1c0] sm:$0xff]  ;;  %328 = vmatpush.msra.mxu1 %v237_v29  ;;  %v102_v34 = vld [vmem:[%s9445_s1 + $0x1c8] sm:$0xff]  ;;  %368 = vmatpush.msra.mxu3 %v238_v31  ;;  %v272_v15 = vld [vmem:[%s9445_s1 + $0x718] sm:$0xff] }
  0x12   :  { %v229_v33 = vld [vmem:[%s9445_s1 + $0x5c0] sm:$0xff]  ;;  %v230_v35 = vld [vmem:[%s9445_s1 + $0x5c8] sm:$0xff]  ;;  %309 = vmatpush.msra.mxu0 %v101_v32  ;;  %349 = vmatpush.msra.mxu2 %v102_v34  ;;  %v135_v16 = vld [vmem:[%s9445_s1 + $0x2d0] sm:$0xff] }
  0x13   :  { %v93_v36 = vld [vmem:[%s9445_s1 + $0x180] sm:$0xff]  ;;  %329 = vmatpush.msra.mxu1 %v229_v33  ;;  %v94_v38 = vld [vmem:[%s9445_s1 + $0x188] sm:$0xff]  ;;  %369 = vmatpush.msra.mxu3 %v230_v35  ;;  %v263_v17 = vld [vmem:[%s9445_s1 + $0x6d0] sm:$0xff] }
  0x14   :  { %v221_v37 = vld [vmem:[%s9445_s1 + $0x580] sm:$0xff]  ;;  %v222_v39 = vld [vmem:[%s9445_s1 + $0x588] sm:$0xff]  ;;  %310 = vmatpush.msra.mxu0 %v93_v36  ;;  %350 = vmatpush.msra.mxu2 %v94_v38  ;;  %v136_v18 = vld [vmem:[%s9445_s1 + $0x2d8] sm:$0xff] }
  0x15   :  { %v85_v40 = vld [vmem:[%s9445_s1 + $0x140] sm:$0xff]  ;;  %330 = vmatpush.msra.mxu1 %v221_v37  ;;  %v86_v42 = vld [vmem:[%s9445_s1 + $0x148] sm:$0xff]  ;;  %370 = vmatpush.msra.mxu3 %v222_v39  ;;  %v264_v19 = vld [vmem:[%s9445_s1 + $0x6d8] sm:$0xff] }
  0x16   :  { %v213_v41 = vld [vmem:[%s9445_s1 + $0x540] sm:$0xff]  ;;  %v214_v43 = vld [vmem:[%s9445_s1 + $0x548] sm:$0xff]  ;;  %311 = vmatpush.msra.mxu0 %v85_v40  ;;  %351 = vmatpush.msra.mxu2 %v86_v42  ;;  %v127_v20 = vld [vmem:[%s9445_s1 + $0x290] sm:$0xff] }
  0x17   :  { %v77_v44 = vld [vmem:[%s9445_s1 + $0x100] sm:$0xff]  ;;  %331 = vmatpush.msra.mxu1 %v213_v41  ;;  %v78_v46 = vld [vmem:[%s9445_s1 + $0x108] sm:$0xff]  ;;  %371 = vmatpush.msra.mxu3 %v214_v43  ;;  %v255_v21 = vld [vmem:[%s9445_s1 + $0x690] sm:$0xff] }
  0x18   :  { %v205_v45 = vld [vmem:[%s9445_s1 + $0x500] sm:$0xff]  ;;  %v206_v47 = vld [vmem:[%s9445_s1 + $0x508] sm:$0xff]  ;;  %312 = vmatpush.msra.mxu0 %v77_v44  ;;  %352 = vmatpush.msra.mxu2 %v78_v46  ;;  %v128_v22 = vld [vmem:[%s9445_s1 + $0x298] sm:$0xff] }
  0x19   :  { %v69_v48 = vld [vmem:[%s9445_s1 + $0xc0] sm:$0xff]  ;;  %332 = vmatpush.msra.mxu1 %v205_v45  ;;  %v70_v50 = vld [vmem:[%s9445_s1 + $0xc8] sm:$0xff]  ;;  %372 = vmatpush.msra.mxu3 %v206_v47  ;;  %v256_v23 = vld [vmem:[%s9445_s1 + $0x698] sm:$0xff] }
  0x1a   :  { %v197_v49 = vld [vmem:[%s9445_s1 + $0x4c0] sm:$0xff]  ;;  %v198_v51 = vld [vmem:[%s9445_s1 + $0x4c8] sm:$0xff]  ;;  %313 = vmatpush.msra.mxu0 %v69_v48  ;;  %353 = vmatpush.msra.mxu2 %v70_v50  ;;  %v119_v24 = vld [vmem:[%s9445_s1 + $0x250] sm:$0xff] }
  0x1b   :  { %v61_v52 = vld [vmem:[%s9445_s1 + $0x80] sm:$0xff]  ;;  %333 = vmatpush.msra.mxu1 %v197_v49  ;;  %v62_v54 = vld [vmem:[%s9445_s1 + $0x88] sm:$0xff]  ;;  %373 = vmatpush.msra.mxu3 %v198_v51  ;;  %v247_v25 = vld [vmem:[%s9445_s1 + $0x650] sm:$0xff] }
  0x1c   :  { %v189_v53 = vld [vmem:[%s9445_s1 + $0x480] sm:$0xff]  ;;  %v190_v55 = vld [vmem:[%s9445_s1 + $0x488] sm:$0xff]  ;;  %314 = vmatpush.msra.mxu0 %v61_v52  ;;  %354 = vmatpush.msra.mxu2 %v62_v54  ;;  %v120_v26 = vld [vmem:[%s9445_s1 + $0x258] sm:$0xff] }
  0x1d   :  { %v53_v56 = vld [vmem:[%s9445_s1 + $0x40] sm:$0xff]  ;;  %334 = vmatpush.msra.mxu1 %v189_v53  ;;  %v54_v58 = vld [vmem:[%s9445_s1 + $0x48] sm:$0xff]  ;;  %374 = vmatpush.msra.mxu3 %v190_v55  ;;  %v248_v27 = vld [vmem:[%s9445_s1 + $0x658] sm:$0xff] }
  0x1e   :  { %v181_v57 = vld [vmem:[%s9445_s1 + $0x440] sm:$0xff]  ;;  %v182_v59 = vld [vmem:[%s9445_s1 + $0x448] sm:$0xff]  ;;  %315 = vmatpush.msra.mxu0 %v53_v56  ;;  %355 = vmatpush.msra.mxu2 %v54_v58  ;;  %v111_v28 = vld [vmem:[%s9445_s1 + $0x210] sm:$0xff] }
  0x1f   :  { %v45_v60 = vld [vmem:[%s9445_s1] sm:$0xff]  ;;  %335 = vmatpush.msra.mxu1 %v181_v57  ;;  %v46_v62 = vld [vmem:[%s9445_s1 + $0x8] sm:$0xff]  ;;  %375 = vmatpush.msra.mxu3 %v182_v59  ;;  %v239_v29 = vld [vmem:[%s9445_s1 + $0x610] sm:$0xff] }
  0x20   :  { %v173_v61 = vld [vmem:[%s9445_s1 + $0x400] sm:$0xff]  ;;  %v174_v63 = vld [vmem:[%s9445_s1 + $0x408] sm:$0xff]  ;;  %316 = vmatpush.msra.mxu0 %v45_v60  ;;  %356 = vmatpush.msra.mxu2 %v46_v62  ;;  %v112_v30 = vld [vmem:[%s9445_s1 + $0x218] sm:$0xff] }
  0x21   :  { %336 = vmatpush.msra.mxu1 %v173_v61  ;;  %376 = vmatpush.msra.mxu3 %v174_v63  ;;  %v240_v31 = vld [vmem:[%s9445_s1 + $0x618] sm:$0xff]  ;;  %v103_v32 = vld [vmem:[%s9445_s1 + $0x1d0] sm:$0xff]  ;;  %v7048_v48 = vld [vmem:[%s9446_s0] sm:$0xff] }
  0x22   :  { %381 = vmatpush.msrb.mxu0 %v167_v0  ;;  %421 = vmatpush.msrb.mxu2 %v168_v2  ;;  %v231_v33 = vld [vmem:[%s9445_s1 + $0x5d0] sm:$0xff]  ;;  %v104_v34 = vld [vmem:[%s9445_s1 + $0x1d8] sm:$0xff]  ;;  %v7053_v49 = vld [vmem:[%s9446_s0 + $0x8] sm:$0xff] }
  0x23   :  { %401 = vmatpush.msrb.mxu1 %v295_v1  ;;  %441 = vmatpush.msrb.mxu3 %v296_v3  ;;  %v232_v35 = vld [vmem:[%s9445_s1 + $0x5d8] sm:$0xff]  ;;  %v95_v36 = vld [vmem:[%s9445_s1 + $0x190] sm:$0xff]  ;;  %v169_v2 = vld [vmem:[%s9445_s1 + $0x3e0] sm:$0xff] }
  0x24   :  { %382 = vmatpush.msrb.mxu0 %v159_v4  ;;  %422 = vmatpush.msrb.mxu2 %v160_v6  ;;  %v223_v37 = vld [vmem:[%s9445_s1 + $0x590] sm:$0xff]  ;;  %v96_v38 = vld [vmem:[%s9445_s1 + $0x198] sm:$0xff]  ;;  %v297_v3 = vld [vmem:[%s9445_s1 + $0x7e0] sm:$0xff] }
  0x25   :  { %402 = vmatpush.msrb.mxu1 %v287_v5  ;;  %442 = vmatpush.msrb.mxu3 %v288_v7  ;;  %v224_v39 = vld [vmem:[%s9445_s1 + $0x598] sm:$0xff]  ;;  %v87_v40 = vld [vmem:[%s9445_s1 + $0x150] sm:$0xff]  ;;  %v170_v4 = vld [vmem:[%s9445_s1 + $0x3e8] sm:$0xff] }
  0x26   :  { %383 = vmatpush.msrb.mxu0 %v151_v8  ;;  %423 = vmatpush.msrb.mxu2 %v152_v10  ;;  %v215_v41 = vld [vmem:[%s9445_s1 + $0x550] sm:$0xff]  ;;  %v88_v42 = vld [vmem:[%s9445_s1 + $0x158] sm:$0xff]  ;;  %v298_v5 = vld [vmem:[%s9445_s1 + $0x7e8] sm:$0xff] }
  0x27   :  { %403 = vmatpush.msrb.mxu1 %v279_v9  ;;  %443 = vmatpush.msrb.mxu3 %v280_v11  ;;  %v216_v43 = vld [vmem:[%s9445_s1 + $0x558] sm:$0xff]  ;;  %v79_v44 = vld [vmem:[%s9445_s1 + $0x110] sm:$0xff]  ;;  %v161_v6 = vld [vmem:[%s9445_s1 + $0x3a0] sm:$0xff] }
  0x28   :  { %384 = vmatpush.msrb.mxu0 %v143_v12  ;;  %424 = vmatpush.msrb.mxu2 %v144_v14  ;;  %v207_v45 = vld [vmem:[%s9445_s1 + $0x510] sm:$0xff]  ;;  %v80_v46 = vld [vmem:[%s9445_s1 + $0x118] sm:$0xff]  ;;  %v289_v7 = vld [vmem:[%s9445_s1 + $0x7a0] sm:$0xff] }
  0x29   :  { %404 = vmatpush.msrb.mxu1 %v271_v13  ;;  %444 = vmatpush.msrb.mxu3 %v272_v15  ;;  %v208_v47 = vld [vmem:[%s9445_s1 + $0x518] sm:$0xff]  ;;  %v71_v50 = vld [vmem:[%s9445_s1 + $0xd0] sm:$0xff]  ;;  %v162_v8 = vld [vmem:[%s9445_s1 + $0x3a8] sm:$0xff] }
  0x2a   :  { %385 = vmatpush.msrb.mxu0 %v135_v16  ;;  %425 = vmatpush.msrb.mxu2 %v136_v18  ;;  %v199_v51 = vld [vmem:[%s9445_s1 + $0x4d0] sm:$0xff]  ;;  %v72_v52 = vld [vmem:[%s9445_s1 + $0xd8] sm:$0xff]  ;;  %v290_v9 = vld [vmem:[%s9445_s1 + $0x7a8] sm:$0xff] }
  0x2b   :  { %405 = vmatpush.msrb.mxu1 %v263_v17  ;;  %445 = vmatpush.msrb.mxu3 %v264_v19  ;;  %v200_v53 = vld [vmem:[%s9445_s1 + $0x4d8] sm:$0xff]  ;;  %v63_v54 = vld [vmem:[%s9445_s1 + $0x90] sm:$0xff]  ;;  %v153_v10 = vld [vmem:[%s9445_s1 + $0x360] sm:$0xff] }
  0x2c   :  { %386 = vmatpush.msrb.mxu0 %v127_v20  ;;  %426 = vmatpush.msrb.mxu2 %v128_v22  ;;  %v191_v55 = vld [vmem:[%s9445_s1 + $0x490] sm:$0xff]  ;;  %v64_v56 = vld [vmem:[%s9445_s1 + $0x98] sm:$0xff]  ;;  %v281_v11 = vld [vmem:[%s9445_s1 + $0x760] sm:$0xff] }
  0x2d   :  { %406 = vmatpush.msrb.mxu1 %v255_v21  ;;  %446 = vmatpush.msrb.mxu3 %v256_v23  ;;  %v192_v57 = vld [vmem:[%s9445_s1 + $0x498] sm:$0xff]  ;;  %v55_v58 = vld [vmem:[%s9445_s1 + $0x50] sm:$0xff]  ;;  %v154_v12 = vld [vmem:[%s9445_s1 + $0x368] sm:$0xff] }
  0x2e   :  { %387 = vmatpush.msrb.mxu0 %v119_v24  ;;  %427 = vmatpush.msrb.mxu2 %v120_v26  ;;  %v183_v59 = vld [vmem:[%s9445_s1 + $0x450] sm:$0xff]  ;;  %v56_v60 = vld [vmem:[%s9445_s1 + $0x58] sm:$0xff]  ;;  %v282_v13 = vld [vmem:[%s9445_s1 + $0x768] sm:$0xff] }
  0x2f   :  { %407 = vmatpush.msrb.mxu1 %v247_v25  ;;  %447 = vmatpush.msrb.mxu3 %v248_v27  ;;  %v184_v61 = vld [vmem:[%s9445_s1 + $0x458] sm:$0xff]  ;;  %v47_v62 = vld [vmem:[%s9445_s1 + $0x10] sm:$0xff]  ;;  %v145_v14 = vld [vmem:[%s9445_s1 + $0x320] sm:$0xff] }
  0x30   :  { %388 = vmatpush.msrb.mxu0 %v111_v28  ;;  %428 = vmatpush.msrb.mxu2 %v112_v30  ;;  %v175_v63 = vld [vmem:[%s9445_s1 + $0x410] sm:$0xff]  ;;  %v48_v0 = vld [vmem:[%s9445_s1 + $0x18] sm:$0xff]  ;;  %v273_v15 = vld [vmem:[%s9445_s1 + $0x720] sm:$0xff] }
  0x31   :  { %408 = vmatpush.msrb.mxu1 %v239_v29  ;;  %448 = vmatpush.msrb.mxu3 %v240_v31  ;;  %v176_v1 = vld [vmem:[%s9445_s1 + $0x418] sm:$0xff]  ;;  %v7154_v16 = vld [vmem:[%s9447_s4] ss:$2 sm:$0xff] }
  0x32   :  { %389 = vmatpush.msrb.mxu0 %v103_v32  ;;  %429 = vmatpush.msrb.mxu2 %v104_v34  ;;  %v146_v17 = vld [vmem:[%s9445_s1 + $0x328] sm:$0xff]  ;;  %v137_v19 = vld [vmem:[%s9445_s1 + $0x2e0] sm:$0xff]  ;;  %v7177_v23 = vperm.slane %v7154_v16, 1 }
  0x33   :  { %409 = vmatpush.msrb.mxu1 %v231_v33  ;;  %449 = vmatpush.msrb.mxu3 %v232_v35  ;;  %v274_v18 = vld [vmem:[%s9445_s1 + $0x728] sm:$0xff]  ;;  %v265_v20 = vld [vmem:[%s9445_s1 + $0x6e0] sm:$0xff] }
  0x34   :  { %390 = vmatpush.msrb.mxu0 %v95_v36  ;;  %430 = vmatpush.msrb.mxu2 %v96_v38  ;;  %v138_v21 = vld [vmem:[%s9445_s1 + $0x2e8] sm:$0xff]  ;;  %v129_v24 = vld [vmem:[%s9445_s1 + $0x2a0] sm:$0xff] }
  0x35   :  { %410 = vmatpush.msrb.mxu1 %v223_v37  ;;  %450 = vmatpush.msrb.mxu3 %v224_v39  ;;  %v266_v22 = vld [vmem:[%s9445_s1 + $0x6e8] sm:$0xff]  ;;  %v257_v25 = vld [vmem:[%s9445_s1 + $0x6a0] sm:$0xff]  ;;  %v7227_v39 = vperm.slane %v7154_v16, 3 }
  0x36   :  { %391 = vmatpush.msrb.mxu0 %v87_v40  ;;  %431 = vmatpush.msrb.mxu2 %v88_v42  ;;  %v130_v26 = vld [vmem:[%s9445_s1 + $0x2a8] sm:$0xff]  ;;  %v121_v28 = vld [vmem:[%s9445_s1 + $0x260] sm:$0xff] }
  0x37   :  { %411 = vmatpush.msrb.mxu1 %v215_v41  ;;  %451 = vmatpush.msrb.mxu3 %v216_v43  ;;  %v258_v27 = vld [vmem:[%s9445_s1 + $0x6a8] sm:$0xff]  ;;  %v249_v29 = vld [vmem:[%s9445_s1 + $0x660] sm:$0xff]  ;;  %v7233_v41 = vperm.slane %v7154_v16, 2 }
  0x38   :  { %392 = vmatpush.msrb.mxu0 %v79_v44  ;;  %432 = vmatpush.msrb.mxu2 %v80_v46  ;;  %v122_v30 = vld [vmem:[%s9445_s1 + $0x268] sm:$0xff]  ;;  %v113_v32 = vld [vmem:[%s9445_s1 + $0x220] sm:$0xff] }
  0x39   :  { %412 = vmatpush.msrb.mxu1 %v207_v45  ;;  %452 = vmatpush.msrb.mxu3 %v208_v47  ;;  %v250_v31 = vld [vmem:[%s9445_s1 + $0x668] sm:$0xff]  ;;  %v241_v33 = vld [vmem:[%s9445_s1 + $0x620] sm:$0xff] }
  0x3a   :  { %357 = vmatmul.f32.vlgmr.msra.gmra.mxu2 %v7048_v48  ;;  %377 = vmatmul.f32.vlgmr.msra.gmra.mxu3 %v7053_v49  ;;  %v114_v34 = vld [vmem:[%s9445_s1 + $0x228] sm:$0xff]  ;;  %v105_v36 = vld [vmem:[%s9445_s1 + $0x1e0] sm:$0xff] }
  0x3b   :  { %393 = vmatpush.msrb.mxu0 %v71_v50  ;;  %413 = vmatpush.msrb.mxu1 %v199_v51  ;;  %v242_v35 = vld [vmem:[%s9445_s1 + $0x628] sm:$0xff]  ;;  %v233_v37 = vld [vmem:[%s9445_s1 + $0x5e0] sm:$0xff] }
  0x3c   :  { %433 = vmatpush.msrb.mxu2 %v72_v52  ;;  %453 = vmatpush.msrb.mxu3 %v200_v53  ;;  %v106_v38 = vld [vmem:[%s9445_s1 + $0x1e8] sm:$0xff]  ;;  %v97_v42 = vld [vmem:[%s9445_s1 + $0x1a0] sm:$0xff] }
  0x3d   :  { %394 = vmatpush.msrb.mxu0 %v63_v54  ;;  %414 = vmatpush.msrb.mxu1 %v191_v55  ;;  %v234_v40 = vld [vmem:[%s9445_s1 + $0x5e8] sm:$0xff]  ;;  %v225_v43 = vld [vmem:[%s9445_s1 + $0x5a0] sm:$0xff] }
  0x3e   :  { %434 = vmatpush.msrb.mxu2 %v64_v56  ;;  %454 = vmatpush.msrb.mxu3 %v192_v57  ;;  %v98_v44 = vld [vmem:[%s9445_s1 + $0x1a8] sm:$0xff]  ;;  %v89_v46 = vld [vmem:[%s9445_s1 + $0x160] sm:$0xff] }
  0x3f   :  { %395 = vmatpush.msrb.mxu0 %v55_v58  ;;  %415 = vmatpush.msrb.mxu1 %v183_v59  ;;  %v226_v45 = vld [vmem:[%s9445_s1 + $0x5a8] sm:$0xff]  ;;  %v217_v47 = vld [vmem:[%s9445_s1 + $0x560] sm:$0xff] }
  0x40   :  { %435 = vmatpush.msrb.mxu2 %v56_v60  ;;  %455 = vmatpush.msrb.mxu3 %v184_v61  ;;  %v90_v50 = vld [vmem:[%s9445_s1 + $0x168] sm:$0xff]  ;;  %v81_v52 = vld [vmem:[%s9445_s1 + $0x120] sm:$0xff] }
  0x41   :  { %317 = vmatmul.f32.vlgmr.msra.gmra.mxu0 %v7048_v48  ;;  %337 = vmatmul.f32.vlgmr.msra.gmra.mxu1 %v7053_v49  ;;  %v218_v51 = vld [vmem:[%s9445_s1 + $0x568] sm:$0xff]  ;;  %v209_v53 = vld [vmem:[%s9445_s1 + $0x520] sm:$0xff] }
  0x42   :  { %396 = vmatpush.msrb.mxu0 %v47_v62  ;;  %416 = vmatpush.msrb.mxu1 %v175_v63  ;;  %v82_v54 = vld [vmem:[%s9445_s1 + $0x128] sm:$0xff]  ;;  %v73_v56 = vld [vmem:[%s9445_s1 + $0xe0] sm:$0xff] }
  0x43   :  { %436 = vmatpush.msrb.mxu2 %v48_v0  ;;  %456 = vmatpush.msrb.mxu3 %v176_v1  ;;  %v210_v55 = vld [vmem:[%s9445_s1 + $0x528] sm:$0xff]  ;;  %v201_v57 = vld [vmem:[%s9445_s1 + $0x4e0] sm:$0xff] }
  0x44   :  { %437 = vmatmul.f32.vlgmr.msrb.gmra.mxu2 %v7048_v48  ;;  %457 = vmatmul.f32.vlgmr.msrb.gmra.mxu3 %v7053_v49  ;;  %v74_v58 = vld [vmem:[%s9445_s1 + $0xe8] sm:$0xff]  ;;  %v65_v60 = vld [vmem:[%s9445_s1 + $0xa0] sm:$0xff] }
  0x45   :  { %461 = vmatpush.msra.mxu0 %v169_v2  ;;  %481 = vmatpush.msra.mxu1 %v297_v3  ;;  %v202_v59 = vld [vmem:[%s9445_s1 + $0x4e8] sm:$0xff]  ;;  %v193_v61 = vld [vmem:[%s9445_s1 + $0x4a0] sm:$0xff] }
  0x46   :  { %501 = vmatpush.msra.mxu2 %v170_v4  ;;  %521 = vmatpush.msra.mxu3 %v298_v5  ;;  %v66_v62 = vld [vmem:[%s9445_s1 + $0xa8] sm:$0xff]  ;;  %v57_v0 = vld [vmem:[%s9445_s1 + $0x60] sm:$0xff] }
  0x47   :  { %462 = vmatpush.msra.mxu0 %v161_v6  ;;  %482 = vmatpush.msra.mxu1 %v289_v7  ;;  %v194_v63 = vld [vmem:[%s9445_s1 + $0x4a8] sm:$0xff]  ;;  %v185_v1 = vld [vmem:[%s9445_s1 + $0x460] sm:$0xff] }
  0x48   :  { %502 = vmatpush.msra.mxu2 %v162_v8  ;;  %522 = vmatpush.msra.mxu3 %v290_v9  ;;  %v58_v2 = vld [vmem:[%s9445_s1 + $0x68] sm:$0xff]  ;;  %v49_v4 = vld [vmem:[%s9445_s1 + $0x20] sm:$0xff]  ;;  %v172_v8 = vld [vmem:[%s9445_s1 + $0x3f8] sm:$0xff] }
  0x49   :  { %463 = vmatpush.msra.mxu0 %v153_v10  ;;  %483 = vmatpush.msra.mxu1 %v281_v11  ;;  %v186_v3 = vld [vmem:[%s9445_s1 + $0x468] sm:$0xff]  ;;  %v177_v5 = vld [vmem:[%s9445_s1 + $0x420] sm:$0xff]  ;;  %v300_v9 = vld [vmem:[%s9445_s1 + $0x7f8] sm:$0xff] }
  0x4a   :  { %503 = vmatpush.msra.mxu2 %v154_v12  ;;  %523 = vmatpush.msra.mxu3 %v282_v13  ;;  %v50_v6 = vld [vmem:[%s9445_s1 + $0x28] sm:$0xff]  ;;  %v171_v10 = vld [vmem:[%s9445_s1 + $0x3f0] sm:$0xff]  ;;  %v164_v11 = vld [vmem:[%s9445_s1 + $0x3b8] sm:$0xff] }
  0x4b   :  { %397 = vmatmul.f32.vlgmr.msrb.gmra.mxu0 %v7048_v48  ;;  %417 = vmatmul.f32.vlgmr.msrb.gmra.mxu1 %v7053_v49  ;;  %v178_v7 = vld [vmem:[%s9445_s1 + $0x428] sm:$0xff]  ;;  %v299_v12 = vld [vmem:[%s9445_s1 + $0x7f0] sm:$0xff]  ;;  %v292_v13 = vld [vmem:[%s9445_s1 + $0x7b8] sm:$0xff] }
  0x4c   :  { %464 = vmatpush.msra.mxu0 %v145_v14  ;;  %484 = vmatpush.msra.mxu1 %v273_v15  ;;  %v163_v14 = vld [vmem:[%s9445_s1 + $0x3b0] sm:$0xff]  ;;  %v156_v15 = vld [vmem:[%s9445_s1 + $0x378] sm:$0xff] }
  0x4d   :  { %504 = vmatpush.msra.mxu2 %v146_v17  ;;  %524 = vmatpush.msra.mxu3 %v274_v18  ;;  %v291_v17 = vld [vmem:[%s9445_s1 + $0x7b0] sm:$0xff]  ;;  %v7355_v18 = vperm.slane %v7154_v16, 4 }
  0x4e   :  { %465 = vmatpush.msra.mxu0 %v137_v19  ;;  %485 = vmatpush.msra.mxu1 %v265_v20  ;;  %v284_v19 = vld [vmem:[%s9445_s1 + $0x778] sm:$0xff] }
  0x4f   :  { %505 = vmatpush.msra.mxu2 %v138_v21  ;;  %525 = vmatpush.msra.mxu3 %v266_v22  ;;  %v148_v20 = vld [vmem:[%s9445_s1 + $0x338] sm:$0xff]  ;;  %v155_v21 = vld [vmem:[%s9445_s1 + $0x370] sm:$0xff] }
  0x50   :  { %649 = vrot.lane.b32.xlu0 %v7177_v23, %s6639_s21  ;;  %466 = vmatpush.msra.mxu0 %v129_v24  ;;  %v276_v22 = vld [vmem:[%s9445_s1 + $0x738] sm:$0xff]  ;;  %v283_v24 = vld [vmem:[%s9445_s1 + $0x770] sm:$0xff] }
  0x51   :  { %486 = vmatpush.msra.mxu1 %v257_v25  ;;  %506 = vmatpush.msra.mxu2 %v130_v26  ;;  %v140_v25 = vld [vmem:[%s9445_s1 + $0x2f8] sm:$0xff]  ;;  %v147_v26 = vld [vmem:[%s9445_s1 + $0x330] sm:$0xff] }
  0x52   :  { %526 = vmatpush.msra.mxu3 %v258_v27  ;;  %467 = vmatpush.msra.mxu0 %v121_v28  ;;  %v268_v27 = vld [vmem:[%s9445_s1 + $0x6f8] sm:$0xff]  ;;  %v275_v28 = vld [vmem:[%s9445_s1 + $0x730] sm:$0xff] }
  0x53   :  { %487 = vmatpush.msra.mxu1 %v249_v29  ;;  %507 = vmatpush.msra.mxu2 %v122_v30  ;;  %v132_v29 = vld [vmem:[%s9445_s1 + $0x2b8] sm:$0xff]  ;;  %v139_v30 = vld [vmem:[%s9445_s1 + $0x2f0] sm:$0xff] }
  0x54   :  { %527 = vmatpush.msra.mxu3 %v250_v31  ;;  %468 = vmatpush.msra.mxu0 %v113_v32  ;;  %v260_v31 = vld [vmem:[%s9445_s1 + $0x6b8] sm:$0xff]  ;;  %v267_v32 = vld [vmem:[%s9445_s1 + $0x6f0] sm:$0xff] }
  0x55   :  { %488 = vmatpush.msra.mxu1 %v241_v33  ;;  %508 = vmatpush.msra.mxu2 %v114_v34  ;;  %v124_v33 = vld [vmem:[%s9445_s1 + $0x278] sm:$0xff]  ;;  %v131_v34 = vld [vmem:[%s9445_s1 + $0x2b0] sm:$0xff] }
  0x56   :  { %528 = vmatpush.msra.mxu3 %v242_v35  ;;  %469 = vmatpush.msra.mxu0 %v105_v36  ;;  %v252_v35 = vld [vmem:[%s9445_s1 + $0x678] sm:$0xff]  ;;  %v259_v36 = vld [vmem:[%s9445_s1 + $0x6b0] sm:$0xff] }
  0x57   :  { %489 = vmatpush.msra.mxu1 %v233_v37  ;;  %509 = vmatpush.msra.mxu2 %v106_v38  ;;  %v7411_v37 = vperm.slane %v7154_v16, 5  ;;  %v116_v38 = vld [vmem:[%s9445_s1 + $0x238] sm:$0xff] }
  0x58   :  { %529 = vmatpush.msra.mxu3 %v234_v40  ;;  %653 = vrot.lane.b32.xlu1 %v7227_v39, %s6639_s21  ;;  %v244_v40 = vld [vmem:[%s9445_s1 + $0x638] sm:$0xff] }
  0x59   :  { %651 = vrot.lane.b32.xlu0 %v7233_v41, %s6639_s21  ;;  %470 = vmatpush.msra.mxu0 %v97_v42  ;;  %v123_v42 = vld [vmem:[%s9445_s1 + $0x270] sm:$0xff] }
  0x5a   :  { %490 = vmatpush.msra.mxu1 %v225_v43  ;;  %510 = vmatpush.msra.mxu2 %v98_v44  ;;  %v108_v43 = vld [vmem:[%s9445_s1 + $0x1f8] sm:$0xff]  ;;  %v251_v44 = vld [vmem:[%s9445_s1 + $0x670] sm:$0xff] }
  0x5b   :  { %530 = vmatpush.msra.mxu3 %v226_v45  ;;  %471 = vmatpush.msra.mxu0 %v89_v46  ;;  %v236_v45 = vld [vmem:[%s9445_s1 + $0x5f8] sm:$0xff]  ;;  %v115_v46 = vld [vmem:[%s9445_s1 + $0x230] sm:$0xff] }
  0x5c   :  { %491 = vmatpush.msra.mxu1 %v217_v47  ;;  %511 = vmatpush.msra.mxu2 %v90_v50  ;;  %v100_v47 = vld [vmem:[%s9445_s1 + $0x1b8] sm:$0xff]  ;;  %v243_v50 = vld [vmem:[%s9445_s1 + $0x630] sm:$0xff] }
  0x5d   :  { %531 = vmatpush.msra.mxu3 %v218_v51  ;;  %472 = vmatpush.msra.mxu0 %v81_v52  ;;  %v228_v51 = vld [vmem:[%s9445_s1 + $0x5b8] sm:$0xff]  ;;  %v107_v52 = vld [vmem:[%s9445_s1 + $0x1f0] sm:$0xff] }
  0x5e   :  { %492 = vmatpush.msra.mxu1 %v209_v53  ;;  %512 = vmatpush.msra.mxu2 %v82_v54  ;;  %v92_v53 = vld [vmem:[%s9445_s1 + $0x178] sm:$0xff]  ;;  %v235_v54 = vld [vmem:[%s9445_s1 + $0x5f0] sm:$0xff] }
  0x5f   :  { %532 = vmatpush.msra.mxu3 %v210_v55  ;;  %473 = vmatpush.msra.mxu0 %v73_v56  ;;  %v220_v55 = vld [vmem:[%s9445_s1 + $0x578] sm:$0xff]  ;;  %v99_v56 = vld [vmem:[%s9445_s1 + $0x1b0] sm:$0xff] }
  0x60   :  { %493 = vmatpush.msra.mxu1 %v201_v57  ;;  %513 = vmatpush.msra.mxu2 %v74_v58  ;;  %v84_v57 = vld [vmem:[%s9445_s1 + $0x138] sm:$0xff]  ;;  %v227_v58 = vld [vmem:[%s9445_s1 + $0x5b0] sm:$0xff] }
  0x61   :  { %533 = vmatpush.msra.mxu3 %v202_v59  ;;  %474 = vmatpush.msra.mxu0 %v65_v60  ;;  %v212_v59 = vld [vmem:[%s9445_s1 + $0x538] sm:$0xff]  ;;  %v91_v60 = vld [vmem:[%s9445_s1 + $0x170] sm:$0xff] }
  0x62   :  { %494 = vmatpush.msra.mxu1 %v193_v61  ;;  %514 = vmatpush.msra.mxu2 %v66_v62  ;;  %v76_v61 = vld [vmem:[%s9445_s1 + $0xf8] sm:$0xff]  ;;  %v219_v62 = vld [vmem:[%s9445_s1 + $0x570] sm:$0xff] }
  0x63   :  { %534 = vmatpush.msra.mxu3 %v194_v63  ;;  %475 = vmatpush.msra.mxu0 %v57_v0  ;;  %v204_v63 = vld [vmem:[%s9445_s1 + $0x4f8] sm:$0xff]  ;;  %v83_v0 = vld [vmem:[%s9445_s1 + $0x130] sm:$0xff] }
  0x64   :  { %495 = vmatpush.msra.mxu1 %v185_v1  ;;  %515 = vmatpush.msra.mxu2 %v58_v2  ;;  %v68_v1 = vld [vmem:[%s9445_s1 + $0xb8] sm:$0xff]  ;;  %v211_v2 = vld [vmem:[%s9445_s1 + $0x530] sm:$0xff] }
  0x65   :  { %535 = vmatpush.msra.mxu3 %v186_v3  ;;  %476 = vmatpush.msra.mxu0 %v49_v4  ;;  %v7491_v3 = vperm.slane %v7154_v16, 0  ;;  %v196_v4 = vld [vmem:[%s9445_s1 + $0x4b8] sm:$0xff] }
  0x66   :  { %496 = vmatpush.msra.mxu1 %v177_v5  ;;  %516 = vmatpush.msra.mxu2 %v50_v6  ;;  %v60_v5 = vld [vmem:[%s9445_s1 + $0x78] sm:$0xff]  ;;  %v75_v6 = vld [vmem:[%s9445_s1 + $0xf0] sm:$0xff] }
  0x67   :  { %536 = vmatpush.msra.mxu3 %v178_v7  ;;  %477 = vmatmul.f32.vlgmr.msra.gmra.mxu0 %v7048_v48  ;;  %v188_v7 = vld [vmem:[%s9445_s1 + $0x478] sm:$0xff] }
  0x68   :  { %497 = vmatmul.f32.vlgmr.msra.gmra.mxu1 %v7053_v49  ;;  %517 = vmatmul.f32.vlgmr.msra.gmra.mxu2 %v7048_v48 }
  0x69   :  { %537 = vmatmul.f32.vlgmr.msra.gmra.mxu3 %v7053_v49  ;;  %581 = vmatpush.msrb.mxu2 %v172_v8  ;;  %v203_v8 = vld [vmem:[%s9445_s1 + $0x4f0] sm:$0xff] }
  0x6a   :  { %601 = vmatpush.msrb.mxu3 %v300_v9  ;;  %541 = vmatpush.msrb.mxu0 %v171_v10  ;;  %v52_v9 = vld [vmem:[%s9445_s1 + $0x38] sm:$0xff]  ;;  %v67_v10 = vld [vmem:[%s9445_s1 + $0xb0] sm:$0xff] }
  0x6b   :  { %582 = vmatpush.msrb.mxu2 %v164_v11  ;;  %561 = vmatpush.msrb.mxu1 %v299_v12  ;;  %v180_v11 = vld [vmem:[%s9445_s1 + $0x438] sm:$0xff]  ;;  %v195_v12 = vld [vmem:[%s9445_s1 + $0x4b0] sm:$0xff] }
  0x6c   :  { %602 = vmatpush.msrb.mxu3 %v292_v13  ;;  %542 = vmatpush.msrb.mxu0 %v163_v14  ;;  %v7523_v13 = vperm.slane %v7154_v16, 7  ;;  %v59_v14 = vld [vmem:[%s9445_s1 + $0x70] sm:$0xff] }
  0x6d   :  { %583 = vmatpush.msrb.mxu2 %v156_v15  ;;  %562 = vmatpush.msrb.mxu1 %v291_v17  ;;  %v187_v15 = vld [vmem:[%s9445_s1 + $0x470] sm:$0xff]  ;;  %v7533_v17 = vperm.slane %v7154_v16, 6 }
  0x6e   :  { %603 = vmatpush.msrb.mxu3 %v284_v19  ;;  %655 = vrot.lane.b32.xlu1 %v7355_v18, %s6639_s21  ;;  %v51_v19 = vld [vmem:[%s9445_s1 + $0x30] sm:$0xff] }
  0x6f   :  { %584 = vmatpush.msrb.mxu2 %v148_v20  ;;  %543 = vmatpush.msrb.mxu0 %v155_v21  ;;  %v179_v20 = vld [vmem:[%s9445_s1 + $0x430] sm:$0xff]  ;;  %s6640_s1 = smov 32  }
  0x70   :  { %604 = vmatpush.msrb.mxu3 %v276_v22  ;;  %563 = vmatpush.msrb.mxu1 %v283_v24 }
  0x71   :  { %585 = vmatpush.msrb.mxu2 %v140_v25  ;;  %544 = vmatpush.msrb.mxu0 %v147_v26 }
  0x72   :  { %605 = vmatpush.msrb.mxu3 %v268_v27  ;;  %564 = vmatpush.msrb.mxu1 %v275_v28 }
  0x73   :  { %586 = vmatpush.msrb.mxu2 %v132_v29  ;;  %545 = vmatpush.msrb.mxu0 %v139_v30 }
  0x74   :  { %606 = vmatpush.msrb.mxu3 %v260_v31  ;;  %565 = vmatpush.msrb.mxu1 %v267_v32 }
  0x75   :  { %587 = vmatpush.msrb.mxu2 %v124_v33  ;;  %546 = vmatpush.msrb.mxu0 %v131_v34 }
  0x76   :  { %607 = vmatpush.msrb.mxu3 %v252_v35  ;;  %566 = vmatpush.msrb.mxu1 %v259_v36 }
  0x77   :  { %588 = vmatpush.msrb.mxu2 %v116_v38  ;;  %657 = vrot.lane.b32.xlu1 %v7411_v37, %s6639_s21 }
  0x78   :  { %608 = vmatpush.msrb.mxu3 %v244_v40  ;;  %547 = vmatpush.msrb.mxu0 %v123_v42 }
  0x79   :  { %589 = vmatpush.msrb.mxu2 %v108_v43  ;;  %567 = vmatpush.msrb.mxu1 %v251_v44 }
  0x7a   :  { %609 = vmatpush.msrb.mxu3 %v236_v45  ;;  %548 = vmatpush.msrb.mxu0 %v115_v46 }
  0x7b   :  { %590 = vmatpush.msrb.mxu2 %v100_v47  ;;  %568 = vmatpush.msrb.mxu1 %v243_v50 }
  0x7c   :  { %610 = vmatpush.msrb.mxu3 %v228_v51  ;;  %549 = vmatpush.msrb.mxu0 %v107_v52 }
  0x7d   :  { %591 = vmatpush.msrb.mxu2 %v92_v53  ;;  %569 = vmatpush.msrb.mxu1 %v235_v54 }
  0x7e   :  { %611 = vmatpush.msrb.mxu3 %v220_v55  ;;  %550 = vmatpush.msrb.mxu0 %v99_v56 }
  0x7f   :  { %592 = vmatpush.msrb.mxu2 %v84_v57  ;;  %570 = vmatpush.msrb.mxu1 %v227_v58 }
  0x80   :  { %612 = vmatpush.msrb.mxu3 %v212_v59  ;;  %551 = vmatpush.msrb.mxu0 %v91_v60 }
  0x81   :  { %593 = vmatpush.msrb.mxu2 %v76_v61  ;;  %571 = vmatpush.msrb.mxu1 %v219_v62 }
  0x82   :  { %613 = vmatpush.msrb.mxu3 %v204_v63  ;;  %552 = vmatpush.msrb.mxu0 %v83_v0 }
  0x83   :  { %594 = vmatpush.msrb.mxu2 %v68_v1  ;;  %572 = vmatpush.msrb.mxu1 %v211_v2 }
  0x84   :  { %614 = vmatpush.msrb.mxu3 %v196_v4  ;;  %647 = vrot.lane.b32.xlu2 %v7491_v3, %s6639_s21 }
  0x85   :  { %595 = vmatpush.msrb.mxu2 %v60_v5  ;;  %553 = vmatpush.msrb.mxu0 %v75_v6 }
  0x86   :  { %615 = vmatpush.msrb.mxu3 %v188_v7  ;;  %573 = vmatpush.msrb.mxu1 %v203_v8 }
  0x87   :  { %596 = vmatpush.msrb.mxu2 %v52_v9  ;;  %554 = vmatpush.msrb.mxu0 %v67_v10 }
  0x88   :  { %616 = vmatpush.msrb.mxu3 %v180_v11  ;;  %597 = vmatmul.f32.vlgmr.msrb.gmra.mxu2 %v7048_v48 }
  0x89   :  { %617 = vmatmul.f32.vlgmr.msrb.gmra.mxu3 %v7053_v49  ;;  %574 = vmatpush.msrb.mxu1 %v195_v12 }
  0x8a   :  { %555 = vmatpush.msrb.mxu0 %v59_v14  ;;  %661 = vrot.lane.b32.xlu0 %v7523_v13, %s6639_s21 }
  0x8b   :  { %575 = vmatpush.msrb.mxu1 %v187_v15 }
  0x8c   :  { %556 = vmatpush.msrb.mxu0 %v51_v19  ;;  %659 = vrot.lane.b32.xlu2 %v7533_v17, %s6639_s21 }
  0x8d   :  { %576 = vmatpush.msrb.mxu1 %v179_v20  ;;  %557 = vmatmul.f32.vlgmr.msrb.gmra.mxu0 %v7048_v48 }
  0x8e   :  { %577 = vmatmul.f32.vlgmr.msrb.gmra.mxu1 %v7053_v49  ;;  %v7562_v49 = vld [vmem:[%s9447_s4 + $0x1] ss:$2 sm:$0xff]  ;;  %s6642_s4 = smov 33  }
  0x8f   :  { %v7565_v33 = vperm.slane %v7562_v49, 1  ;;  %v7572_v35 = vperm.slane %v7562_v49, 3  ;;  %v7600_v56 = vperm.slane %v7562_v49, 6  ;;  %v7603_v57 = vperm.slane %v7562_v49, 2 }
  0x90   :  { %v7610_v59 = vperm.slane %v7562_v49, 4  ;;  %v7636_v11 = vperm.slane %v7562_v49, 7  ;;  %v7652_v20 = vperm.slane %v7562_v49, 0 }
  0xbd   :  { %v358_v16 = vpop.f32.mrf.mxu2  ;;  %v378_v21 = vpop.f32.mrf.mxu3 }
  0xbe   :  { %v318_v22 = vpop.f32.mrf.mxu0  ;;  %v338_v24 = vpop.f32.mrf.mxu1  ;;  %v7548_v25 = vadd.f32 %v378_v21, %v358_v16 }
  0xbf   :  { %v7591_v52 = vadd.f32 %v338_v24, %v318_v22  ;;  %v7664_v22 = vperm.slane %v7562_v49, 5 }
  0xc2   :  { %v7569_v34 = vpop.permute.xlu0 %649 }
  0xc7   :  { %v438_v26 = vpop.f32.mrf.mxu2  ;;  %v458_v27 = vpop.f32.mrf.mxu3 }
  0xc8   :  { %v398_v28 = vpop.f32.mrf.mxu0  ;;  %v418_v29 = vpop.f32.mrf.mxu1  ;;  %v7550_v30 = vadd.f32 %v458_v27, %v438_v26 }
  0xc9   :  { %v7552_v31 = vadd.f32 %v418_v29, %v398_v28 }
  0xca   :  { %v6325_v32 = vpack.i.bf16 0.0, %v7550_v30  ;;  %v654_v36 = vpop.permute.xlu1 %653 }
  0xcb   :  { %v6320_v48 = vpack.i.bf16 %v7552_v31, %v7548_v25  ;;  %v652_v38 = vpop.permute.xlu0 %651 }
  0xcc   :  { %6326 = vrot.lane.b32.xlu0 %v6325_v32, %s6640_s1  ;;  %v7580_v44 = vsel %vm663_vm0, %v7569_v34, %v652_v38  ;;  %v7583_v45 = vsel %vm663_vm0, %v652_v38, %v654_v36 }
  0xcd   :  { %6321 = vrot.lane.b32.xlu2 %v6320_v48, %s6640_s1  ;;  %9515 = vst [vmem:[#allocation3_spill] sm:$0xff] %v7580_v44  ;;  %v682_v46 = vmul.f32 %v7580_v44, %v7548_v25  ;;  %v683_v47 = vmul.f32 %v7583_v45, %v7552_v31 }
  0xce   :  { %9516 = vst [vmem:[#allocation4_spill] sm:$0xff] %v7583_v45 }
  0xcf   :  { %v6340_v54 = vpack.i.bf16 %v683_v47, %v682_v46  ;;  %v7694_v46 = vld [vmem:[%s9448_s2 + $0x10] sm:$0xff] }
  0xd4   :  { %1174 = vrot.lane.b32.xlu0 %v7565_v33, %s6641_s20 }
  0xd5   :  { %1178 = vrot.lane.b32.xlu2 %v7572_v35, %s6641_s20 }
  0xde   :  { %v648_v61 = vpop.permute.xlu2 %647 }
  0xdf   :  { %v7619_v62 = vmul.f32 0.0, %v648_v61  ;;  %v7676_v27 = vsel %vm663_vm0, %v648_v61, %v7569_v34 }
  0xe0   :  { %v656_v58 = vpop.permute.xlu1 %655  ;;  %9523 = vst [vmem:[#allocation11_spill] sm:$0xff] %v7676_v27  ;;  %v681_v29 = vmul.f32 %v7676_v27, %v7591_v52 }
  0xe1   :  { %v7613_v60 = vsel %vm663_vm0, %v654_v36, %v656_v58  ;;  %9518 = vst [vmem:[#allocation6_spill] sm:$0xff] %v7619_v62 }
  0xe2   :  { %9517 = vst [vmem:[#allocation5_spill] sm:$0xff] %v7613_v60  ;;  %v684_v63 = vmul.f32 %v7613_v60, %v7550_v30 }
  0xe4   :  { %v478_v40 = vpop.f32.mrf.mxu0  ;;  %v6345_v0 = vpack.i.bf16 %v7619_v62, %v684_v63 }
  0xe5   :  { %v498_v42 = vpop.f32.mrf.mxu1 }
  0xe6   :  { %v7576_v43 = vadd.f32 %v498_v42, %v478_v40  ;;  %v660_v2 = vpop.permute.xlu2 %659 }
  0xe8   :  { %713 = vrot.lane.b32.xlu0 %v7576_v43, %s6640_s1 }
  0xe9   :  { %v658_v16 = vpop.permute.xlu1 %657 }
  0xea   :  { %v7661_v21 = vsel %vm663_vm0, %v656_v58, %v658_v16  ;;  %v7669_v26 = vsel %vm663_vm0, %v658_v16, %v660_v2 }
  0xeb   :  { %v518_v50 = vpop.f32.mrf.mxu2  ;;  %9521 = vst [vmem:[#allocation9_spill] sm:$0xff] %v7661_v21  ;;  %v685_v24 = vmul.f32 %v7661_v21, %v7576_v43 }
  0xec   :  { %v538_v51 = vpop.f32.mrf.mxu3  ;;  %9522 = vst [vmem:[#allocation10_spill] sm:$0xff] %v7669_v26 }
  0xed   :  { %v7593_v53 = vadd.f32 %v538_v51, %v518_v50  ;;  %v7703_v51 = vld [vmem:[%s9448_s2 + $0x18] sm:$0xff] }
  0xef   :  { %v6330_v55 = vpack.i.bf16 %v7593_v53, %v7591_v52  ;;  %v686_v28 = vmul.f32 %v7669_v26, %v7593_v53 }
  0xf0   :  { %6341 = vrot.lane.b32.xlu0 %v6340_v54, %s6642_s4 }
  0xf1   :  { %6331 = vrot.lane.b32.xlu1 %v6330_v55, %s6640_s1  ;;  %v6350_v32 = vpack.i.bf16 %v686_v28, %v681_v29 }
  0xf8   :  { %1184 = vrot.lane.b32.xlu0 %v7600_v56, %s6641_s20 }
  0xf9   :  { %1176 = vrot.lane.b32.xlu1 %v7603_v57, %s6641_s20 }
  0xfc   :  { %v7624_v1 = vpop.permute.xlu0 %661 }
  0xfd   :  { %9519 = vst [vmem:[#allocation7_spill] sm:$0xff] %v7624_v1  ;;  %v7629_v7 = vsel %vm663_vm0, %v660_v2, %v7624_v1 }
  0xfe   :  { %9520 = vst [vmem:[#allocation8_spill] sm:$0xff] %v7629_v7 }
 0x100   :  { %1473 = vrot.lane.b32.xlu0 %v7227_v39, %s6643_s22 }
 0x101   :  { %1180 = vrot.lane.b32.xlu1 %v7610_v59, %s6641_s20 }
 0x109   :  { %6346 = vrot.lane.b32.xlu1 %v6345_v0, %s6642_s4 }
 0x10a   :  { %v558_v4 = vpop.f32.mrf.mxu0 }
 0x10b   :  { %v578_v5 = vpop.f32.mrf.mxu1  ;;  %v598_v6 = vpop.f32.mrf.mxu2 }
 0x10c   :  { %v7631_v8 = vadd.f32 %v578_v5, %v558_v4  ;;  %v618_v9 = vpop.f32.mrf.mxu3 }
 0x10d   :  { %v7633_v10 = vadd.f32 %v618_v9, %v598_v6 }
 0x10e   :  { %v687_v12 = vmul.f32 %v7629_v7, %v7631_v8 }
 0x10f   :  { %v688_v14 = vmul.f32 %v7624_v1, %v7633_v10  ;;  %v7644_v15 = vpack.i.bf16 %v7633_v10, %v7631_v8 }
 0x111   :  { %6336 = vrot.lane.b32.xlu2 %v7644_v15, %s6640_s1  ;;  %1186 = vrot.lane.b32.xlu1 %v7636_v11, %s6641_s20  ;;  %v6355_v19 = vpack.i.bf16 %v688_v14, %v687_v12 }
 0x113   :  { %6356 = vrot.lane.b32.xlu0 %v6355_v19, %s6642_s4 }
 0x119   :  { %1172 = vrot.lane.b32.xlu2 %v7652_v20, %s6641_s20  ;;  %1469 = vrot.lane.b32.xlu1 %v7177_v23, %s6643_s22 }
 0x11b   :  { %1467 = vrot.lane.b32.xlu0 %v7491_v3, %s6643_s22 }
 0x121   :  { %1182 = vrot.lane.b32.xlu2 %v7664_v22, %s6641_s20  ;;  %948 = vrot.lane.b32.xlu1 %v685_v24, %s6642_s4 }
 0x123   :  { %1477 = vrot.lane.b32.xlu0 %v7411_v37, %s6643_s22 }
 0x127   :  { %v6322_v48 = vpop.permute.xlu2 %6321 }
 0x128   :  { %v6324_v49 = vunpack.i.h.bf16 %v6322_v48  ;;  %v6323_v36 = vunpack.i.l.bf16 %v6322_v48 }
 0x129   :  { %6351 = vrot.lane.b32.xlu2 %v6350_v32, %s6642_s4 }
 0x12a   :  { %v724_v38 = vsel %vm721_vm1, %v6323_v36, %v6324_v49 }
 0x12b   :  { %806 = vmatpush.msra.mxu2 %v724_v38 }
 0x12c   :  { %6028 = vmatmul.msk.f32.vlgmr.msra.gmra.mxu2 %vm738_vm2, %v7694_v46 }
 0x12f   :  { %v1179_v54 = vpop.permute.xlu2 %1178 }
 0x131   :  { %1471 = vrot.lane.b32.xlu2 %v7233_v41, %s6643_s22 }
 0x134   :  { %6029 = vmatmul.msk.f32.gmra.mxu2 %vm738_vm2, %v7703_v51 }
 0x139   :  { %1475 = vrot.lane.b32.xlu2 %v7355_v18, %s6643_s22 }
 0x13e   :  { %v6327_v34 = vpop.permute.xlu0 %6326 }
 0x13f   :  { %v6328_v40 = vunpack.i.l.bf16 %v6327_v34  ;;  %v6329_v58 = vunpack.i.h.bf16 %v6327_v34 }
 0x141   :  { %v725_v42 = vsel %vm721_vm1, %v6324_v49, %v6328_v40 }
 0x142   :  { %829 = vmatpush.msra.mxu3 %v725_v42 }
 0x143   :  { %6030 = vmatmul.msk.f32.vlgmr.msra.gmra.mxu3 %vm738_vm2, %v7694_v46 }
 0x146   :  { %v1175_v47 = vpop.permute.xlu0 %1174 }
 0x14b   :  { %6031 = vmatmul.msk.f32.gmra.mxu3 %vm738_vm2, %v7703_v51 }
 0x15a   :  { %v714_v50 = vpop.permute.xlu0 %713 }
 0x15b   :  { %v726_v5 = vsel %vm721_vm1, %v6328_v40, %v714_v50 }
 0x162   :  { %v7713_v6 = vpop.permute.xlu0 %6341 }
 0x163   :  { %v6332_v55 = vpop.permute.xlu1 %6331  ;;  %v6344_v9 = vunpack.i.h.bf16 %v7713_v6  ;;  %v6343_v12 = vunpack.i.l.bf16 %v7713_v6 }
 0x164   :  { %v6334_v61 = vunpack.i.h.bf16 %v6332_v55  ;;  %v6333_v63 = vunpack.i.l.bf16 %v6332_v55 }
 0x165   :  { %v959_v38 = vsel %vm956_vm4, %v6343_v12, %v6344_v9 }
 0x166   :  { %v722_v0 = vsel %vm721_vm1, %v6329_v58, %v6333_v63  ;;  %v723_v2 = vsel %vm721_vm1, %v6333_v63, %v6323_v36  ;;  %v727_v4 = vsel %vm721_vm1, %v714_v50, %v6334_v61 }
 0x167   :  { %760 = vmatpush.msra.mxu0 %v722_v0  ;;  %783 = vmatpush.msra.mxu1 %v723_v2 }
 0x168   :  { %6024 = vmatmul.msk.f32.vlgmr.msra.gmra.mxu0 %vm738_vm2, %v7694_v46  ;;  %6026 = vmatmul.msk.f32.vlgmr.msra.gmra.mxu1 %vm738_vm2, %v7694_v46 }
 0x169   :  { %852 = vmatpush.msrb.mxu0 %v726_v5  ;;  %875 = vmatpush.msrb.mxu1 %v727_v4 }
 0x16a   :  { %v1185_v40 = vpop.permute.xlu0 %1184 }
 0x16b   :  { %v6337_v14 = vpop.permute.xlu2 %6336  ;;  %v1177_v19 = vpop.permute.xlu1 %1176 }
 0x16c   :  { %v6339_v16 = vunpack.i.h.bf16 %v6337_v14  ;;  %v6338_v24 = vunpack.i.l.bf16 %v6337_v14  ;;  %v7722_v28 = vsel %vm1188_vm3, %v1175_v47, %v1177_v19  ;;  %v7725_v29 = vsel %vm1188_vm3, %v1177_v19, %v1179_v54 }
 0x16d   :  { %9524 = vst [vmem:[#allocation12_spill] sm:$0xff] %v7722_v28  ;;  %v1207_v32 = vmul.f32 %v7722_v28, %v7548_v25  ;;  %v1208_v48 = vmul.f32 %v7725_v29, %v7552_v31 }
 0x16e   :  { %9525 = vst [vmem:[#allocation13_spill] sm:$0xff] %v7725_v29  ;;  %v728_v49 = vsel %vm721_vm1, %v6334_v61, %v6338_v24  ;;  %v729_v36 = vsel %vm721_vm1, %v6338_v24, %v6339_v16 }
 0x16f   :  { %898 = vmatpush.msrb.mxu2 %v728_v49  ;;  %v6360_v34 = vpack.i.bf16 %v1208_v48, %v1207_v32  ;;  %921 = vmatpush.msrb.mxu3 %v729_v36 }
 0x170   :  { %6038 = vmatmul.msk.f32.vlgmr.msrb.gmra.mxu3 %vm738_vm2, %v7694_v46  ;;  %6036 = vmatmul.msk.f32.vlgmr.msrb.gmra.mxu2 %vm738_vm2, %v7694_v46 }
 0x171   :  { %1040 = vmatpush.msra.mxu2 %v959_v38  ;;  %6361 = vrot.lane.b32.xlu1 %v6360_v34, %s6644_s26 }
 0x172   :  { %6025 = vmatmul.msk.f32.gmra.mxu0 %vm738_vm2, %v7703_v51  ;;  %6027 = vmatmul.msk.f32.gmra.mxu1 %vm738_vm2, %v7703_v51  ;;  %v1474_v2 = vpop.permute.xlu0 %1473 }
 0x173   :  { %v1173_v42 = vpop.permute.xlu2 %1172  ;;  %v1181_v50 = vpop.permute.xlu1 %1180 }
 0x174   :  { %v7745_v55 = vmul.f32 0.0, %v1173_v42  ;;  %v7748_v58 = vsel %vm1188_vm3, %v1179_v54, %v1181_v50  ;;  %v7759_v0 = vsel %vm1188_vm3, %v1173_v42, %v1175_v47 }
 0x175   :  { %9527 = vst [vmem:[#allocation15_spill] sm:$0xff] %v7748_v58  ;;  %v1209_v61 = vmul.f32 %v7748_v58, %v7550_v30  ;;  %v1206_v47 = vmul.f32 %v7759_v0, %v7591_v52 }
 0x176   :  { %9526 = vst [vmem:[#allocation14_spill] sm:$0xff] %v7745_v55 }
 0x177   :  { %v6365_v63 = vpack.i.bf16 %v7745_v55, %v1209_v61  ;;  %9528 = vst [vmem:[#allocation16_spill] sm:$0xff] %v7759_v0 }
 0x178   :  { %6039 = vmatmul.msk.f32.gmra.mxu3 %vm738_vm2, %v7703_v51  ;;  %6037 = vmatmul.msk.f32.gmra.mxu2 %vm738_vm2, %v7703_v51 }
 0x179   :  { %1479 = vrot.lane.b32.xlu1 %v7533_v17, %s6643_s22  ;;  %6366 = vrot.lane.b32.xlu2 %v6365_v63, %s6644_s26 }
 0x17a   :  { %6032 = vmatmul.msk.f32.vlgmr.msrb.gmra.mxu0 %vm738_vm2, %v7694_v46  ;;  %6034 = vmatmul.msk.f32.vlgmr.msrb.gmra.mxu1 %vm738_vm2, %v7694_v46 }
 0x17b   :  { %v1183_v54 = vpop.permute.xlu2 %1182  ;;  %v6347_v4 = vpop.permute.xlu1 %6346 }
 0x17c   :  { %v7768_v5 = vsel %vm1188_vm3, %v1183_v54, %v1185_v40  ;;  %v6348_v14 = vunpack.i.l.bf16 %v6347_v4  ;;  %v6349_v48 = vunpack.i.h.bf16 %v6347_v4  ;;  %v7791_v38 = vsel %vm1188_vm3, %v1181_v50, %v1183_v54 }
 0x17d   :  { %9529 = vst [vmem:[#allocation17_spill] sm:$0xff] %v7768_v5  ;;  %v1211_v19 = vmul.f32 %v7768_v5, %v7593_v53  ;;  %v1210_v50 = vmul.f32 %v7791_v38, %v7576_v43 }
 0x17e   :  { %v960_v16 = vsel %vm956_vm4, %v6344_v9, %v6348_v14  ;;  %9532 = vst [vmem:[#allocation20_spill] sm:$0xff] %v7791_v38 }
 0x17f   :  { %1063 = vmatpush.msra.mxu3 %v960_v16  ;;  %v6370_v24 = vpack.i.bf16 %v1211_v19, %v1206_v47 }
 0x181   :  { %6371 = vrot.lane.b32.xlu0 %v6370_v24, %s6644_s26  ;;  %1481 = vrot.lane.b32.xlu2 %v7523_v13, %s6643_s22 }
 0x182   :  { %6033 = vmatmul.msk.f32.gmra.mxu0 %vm738_vm2, %v7703_v51  ;;  %6035 = vmatmul.msk.f32.gmra.mxu1 %vm738_vm2, %v7703_v51 }
 0x183   :  { %v6352_v46 = vpop.permute.xlu2 %6351  ;;  %v7782_v32 = vpop.permute.xlu1 %1186 }
 0x184   :  { %9530 = vst [vmem:[#allocation18_spill] sm:$0xff] %v7782_v32  ;;  %v6353_v49 = vunpack.i.l.bf16 %v6352_v46  ;;  %v7786_v9 = vsel %vm1188_vm3, %v1185_v40, %v7782_v32  ;;  %v1213_v36 = vmul.f32 %v7782_v32, %v7633_v10  ;;  %v6354_v34 = vunpack.i.h.bf16 %v6352_v46 }
 0x185   :  { %9531 = vst [vmem:[#allocation19_spill] sm:$0xff] %v7786_v9  ;;  %v1212_v42 = vmul.f32 %v7786_v9, %v7631_v8  ;;  %v6357_v51 = vpop.permute.xlu0 %6356 }
 0x186   :  { %v6359_v61 = vunpack.i.h.bf16 %v6357_v51  ;;  %v6358_v63 = vunpack.i.l.bf16 %v6357_v51  ;;  %v957_v4 = vsel %vm956_vm4, %v6349_v48, %v6353_v49  ;;  %v958_v40 = vsel %vm956_vm4, %v6353_v49, %v6343_v12 }
 0x187   :  { %994 = vmatpush.msra.mxu0 %v957_v4  ;;  %1017 = vmatpush.msra.mxu1 %v958_v40  ;;  %v6375_v47 = vpack.i.bf16 %v1213_v36, %v1212_v42 }
 0x188   :  { %v963_v54 = vsel %vm956_vm4, %v6354_v34, %v6358_v63  ;;  %v964_v19 = vsel %vm956_vm4, %v6358_v63, %v6359_v61 }
 0x189   :  { %1132 = vmatpush.msrb.mxu2 %v963_v54  ;;  %6376 = vrot.lane.b32.xlu1 %v6375_v47, %s6644_s26 }
 0x18a   :  { %1236 = vrot.lane.b32.xlu2 %v1210_v50, %s6644_s26  ;;  %1155 = vmatpush.msrb.mxu3 %v964_v19 }
 0x18b   :  { %v1472_v6 = vpop.permute.xlu2 %1471  ;;  %v1470_v16 = vpop.permute.xlu1 %1469 }
 0x18c   :  { %v7806_v12 = vsel %vm1483_vm5, %v1472_v6, %v1474_v2  ;;  %v7809_v24 = vsel %vm1483_vm5, %v1470_v16, %v1472_v6  ;;  %v690_v6 = vld [vmem:[%s9448_s2 + $0x8] sm:$0xff] }
 0x18d   :  { %9533 = vst [vmem:[#allocation21_spill] sm:$0xff] %v7806_v12  ;;  %v1503_v46 = vmul.f32 %v7806_v12, %v7552_v31  ;;  %v1502_v48 = vmul.f32 %v7809_v24, %v7548_v25  ;;  %v1468_v49 = vpop.permute.xlu0 %1467 }
 0x18e   :  { %9534 = vst [vmem:[#allocation22_spill] sm:$0xff] %v7809_v24  ;;  %v7816_v36 = vsel %vm1483_vm5, %v1468_v49, %v1470_v16  ;;  %v7819_v51 = vmul.f32 0.0, %v1468_v49  ;;  %v6056_v49 = vld [vmem:[%s9448_s2 + $0x20] sm:$0xff] }
 0x18f   :  { %9535 = vst [vmem:[#allocation23_spill] sm:$0xff] %v7816_v36  ;;  %v6380_v42 = vpack.i.bf16 %v1503_v46, %v1502_v48 }
 0x190   :  { %9536 = vst [vmem:[#allocation24_spill] sm:$0xff] %v7819_v51 }
 0x191   :  { %6381 = vrot.lane.b32.xlu0 %v6380_v42, %s6645_s27 }
 0x193   :  { %v1476_v61 = vpop.permute.xlu2 %1475  ;;  %v949_v63 = vpop.permute.xlu1 %948 }
 0x194   :  { %v7822_v4 = vsel %vm1483_vm5, %v1474_v2, %v1476_v61  ;;  %v961_v40 = vsel %vm956_vm4, %v6348_v14, %v949_v63  ;;  %v962_v47 = vsel %vm956_vm4, %v949_v63, %v6354_v34  ;;  %v689_v34 = vld [vmem:[%s9448_s2] sm:$0xff] }
 0x195   :  { %9537 = vst [vmem:[#allocation25_spill] sm:$0xff] %v7822_v4  ;;  %v1504_v50 = vmul.f32 %v7822_v4, %v7550_v30  ;;  %1086 = vmatpush.msrb.mxu0 %v961_v40  ;;  %1109 = vmatpush.msrb.mxu1 %v962_v47  ;;  %v1478_v19 = vpop.permute.xlu0 %1477 }
 0x196   :  { %v7833_v2 = vsel %vm1483_vm5, %v1476_v61, %v1478_v19  ;;  %6040 = vmatmul.msk.f32.vlgmr.msra.gmra.mxu0 %vm738_vm2, %v689_v34  ;;  %6042 = vmatmul.msk.f32.vlgmr.msra.gmra.mxu1 %vm738_vm2, %v689_v34 }
 0x197   :  { %v6385_v54 = vpack.i.bf16 %v7819_v51, %v1504_v50  ;;  %9538 = vst [vmem:[#allocation26_spill] sm:$0xff] %v7833_v2  ;;  %v1505_v14 = vmul.f32 %v7833_v2, %v7576_v43  ;;  %6044 = vmatmul.msk.f32.vlgmr.msra.gmra.mxu2 %vm738_vm2, %v689_v34  ;;  %6046 = vmatmul.msk.f32.vlgmr.msra.gmra.mxu3 %vm738_vm2, %v689_v34 }
 0x199   :  { %6386 = vrot.lane.b32.xlu1 %v6385_v54, %s6645_s27  ;;  %v1501_v54 = vmul.f32 %v7816_v36, %v7591_v52 }
 0x19e   :  { %6041 = vmatmul.msk.f32.gmra.mxu0 %vm738_vm2, %v690_v6  ;;  %6043 = vmatmul.msk.f32.gmra.mxu1 %vm738_vm2, %v690_v6 }
 0x19f   :  { %6045 = vmatmul.msk.f32.gmra.mxu2 %vm738_vm2, %v690_v6  ;;  %6047 = vmatmul.msk.f32.gmra.mxu3 %vm738_vm2, %v690_v6 }
 0x1a1   :  { %1982 = vrot.lane.b32.xlu1 %v7565_v33, %s6645_s27 }
 0x1a6   :  { %6048 = vmatmul.msk.f32.vlgmr.msrb.gmra.mxu0 %vm738_vm2, %v689_v34  ;;  %6050 = vmatmul.msk.f32.vlgmr.msrb.gmra.mxu1 %vm738_vm2, %v689_v34 }
 0x1a7   :  { %6052 = vmatmul.msk.f32.vlgmr.msrb.gmra.mxu2 %vm738_vm2, %v689_v34  ;;  %6054 = vmatmul.msk.f32.vlgmr.msrb.gmra.mxu3 %vm738_vm2, %v689_v34 }
 0x1a9   :  { %1531 = vrot.lane.b32.xlu1 %v1505_v14, %s6645_s27 }
 0x1ae   :  { %6049 = vmatmul.msk.f32.gmra.mxu0 %vm738_vm2, %v690_v6  ;;  %6051 = vmatmul.msk.f32.gmra.mxu1 %vm738_vm2, %v690_v6 }
 0x1af   :  { %6053 = vmatmul.msk.f32.gmra.mxu2 %vm738_vm2, %v690_v6  ;;  %6055 = vmatmul.msk.f32.gmra.mxu3 %vm738_vm2, %v690_v6 }
 0x1b1   :  { %1990 = vrot.lane.b32.xlu1 %v7664_v22, %s6645_s27 }
 0x1b9   :  { %2275 = vrot.lane.b32.xlu1 %v7177_v23, %s6644_s26 }
 0x1c1   :  { %2281 = vrot.lane.b32.xlu1 %v7355_v18, %s6644_s26 }
 0x1d3   :  { %v6367_v23 = vpop.permute.xlu2 %6366 }
 0x1d4   :  { %v6368_v16 = vunpack.i.l.bf16 %v6367_v23 }
 0x1db   :  { %v7873_v63 = vpop.permute.xlu2 %1481 }
 0x1dc   :  { %9539 = vst [vmem:[#allocation27_spill] sm:$0xff] %v7873_v63  ;;  %v1508_v14 = vmul.f32 %v7873_v63, %v7633_v10 }
 0x1e3   :  { %v6362_v18 = vpop.permute.xlu1 %6361 }
 0x1e4   :  { %v6364_v46 = vunpack.i.h.bf16 %v6362_v18  ;;  %v6363_v48 = vunpack.i.l.bf16 %v6362_v18 }
 0x1e6   :  { %v1247_v42 = vsel %vm1244_vm6, %v6363_v48, %v6364_v46  ;;  %v1248_v61 = vsel %vm1244_vm6, %v6364_v46, %v6368_v16 }
 0x1e7   :  { %1328 = vmatpush.msra.mxu2 %v1247_v42  ;;  %1351 = vmatpush.msra.mxu3 %v1248_v61  ;;  %v6369_v42 = vunpack.i.h.bf16 %v6367_v23  ;;  %v1237_v61 = vpop.permute.xlu2 %1236 }
 0x1e8   :  { %6062 = vmatmul.msk.f32.vlgmr.msra.gmra.mxu2 %vm738_vm2, %v6056_v49  ;;  %6064 = vmatmul.msk.f32.vlgmr.msra.gmra.mxu3 %vm738_vm2, %v6056_v49  ;;  %v1249_v0 = vsel %vm1244_vm6, %v6368_v16, %v1237_v61 }
 0x1eb   :  { %v1480_v40 = vpop.permute.xlu1 %1479 }
 0x1ec   :  { %v7876_v47 = vsel %vm1483_vm5, %v1478_v19, %v1480_v40  ;;  %v7880_v50 = vsel %vm1483_vm5, %v1480_v40, %v7873_v63 }
 0x1ed   :  { %9540 = vst [vmem:[#allocation28_spill] sm:$0xff] %v7876_v47  ;;  %v1506_v34 = vmul.f32 %v7876_v47, %v7593_v53  ;;  %v1507_v6 = vmul.f32 %v7880_v50, %v7631_v8 }
 0x1ee   :  { %9541 = vst [vmem:[#allocation29_spill] sm:$0xff] %v7880_v50 }
 0x1ef   :  { %v6390_v18 = vpack.i.bf16 %v1506_v34, %v1501_v54  ;;  %v6395_v46 = vpack.i.bf16 %v1508_v14, %v1507_v6 }
 0x1f1   :  { %6391 = vrot.lane.b32.xlu2 %v6390_v18, %s6645_s27  ;;  %6396 = vrot.lane.b32.xlu0 %v6395_v46, %s6645_s27 }
 0x1f3   :  { %v6372_v19 = vpop.permute.xlu0 %6371 }
 0x1f4   :  { %v6374_v40 = vunpack.i.h.bf16 %v6372_v19  ;;  %v6373_v12 = vunpack.i.l.bf16 %v6372_v19 }
 0x1f6   :  { %v1245_v24 = vsel %vm1244_vm6, %v6369_v42, %v6373_v12  ;;  %v1246_v63 = vsel %vm1244_vm6, %v6373_v12, %v6363_v48  ;;  %v1250_v5 = vsel %vm1244_vm6, %v1237_v61, %v6374_v40 }
 0x1f7   :  { %1282 = vmatpush.msra.mxu0 %v1245_v24  ;;  %1305 = vmatpush.msra.mxu1 %v1246_v63 }
 0x1f8   :  { %6058 = vmatmul.msk.f32.vlgmr.msra.gmra.mxu0 %vm738_vm2, %v6056_v49  ;;  %6060 = vmatmul.msk.f32.vlgmr.msra.gmra.mxu1 %vm738_vm2, %v6056_v49 }
 0x1f9   :  { %1374 = vmatpush.msrb.mxu0 %v1249_v0  ;;  %1397 = vmatpush.msrb.mxu1 %v1250_v5  ;;  %v6057_v0 = vld [vmem:[%s9448_s2 + $0x28] sm:$0xff] }
 0x1fa   :  { %1984 = vrot.lane.b32.xlu2 %v7603_v57, %s6645_s27  ;;  %1986 = vrot.lane.b32.xlu0 %v7572_v35, %s6645_s27 }
 0x1fb   :  { %v6377_v23 = vpop.permute.xlu1 %6376  ;;  %6063 = vmatmul.msk.f32.gmra.mxu2 %vm738_vm2, %v6057_v0  ;;  %6065 = vmatmul.msk.f32.gmra.mxu3 %vm738_vm2, %v6057_v0 }
 0x1fc   :  { %v6379_v12 = vunpack.i.h.bf16 %v6377_v23  ;;  %v6378_v48 = vunpack.i.l.bf16 %v6377_v23 }
 0x1fe   :  { %v1251_v54 = vsel %vm1244_vm6, %v6374_v40, %v6378_v48  ;;  %v1252_v24 = vsel %vm1244_vm6, %v6378_v48, %v6379_v12 }
 0x1ff   :  { %1420 = vmatpush.msrb.mxu2 %v1251_v54  ;;  %1443 = vmatpush.msrb.mxu3 %v1252_v24 }
 0x200   :  { %6059 = vmatmul.msk.f32.gmra.mxu0 %vm738_vm2, %v6057_v0  ;;  %6061 = vmatmul.msk.f32.gmra.mxu1 %vm738_vm2, %v6057_v0 }
 0x202   :  { %1988 = vrot.lane.b32.xlu2 %v7610_v59, %s6645_s27  ;;  %1980 = vrot.lane.b32.xlu0 %v7652_v20, %s6645_s27 }
 0x203   :  { %v6382_v5 = vpop.permute.xlu0 %6381  ;;  %6070 = vmatmul.msk.f32.vlgmr.msrb.gmra.mxu2 %vm738_vm2, %v6056_v49  ;;  %6072 = vmatmul.msk.f32.vlgmr.msrb.gmra.mxu3 %vm738_vm2, %v6056_v49 }
 0x204   :  { %v6384_v16 = vunpack.i.h.bf16 %v6382_v5  ;;  %v6383_v63 = vunpack.i.l.bf16 %v6382_v5 }
 0x206   :  { %v1542_v14 = vsel %vm1539_vm7, %v6383_v63, %v6384_v16 }
 0x207   :  { %1623 = vmatpush.msra.mxu2 %v1542_v14 }
 0x208   :  { %6066 = vmatmul.msk.f32.vlgmr.msrb.gmra.mxu0 %vm738_vm2, %v6056_v49  ;;  %6068 = vmatmul.msk.f32.vlgmr.msrb.gmra.mxu1 %vm738_vm2, %v6056_v49 }
 0x20a   :  { %1992 = vrot.lane.b32.xlu2 %v7600_v56, %s6645_s27  ;;  %1994 = vrot.lane.b32.xlu0 %v7636_v11, %s6645_s27 }
 0x20b   :  { %v6387_v34 = vpop.permute.xlu1 %6386  ;;  %6071 = vmatmul.msk.f32.gmra.mxu2 %vm738_vm2, %v6057_v0  ;;  %6073 = vmatmul.msk.f32.gmra.mxu3 %vm738_vm2, %v6057_v0 }
 0x20c   :  { %v6388_v6 = vunpack.i.l.bf16 %v6387_v34  ;;  %v6389_v46 = vunpack.i.h.bf16 %v6387_v34 }
 0x20e   :  { %v1543_v18 = vsel %vm1539_vm7, %v6384_v16, %v6388_v6 }
 0x20f   :  { %1646 = vmatpush.msra.mxu3 %v1543_v18 }
 0x210   :  { %6067 = vmatmul.msk.f32.gmra.mxu0 %vm738_vm2, %v6057_v0  ;;  %6069 = vmatmul.msk.f32.gmra.mxu1 %vm738_vm2, %v6057_v0 }
 0x212   :  { %2277 = vrot.lane.b32.xlu2 %v7233_v41, %s6644_s26  ;;  %2279 = vrot.lane.b32.xlu0 %v7227_v39, %s6644_s26  ;;  %v6074_v41 = vld [vmem:[%s9448_s2 + $0x30] sm:$0xff]  ;;  %v6075_v39 = vld [vmem:[%s9448_s2 + $0x38] sm:$0xff] }
 0x213   :  { %6080 = vmatmul.msk.f32.vlgmr.msra.gmra.mxu2 %vm738_vm2, %v6074_v41  ;;  %6082 = vmatmul.msk.f32.vlgmr.msra.gmra.mxu3 %vm738_vm2, %v6074_v41 }
 0x21a   :  { %2273 = vrot.lane.b32.xlu2 %v7491_v3, %s6644_s26  ;;  %v1983_v3 = vpop.permute.xlu1 %1982 }
 0x21b   :  { %6081 = vmatmul.msk.f32.gmra.mxu2 %vm738_vm2, %v6075_v39  ;;  %6083 = vmatmul.msk.f32.gmra.mxu3 %vm738_vm2, %v6075_v39 }
 0x222   :  { %2283 = vrot.lane.b32.xlu2 %v7411_v37, %s6644_s26  ;;  %v1532_v42 = vpop.permute.xlu1 %1531 }
 0x223   :  { %v1544_v12 = vsel %vm1539_vm7, %v6388_v6, %v1532_v42 }
 0x24b   :  { %v6392_v49 = vpop.permute.xlu2 %6391 }
 0x24c   :  { %v6394_v37 = vunpack.i.h.bf16 %v6392_v49  ;;  %v6393_v19 = vunpack.i.l.bf16 %v6392_v49 }
 0x24e   :  { %v1540_v61 = vsel %vm1539_vm7, %v6389_v46, %v6393_v19  ;;  %v1541_v40 = vsel %vm1539_vm7, %v6393_v19, %v6383_v63  ;;  %v1545_v23 = vsel %vm1539_vm7, %v1532_v42, %v6394_v37 }
 0x24f   :  { %1577 = vmatpush.msra.mxu0 %v1540_v61  ;;  %1600 = vmatpush.msra.mxu1 %v1541_v40 }
 0x250   :  { %6076 = vmatmul.msk.f32.vlgmr.msra.gmra.mxu0 %vm738_vm2, %v6074_v41  ;;  %6078 = vmatmul.msk.f32.vlgmr.msra.gmra.mxu1 %vm738_vm2, %v6074_v41 }
 0x251   :  { %1669 = vmatpush.msrb.mxu0 %v1544_v12  ;;  %1692 = vmatpush.msrb.mxu1 %v1545_v23 }
 0x253   :  { %1786 = vmatpush.msra.mxu0 %v7591_v52  ;;  %1809 = vmatpush.msra.mxu1 %v7548_v25 }
 0x254   :  { %v1985_v48 = vpop.permute.xlu2 %1984 }
 0x255   :  { %v7968_v14 = vsel %vm1539_vm7, %v1983_v3, %v1985_v48 }
 0x256   :  { %9542 = vst [vmem:[#allocation30_spill] sm:$0xff] %v7968_v14  ;;  %v2014_v18 = vmul.f32 %v7968_v14, %v7552_v31 }
 0x258   :  { %6077 = vmatmul.msk.f32.gmra.mxu0 %vm738_vm2, %v6075_v39  ;;  %6079 = vmatmul.msk.f32.gmra.mxu1 %vm738_vm2, %v6075_v39 }
 0x25c   :  { %v1989_v24 = vpop.permute.xlu2 %1988 }
 0x260   :  { %6084 = vmatmul.msk.f32.vlgmr.msrb.gmra.mxu0 %vm738_vm2, %v6074_v41  ;;  %6086 = vmatmul.msk.f32.vlgmr.msrb.gmra.mxu1 %vm738_vm2, %v6074_v41 }
 0x261   :  { %1878 = vmatpush.msrb.mxu0 %v7576_v43  ;;  %1901 = vmatpush.msrb.mxu1 %v7593_v53 }
 0x263   :  { %v6397_v54 = vpop.permute.xlu0 %6396 }
 0x264   :  { %v6399_v0 = vunpack.i.h.bf16 %v6397_v54  ;;  %v6398_v5 = vunpack.i.l.bf16 %v6397_v54  ;;  %v1993_v49 = vpop.permute.xlu2 %1992 }
 0x266   :  { %v1546_v16 = vsel %vm1539_vm7, %v6394_v37, %v6398_v5  ;;  %v1547_v63 = vsel %vm1539_vm7, %v6398_v5, %v6399_v0  ;;  %v1991_v37 = vpop.permute.xlu1 %1990 }
 0x267   :  { %1715 = vmatpush.msrb.mxu2 %v1546_v16  ;;  %1738 = vmatpush.msrb.mxu3 %v1547_v63  ;;  %v7987_v42 = vsel %vm1539_vm7, %v1991_v37, %v1993_v49 }
 0x268   :  { %6088 = vmatmul.msk.f32.vlgmr.msrb.gmra.mxu2 %vm738_vm2, %v6074_v41  ;;  %6090 = vmatmul.msk.f32.vlgmr.msrb.gmra.mxu3 %vm738_vm2, %v6074_v41  ;;  %9545 = vst [vmem:[#allocation33_spill] sm:$0xff] %v7987_v42 }
 0x269   :  { %1832 = vmatpush.msra.mxu2 %v7552_v31  ;;  %1855 = vmatpush.msra.mxu3 %v7550_v30 }
 0x26a   :  { %6085 = vmatmul.msk.f32.gmra.mxu0 %vm738_vm2, %v6075_v39  ;;  %6087 = vmatmul.msk.f32.gmra.mxu1 %vm738_vm2, %v6075_v39 }
 0x26b   :  { %1924 = vmatpush.msrb.mxu2 %v7631_v8  ;;  %1947 = vmatpush.msrb.mxu3 %v7633_v10 }
 0x26c   :  { %v1987_v34 = vpop.permute.xlu0 %1986  ;;  %v2278_v5 = vpop.permute.xlu2 %2277 }
 0x26d   :  { %v7975_v6 = vsel %vm1539_vm7, %v1985_v48, %v1987_v34  ;;  %v7982_v19 = vsel %vm1539_vm7, %v1987_v34, %v1989_v24  ;;  %v2018_v48 = vmul.f32 %v7987_v42, %v7631_v8 }
 0x26e   :  { %9543 = vst [vmem:[#allocation31_spill] sm:$0xff] %v7975_v6  ;;  %v2015_v41 = vmul.f32 %v7975_v6, %v7550_v30  ;;  %v2016_v40 = vmul.f32 %v7982_v19, %v7576_v43 }
 0x26f   :  { %9544 = vst [vmem:[#allocation32_spill] sm:$0xff] %v7982_v19 }
 0x270   :  { %v6400_v46 = vpack.i.bf16 %v2015_v41, %v2014_v18  ;;  %6089 = vmatmul.msk.f32.gmra.mxu2 %vm738_vm2, %v6075_v39  ;;  %6091 = vmatmul.msk.f32.gmra.mxu3 %vm738_vm2, %v6075_v39 }
 0x272   :  { %6401 = vrot.lane.b32.xlu0 %v6400_v46, %s6643_s22 }
 0x274   :  { %v7990_v61 = vpop.permute.xlu0 %1980  ;;  %v8025_v46 = vpop.permute.xlu2 %2273 }
 0x275   :  { %9546 = vst [vmem:[#allocation34_spill] sm:$0xff] %v7990_v61  ;;  %v7996_v23 = vsel %vm1539_vm7, %v7990_v61, %v1983_v3  ;;  %v2012_v12 = vmul.f32 %v7990_v61, %v7591_v52  ;;  %v8008_v3 = vpop.permute.xlu1 %2275 }
 0x276   :  { %9547 = vst [vmem:[#allocation35_spill] sm:$0xff] %v7996_v23  ;;  %v2013_v54 = vmul.f32 %v7996_v23, %v7548_v25 }
 0x277   :  { %v6405_v0 = vpack.i.bf16 %v2012_v12, %v2016_v40  ;;  %9551 = vst [vmem:[#allocation39_spill] sm:$0xff] %v8025_v46 }
 0x278   :  { %v6410_v39 = vpack.i.bf16 %v2018_v48, %v2013_v54 }
 0x279   :  { %6406 = vrot.lane.b32.xlu1 %v6405_v0, %s6643_s22  ;;  %v2305_v0 = vmul.f32 %v8025_v46, %v7591_v52 }
 0x27a   :  { %2285 = vrot.lane.b32.xlu0 %v7533_v17, %s6644_s26  ;;  %6411 = vrot.lane.b32.xlu2 %v6410_v39, %s6643_s22  ;;  %v8023_v17 = vsel %vm1244_vm6, %v8008_v3, %v2278_v5 }
 0x27b   :  { %9550 = vst [vmem:[#allocation38_spill] sm:$0xff] %v8023_v17 }
 0x27c   :  { %v1995_v16 = vpop.permute.xlu0 %1994 }
 0x27d   :  { %v8011_v63 = vsel %vm1539_vm7, %v1993_v49, %v1995_v16  ;;  %v8013_v34 = vmul.f32 0.0, %v1995_v16  ;;  %v8028_v49 = vsel %vm1539_vm7, %v1989_v24, %v1991_v37  ;;  %v2282_v40 = vpop.permute.xlu1 %2281 }
 0x27e   :  { %9548 = vst [vmem:[#allocation36_spill] sm:$0xff] %v8011_v63  ;;  %v2019_v18 = vmul.f32 %v8011_v63, %v7633_v10  ;;  %v2017_v37 = vmul.f32 %v8028_v49, %v7593_v53 }
 0x27f   :  { %9549 = vst [vmem:[#allocation37_spill] sm:$0xff] %v8013_v34 }
 0x280   :  { %v6415_v41 = vpack.i.bf16 %v8013_v34, %v2019_v18  ;;  %9552 = vst [vmem:[#allocation40_spill] sm:$0xff] %v8028_v49  ;;  %v2284_v18 = vpop.permute.xlu2 %2283 }
 0x281   :  { %2287 = vrot.lane.b32.xlu1 %v7523_v13, %s6644_s26  ;;  %v2307_v13 = vmul.f32 %v8023_v17, %v7552_v31 }
 0x282   :  { %6416 = vrot.lane.b32.xlu0 %v6415_v41, %s6643_s22  ;;  %v6092_v41 = vld [vmem:[%s9448_s2 + $0x40] sm:$0xff] }
 0x283   :  { %6098 = vmatmul.msk.f32.vlgmr.msra.gmra.mxu2 %vm738_vm2, %v6092_v41  ;;  %6100 = vmatmul.msk.f32.vlgmr.msra.gmra.mxu3 %vm738_vm2, %v6092_v41 }
 0x284   :  { %v2280_v12 = vpop.permute.xlu0 %2279  ;;  %6094 = vmatmul.msk.f32.vlgmr.msra.gmra.mxu0 %vm738_vm2, %v6092_v41  ;;  %6096 = vmatmul.msk.f32.vlgmr.msra.gmra.mxu1 %vm738_vm2, %v6092_v41 }
 0x285   :  { %v8031_v48 = vsel %vm1244_vm6, %v2278_v5, %v2280_v12  ;;  %v8034_v54 = vsel %vm1244_vm6, %v2280_v12, %v2282_v40  ;;  %v8061_v12 = vsel %vm1244_vm6, %v2282_v40, %v2284_v18 }
 0x286   :  { %9553 = vst [vmem:[#allocation41_spill] sm:$0xff] %v8031_v48  ;;  %v2308_v39 = vmul.f32 %v8031_v48, %v7550_v30  ;;  %v2309_v24 = vmul.f32 %v8034_v54, %v7576_v43 }
 0x287   :  { %9554 = vst [vmem:[#allocation42_spill] sm:$0xff] %v8034_v54 }
 0x288   :  { %v6420_v5 = vpack.i.bf16 %v2308_v39, %v2307_v13  ;;  %v6425_v16 = vpack.i.bf16 %v2305_v0, %v2309_v24  ;;  %9555 = vst [vmem:[#allocation43_spill] sm:$0xff] %v8061_v12  ;;  %v6093_v13 = vld [vmem:[%s9448_s2 + $0x48] sm:$0xff] }
 0x289   :  { %2043 = vrot.lane.b32.xlu1 %v2017_v37, %s6643_s22 }
 0x28a   :  { %6421 = vrot.lane.b32.xlu2 %v6420_v5, %s6641_s20  ;;  %6426 = vrot.lane.b32.xlu0 %v6425_v16, %s6641_s20 }
 0x28b   :  { %6099 = vmatmul.msk.f32.gmra.mxu2 %vm738_vm2, %v6093_v13  ;;  %6101 = vmatmul.msk.f32.gmra.mxu3 %vm738_vm2, %v6093_v13 }
 0x28c   :  { %6095 = vmatmul.msk.f32.gmra.mxu0 %vm738_vm2, %v6093_v13  ;;  %6097 = vmatmul.msk.f32.gmra.mxu1 %vm738_vm2, %v6093_v13 }
 0x292   :  { %2821 = vrot.lane.b32.xlu0 %v7565_v33, %s6642_s4  ;;  %2825 = vrot.lane.b32.xlu2 %v7572_v35, %s6642_s4  ;;  %v2310_v33 = vmul.f32 %v8061_v12, %v7593_v53  ;;  %v6440_v35 = vpack.i.bf16 %v7550_v30, %v7552_v31 }
 0x293   :  { %6106 = vmatmul.msk.f32.vlgmr.msrb.gmra.mxu2 %vm738_vm2, %v6092_v41  ;;  %6108 = vmatmul.msk.f32.vlgmr.msrb.gmra.mxu3 %vm738_vm2, %v6092_v41 }
 0x294   :  { %6102 = vmatmul.msk.f32.vlgmr.msrb.gmra.mxu0 %vm738_vm2, %v6092_v41  ;;  %6104 = vmatmul.msk.f32.vlgmr.msrb.gmra.mxu1 %vm738_vm2, %v6092_v41 }
 0x29a   :  { %2336 = vrot.lane.b32.xlu0 %v2310_v33, %s6641_s20 }
 0x29b   :  { %6107 = vmatmul.msk.f32.gmra.mxu2 %vm738_vm2, %v6093_v13  ;;  %6109 = vmatmul.msk.f32.gmra.mxu3 %vm738_vm2, %v6093_v13 }
 0x29c   :  { %6103 = vmatmul.msk.f32.gmra.mxu0 %vm738_vm2, %v6093_v13  ;;  %6105 = vmatmul.msk.f32.gmra.mxu1 %vm738_vm2, %v6093_v13 }
 0x2a2   :  { %6441 = vrot.lane.b32.xlu0 %v6440_v35, %s6646_s29 }
 0x2aa   :  { %2831 = vrot.lane.b32.xlu0 %v7600_v56, %s6642_s4  ;;  %v8091_v56 = vld [vmem:[%s9448_s2 + $0x50] sm:$0xff] }
 0x2b2   :  { %6451 = vrot.lane.b32.xlu0 %v7644_v15, %s6646_s29  ;;  %v8102_v15 = vsel %vm1244_vm6, %v8025_v46, %v8008_v3  ;;  %v6111_v3 = vld [vmem:[%s9448_s2 + $0x58] sm:$0xff] }
 0x2b3   :  { %9556 = vst [vmem:[#allocation44_spill] sm:$0xff] %v8102_v15 }
 0x2d4   :  { %v6412_v40 = vpop.permute.xlu2 %6411 }
 0x2d5   :  { %v6413_v39 = vunpack.i.l.bf16 %v6412_v40 }
 0x2e4   :  { %v6402_v0 = vpop.permute.xlu0 %6401 }
 0x2e5   :  { %v6404_v24 = vunpack.i.h.bf16 %v6402_v0  ;;  %v6403_v37 = vunpack.i.l.bf16 %v6402_v0 }
 0x2e7   :  { %v2052_v5 = vsel %vm1483_vm5, %v6413_v39, %v6403_v37  ;;  %v2053_v16 = vsel %vm1483_vm5, %v6403_v37, %v6404_v24  ;;  %v2306_v37 = vmul.f32 %v8102_v15, %v7548_v25 }
 0x2e8   :  { %2111 = vmatpush.msra.mxu1 %v2052_v5  ;;  %2134 = vmatpush.msra.mxu2 %v2053_v16 }
 0x2e9   :  { %6116 = vmatmul.msk.f32.vlgmr.msra.gmra.mxu2 %vm738_vm2, %v8091_v56  ;;  %6114 = vmatmul.msk.f32.vlgmr.msra.gmra.mxu1 %vm738_vm2, %v8091_v56 }
 0x2eb   :  { %v6407_v41 = vpop.permute.xlu1 %6406 }
 0x2ec   :  { %v6409_v33 = vunpack.i.h.bf16 %v6407_v41  ;;  %v6408_v13 = vunpack.i.l.bf16 %v6407_v41  ;;  %v2286_v35 = vpop.permute.xlu0 %2285 }
 0x2ed   :  { %v8105_v0 = vsel %vm1244_vm6, %v2284_v18, %v2286_v35 }
 0x2ee   :  { %9557 = vst [vmem:[#allocation45_spill] sm:$0xff] %v8105_v0  ;;  %v2311_v5 = vmul.f32 %v8105_v0, %v7631_v8  ;;  %v2051_v16 = vsel %vm1483_vm5, %v6409_v33, %v6413_v39  ;;  %v2054_v49 = vsel %vm1483_vm5, %v6404_v24, %v6408_v13  ;;  %v8123_v39 = vpop.permute.xlu2 %6421 }
 0x2ef   :  { %2088 = vmatpush.msra.mxu0 %v2051_v16  ;;  %2157 = vmatpush.msra.mxu3 %v2054_v49  ;;  %v6414_v16 = vunpack.i.h.bf16 %v6412_v40  ;;  %v6424_v15 = vunpack.i.h.bf16 %v8123_v39  ;;  %v9468_v19 = vunpack.i.l.bf16 %v8123_v39  ;;  %v9569_v32 = vunpack.i.l.bf16 %v8123_v39 }
 0x2f0   :  { %6118 = vmatmul.msk.f32.vlgmr.msra.gmra.mxu3 %vm738_vm2, %v8091_v56  ;;  %v6430_v18 = vpack.i.bf16 %v2311_v5, %v2306_v37  ;;  %6112 = vmatmul.msk.f32.vlgmr.msra.gmra.mxu0 %vm738_vm2, %v8091_v56 }
 0x2f1   :  { %6117 = vmatmul.msk.f32.gmra.mxu2 %vm738_vm2, %v6111_v3  ;;  %6115 = vmatmul.msk.f32.gmra.mxu1 %vm738_vm2, %v6111_v3  ;;  %v2346_v40 = vsel %vm1188_vm3, %v9468_v19, %v6424_v15 }
 0x2f2   :  { %6431 = vrot.lane.b32.xlu1 %v6430_v18, %s6641_s20 }
 0x2f3   :  { %v2288_v24 = vpop.permute.xlu1 %2287 }
 0x2f4   :  { %v8126_v41 = vsel %vm1244_vm6, %v2286_v35, %v2288_v24  ;;  %v8128_v49 = vmul.f32 0.0, %v2288_v24  ;;  %v6417_v33 = vpop.permute.xlu0 %6416 }
 0x2f5   :  { %9558 = vst [vmem:[#allocation46_spill] sm:$0xff] %v8126_v41  ;;  %v2312_v37 = vmul.f32 %v8126_v41, %v7633_v10  ;;  %v6419_v5 = vunpack.i.h.bf16 %v6417_v33  ;;  %v6418_v0 = vunpack.i.l.bf16 %v6417_v33 }
 0x2f6   :  { %9559 = vst [vmem:[#allocation47_spill] sm:$0xff] %v8128_v49  ;;  %v8237_v41 = vpop.permute.xlu2 %2825 }
 0x2f7   :  { %v6435_v18 = vpack.i.bf16 %v8128_v49, %v2312_v37  ;;  %v2057_v61 = vsel %vm1483_vm5, %v6414_v16, %v6418_v0  ;;  %v2058_v35 = vsel %vm1483_vm5, %v6418_v0, %v6419_v5  ;;  %v8157_v5 = vpop.f32.mrf.mxu0 }
 0x2f8   :  { %6119 = vmatmul.msk.f32.gmra.mxu3 %vm738_vm2, %v6111_v3  ;;  %2226 = vmatpush.msrb.mxu2 %v2057_v61 }
 0x2f9   :  { %2249 = vmatpush.msrb.mxu3 %v2058_v35  ;;  %6436 = vrot.lane.b32.xlu2 %v6435_v18, %s6641_s20  ;;  %v6647_v35 = vmov 0.0  }
 0x2fa   :  { %6124 = vmatmul.msk.f32.vlgmr.msrb.gmra.mxu2 %vm738_vm2, %v8091_v56  ;;  %2823 = vrot.lane.b32.xlu1 %v7603_v57, %s6642_s4 }
 0x2fb   :  { %2427 = vmatpush.msra.mxu2 %v2346_v40  ;;  %v2044_v24 = vpop.permute.xlu1 %2043  ;;  %6113 = vmatmul.msk.f32.gmra.mxu0 %vm738_vm2, %v6111_v3 }
 0x2fc   :  { %v2055_v0 = vsel %vm1483_vm5, %v6408_v13, %v2044_v24  ;;  %v2056_v61 = vsel %vm1483_vm5, %v2044_v24, %v6414_v16  ;;  %v8149_v33 = vpop.permute.xlu0 %6426  ;;  %v8174_v13 = vpop.f32.mrf.mxu2  ;;  %v8193_v16 = vld [vmem:[%s9448_s2 + $0x68] sm:$0xff] }
 0x2fd   :  { %v9467_v37 = vunpack.i.l.bf16 %v8149_v33  ;;  %2180 = vmatpush.msrb.mxu0 %v2055_v0  ;;  %2203 = vmatpush.msrb.mxu1 %v2056_v61  ;;  %v8217_v0 = vpop.f32.mrf.mxu1  ;;  %v6429_v38 = vunpack.i.h.bf16 %v8149_v33  ;;  %v9570_v28 = vunpack.i.l.bf16 %v8149_v33 }
 0x2fe   :  { %6122 = vmatmul.msk.f32.vlgmr.msrb.gmra.mxu1 %vm738_vm2, %v8091_v56 }
 0x2ff   :  { %v2347_v57 = vsel %vm1188_vm3, %v6424_v15, %v9467_v37  ;;  %v8172_v15 = vld [vmem:[%s9448_s2 + $0x60] sm:$0xff] }
 0x300   :  { %6126 = vmatmul.msk.f32.vlgmr.msrb.gmra.mxu3 %vm738_vm2, %v8091_v56 }
 0x301   :  { %2450 = vmatpush.msra.mxu3 %v2347_v57  ;;  %2819 = vrot.lane.b32.xlu2 %v7652_v20, %s6642_s4  ;;  %v8179_v20 = vpop.f32.mrf.mxu0 }
 0x302   :  { %6125 = vmatmul.msk.f32.gmra.mxu2 %vm738_vm2, %v6111_v3  ;;  %2827 = vrot.lane.b32.xlu1 %v7610_v59, %s6642_s4  ;;  %v8186_v59 = vpop.f32.mrf.mxu3 }
 0x303   :  { %6120 = vmatmul.msk.f32.vlgmr.msrb.gmra.mxu0 %vm738_vm2, %v8091_v56  ;;  %v6445_v56 = vpack.i.bf16 %v7548_v25, %v7591_v52 }
 0x305   :  { %v8221_v61 = vpop.f32.mrf.mxu1 }
 0x306   :  { %6123 = vmatmul.msk.f32.gmra.mxu1 %vm738_vm2, %v6111_v3 }
 0x308   :  { %6127 = vmatmul.msk.f32.gmra.mxu3 %vm738_vm2, %v6111_v3 }
 0x309   :  { %2829 = vrot.lane.b32.xlu2 %v7664_v22, %s6642_s4  ;;  %v8198_v22 = vpop.f32.mrf.mxu2 }
 0x30a   :  { %6134 = vmatmul.msk.f32.vlgmr.msra.gmra.mxu2 %vm738_vm2, %v8172_v15  ;;  %2586 = vrot.lane.b32.xlu1 %v7576_v43, %s6646_s29  ;;  %v8206_v18 = vpop.f32.mrf.mxu3 }
 0x30b   :  { %6121 = vmatmul.msk.f32.gmra.mxu0 %vm738_vm2, %v6111_v3  ;;  %v8204_v3 = vpop.f32.mrf.mxu0 }
 0x30d   :  { %v8227_v37 = vpop.f32.mrf.mxu1 }
 0x30e   :  { %9560 = vst [vmem:[#allocation48_spill] sm:$0xff] %v8227_v37 }
 0x310   :  { %6136 = vmatmul.msk.f32.vlgmr.msra.gmra.mxu3 %vm738_vm2, %v8172_v15 }
 0x311   :  { %6446 = vrot.lane.b32.xlu2 %v6445_v56, %s6646_s29  ;;  %v8225_v56 = vpop.permute.xlu0 %2821  ;;  %v8229_v19 = vpop.f32.mrf.mxu2 }
 0x312   :  { %6135 = vmatmul.msk.f32.gmra.mxu2 %vm738_vm2, %v8193_v16  ;;  %2833 = vrot.lane.b32.xlu1 %v7636_v11, %s6642_s4  ;;  %9561 = vst [vmem:[#allocation49_spill] sm:$0xff] %v8229_v19  ;;  %v8235_v49 = vpop.f32.mrf.mxu3 }
 0x313   :  { %v8213_v40 = vpop.f32.mrf.mxu0  ;;  %9563 = vst [vmem:[#allocation51_spill] sm:$0xff] %v8235_v49 }
 0x315   :  { %v8233_v12 = vpop.f32.mrf.mxu1 }
 0x316   :  { %9562 = vst [vmem:[#allocation50_spill] sm:$0xff] %v8233_v12 }
 0x318   :  { %6137 = vmatmul.msk.f32.gmra.mxu3 %vm738_vm2, %v8193_v16 }
 0x319   :  { %2588 = vrot.lane.b32.xlu2 %v7593_v53, %s6646_s29  ;;  %v8239_v54 = vpop.f32.mrf.mxu2 }
 0x31a   :  { %2594 = vrot.lane.b32.xlu1 %v6647_v35, %s6646_s29  ;;  %v2337_v35 = vpop.permute.xlu0 %2336  ;;  %9564 = vst [vmem:[#allocation52_spill] sm:$0xff] %v8239_v54  ;;  %v8247_v48 = vpop.f32.mrf.mxu3 }
 0x31b   :  { %v8215_v24 = vpop.f32.mrf.mxu0  ;;  %9565 = vst [vmem:[#allocation53_spill] sm:$0xff] %v8247_v48  ;;  %v2348_v1 = vsel %vm1188_vm3, %v9570_v28, %v2337_v35 }
 0x31d   :  { %v8245_v34 = vpop.f32.mrf.mxu1 }
 0x321   :  { %v8250_v26 = vpop.f32.mrf.mxu2 }
 0x322   :  { %v8243_v21 = vpop.permute.xlu0 %6441 }
 0x323   :  { %v8219_v11 = vpop.f32.mrf.mxu0 }
 0x325   :  { %v8260_v2 = vpop.f32.mrf.mxu1 }
 0x329   :  { %v8276_v47 = vpop.f32.mrf.mxu2 }
 0x32a   :  { %v8256_v6 = vpop.permute.xlu0 %2831 }
 0x32b   :  { %v8223_v57 = vpop.f32.mrf.mxu0 }
 0x332   :  { %v8281_v4 = vpop.permute.xlu0 %6451 }
 0x333   :  { %v8231_v50 = vpop.f32.mrf.mxu0  ;;  %v6454_v29 = vunpack.i.h.bf16 %v8281_v4 }
 0x33b   :  { %v8241_v46 = vpop.f32.mrf.mxu0 }
 0x343   :  { %v8254_v27 = vpop.f32.mrf.mxu0 }
 0x353   :  { %v6437_v17 = vpop.permute.xlu2 %6436 }
 0x354   :  { %v6439_v63 = vunpack.i.h.bf16 %v6437_v17  ;;  %v6438_v42 = vunpack.i.l.bf16 %v6437_v17 }
 0x356   :  { %v2351_v23 = vsel %vm1188_vm3, %v6438_v42, %v6439_v63  ;;  %v8269_v63 = vpop.f32.mrf.mxu3 }
 0x357   :  { %2542 = vmatpush.msrb.mxu3 %v2351_v23 }
 0x358   :  { %6144 = vmatmul.msk.f32.vlgmr.msrb.gmra.mxu3 %vm738_vm2, %v8172_v15 }
 0x35b   :  { %v8258_v14 = vpop.permute.xlu2 %2819 }
 0x35c   :  { %9566 = vst [vmem:[#allocation54_spill] sm:$0xff] %v8258_v14  ;;  %v8265_v17 = vsel %vm956_vm4, %v8258_v14, %v8225_v56  ;;  %v2851_v23 = vmul.f32 %v8258_v14, %v7591_v52  ;;  %v8283_v52 = vpop.f32.mrf.mxu0 }
 0x35d   :  { %9567 = vst [vmem:[#allocation55_spill] sm:$0xff] %v8265_v17  ;;  %v2852_v62 = vmul.f32 %v8265_v17, %v7548_v25  ;;  %v8285_v25 = vpop.f32.mrf.mxu1 }
 0x35e   :  { %9568 = vst [vmem:[#allocation56_spill] sm:$0xff] %v8285_v25 }
 0x35f   :  { %v6460_v60 = vpack.i.bf16 %v2852_v62, %v2851_v23  ;;  %v8288_v23 = vpop.f32.mrf.mxu3 }
 0x360   :  { %6145 = vmatmul.msk.f32.gmra.mxu3 %vm738_vm2, %v8193_v16 }
 0x361   :  { %6461 = vrot.lane.b32.xlu2 %v6460_v60, %s6639_s21  ;;  %v6443_v60 = vunpack.i.l.bf16 %v8243_v21 }
 0x363   :  { %v8278_v36 = vpop.permute.xlu2 %2829 }
 0x364   :  { %v6432_v51 = vpop.permute.xlu1 %6431 }
 0x365   :  { %v6434_v14 = vunpack.i.h.bf16 %v6432_v51  ;;  %v6433_v55 = vunpack.i.l.bf16 %v6432_v51  ;;  %v6453_v51 = vunpack.i.l.bf16 %v8281_v4 }
 0x367   :  { %v2344_v17 = vsel %vm1188_vm3, %v6429_v38, %v6433_v55  ;;  %v2345_v9 = vsel %vm1188_vm3, %v6433_v55, %v9569_v32  ;;  %v2350_v58 = vsel %vm1188_vm3, %v6434_v14, %v6438_v42  ;;  %v2349_v62 = vsel %vm1188_vm3, %v2337_v35, %v6434_v14  ;;  %v8311_v38 = vpop.f32.mrf.mxu2 }
 0x368   :  { %2381 = vmatpush.msra.mxu0 %v2344_v17  ;;  %2404 = vmatpush.msra.mxu1 %v2345_v9  ;;  %v9571_v55 = vunpack.i.h.bf16 %v8243_v21  ;;  %9572 = vst [vmem:[#allocation57_spill] sm:$0xff] %v8311_v38  ;;  %v2603_v28 = vsel %vm2596_vm8, %v6453_v51, %v6454_v29 }
 0x369   :  { %2519 = vmatpush.msrb.mxu2 %v2350_v58  ;;  %6130 = vmatmul.msk.f32.vlgmr.msra.gmra.mxu0 %vm738_vm2, %v8172_v15 }
 0x36a   :  { %6132 = vmatmul.msk.f32.vlgmr.msra.gmra.mxu1 %vm738_vm2, %v8172_v15  ;;  %2473 = vmatpush.msrb.mxu0 %v2348_v1  ;;  %v2599_v32 = vsel %vm2596_vm8, %v6443_v60, %v9571_v55  ;;  %v8330_v55 = vpop.f32.mrf.mxu0 }
 0x36b   :  { %2496 = vmatpush.msrb.mxu1 %v2349_v62  ;;  %6142 = vmatmul.msk.f32.vlgmr.msrb.gmra.mxu2 %vm738_vm2, %v8172_v15  ;;  %v6447_v9 = vpop.permute.xlu2 %6446 }
 0x36c   :  { %2680 = vmatpush.msra.mxu2 %v2599_v32  ;;  %v6449_v58 = vunpack.i.h.bf16 %v6447_v9  ;;  %v6448_v14 = vunpack.i.l.bf16 %v6447_v9  ;;  %v2824_v42 = vpop.permute.xlu1 %2823  ;;  %v8334_v9 = vpop.f32.mrf.mxu3 }
 0x36d   :  { %v8318_v1 = vsel %vm956_vm4, %v8225_v56, %v2824_v42  ;;  %v8322_v39 = vsel %vm956_vm4, %v2824_v42, %v8237_v41  ;;  %v8332_v56 = vpop.f32.mrf.mxu1  ;;  %9576 = vst [vmem:[#allocation61_spill] sm:$0xff] %v8334_v9 }
 0x36e   :  { %2772 = vmatpush.msrb.mxu2 %v2603_v28  ;;  %9573 = vst [vmem:[#allocation58_spill] sm:$0xff] %v8318_v1  ;;  %v2853_v33 = vmul.f32 %v8318_v1, %v7552_v31  ;;  %v2854_v35 = vmul.f32 %v8322_v39, %v7550_v30  ;;  %v2597_v17 = vsel %vm2596_vm8, %v6448_v14, %v6449_v58 }
 0x36f   :  { %9574 = vst [vmem:[#allocation59_spill] sm:$0xff] %v8322_v39  ;;  %v2598_v62 = vsel %vm2596_vm8, %v6449_v58, %v6443_v60  ;;  %2634 = vmatpush.msra.mxu0 %v2597_v17  ;;  %v8351_v28 = vpop.f32.mrf.mxu2 }
 0x370   :  { %2657 = vmatpush.msra.mxu1 %v2598_v62  ;;  %9575 = vst [vmem:[#allocation60_spill] sm:$0xff] %v8332_v56  ;;  %v6455_v32 = vpack.i.bf16 %v2854_v35, %v2853_v33  ;;  %v9581_v62 = vunpack.i.h.bf16 %v8243_v21 }
 0x371   :  { %6131 = vmatmul.msk.f32.gmra.mxu0 %vm738_vm2, %v8193_v16  ;;  %9579 = vst [vmem:[#allocation64_spill] sm:$0xff] %v8351_v28 }
 0x372   :  { %6133 = vmatmul.msk.f32.gmra.mxu1 %vm738_vm2, %v8193_v16  ;;  %6456 = vrot.lane.b32.xlu0 %v6455_v32, %s6639_s21  ;;  %v8362_v33 = vpop.f32.mrf.mxu0 }
 0x373   :  { %6143 = vmatmul.msk.f32.gmra.mxu2 %vm738_vm2, %v8193_v16  ;;  %v2589_v42 = vpop.permute.xlu2 %2588 }
 0x374   :  { %v2828_v30 = vpop.permute.xlu1 %2827 }
 0x375   :  { %v8345_v31 = vsel %vm956_vm4, %v8237_v41, %v2828_v30  ;;  %v8349_v60 = vsel %vm956_vm4, %v2828_v30, %v8278_v36  ;;  %v6146_v41 = vld [vmem:[%s9448_s2 + $0x70] sm:$0xff]  ;;  %v8366_v35 = vpop.f32.mrf.mxu1 }
 0x376   :  { %9577 = vst [vmem:[#allocation62_spill] sm:$0xff] %v8345_v31  ;;  %v2855_v58 = vmul.f32 %v8345_v31, %v7576_v43  ;;  %v2856_v14 = vmul.f32 %v8349_v60, %v7593_v53  ;;  %v2602_v43 = vsel %vm2596_vm8, %v2589_v42, %v6453_v51  ;;  %v8371_v53 = vpop.f32.mrf.mxu3 }
 0x377   :  { %9578 = vst [vmem:[#allocation63_spill] sm:$0xff] %v8349_v60  ;;  %v8379_v51 = vpop.f32.mrf.mxu2 }
 0x378   :  { %2880 = vrot.lane.b32.xlu1 %v2855_v58, %s6639_s21  ;;  %2882 = vrot.lane.b32.xlu2 %v2856_v14, %s6639_s21  ;;  %9580 = vst [vmem:[#allocation65_spill] sm:$0xff] %v8371_v53  ;;  %v8393_v58 = vsel %vm956_vm4, %v8278_v36, %v8256_v6 }
 0x379   :  { %6138 = vmatmul.msk.f32.vlgmr.msrb.gmra.mxu0 %vm738_vm2, %v8172_v15  ;;  %9582 = vst [vmem:[#allocation66_spill] sm:$0xff] %v8393_v58 }
 0x37a   :  { %6140 = vmatmul.msk.f32.vlgmr.msrb.gmra.mxu1 %vm738_vm2, %v8172_v15  ;;  %v6147_v15 = vld [vmem:[%s9448_s2 + $0x78] sm:$0xff]  ;;  %v8388_v21 = vpop.f32.mrf.mxu0 }
 0x37b   :  { %6152 = vmatmul.msk.f32.vlgmr.msra.gmra.mxu2 %vm738_vm2, %v6146_v41  ;;  %2749 = vmatpush.msrb.mxu1 %v2602_v43 }
 0x37c   :  { %v2587_v17 = vpop.permute.xlu1 %2586 }
 0x37d   :  { %v2600_v32 = vsel %vm2596_vm8, %v9581_v62, %v2587_v17  ;;  %v2601_v30 = vsel %vm2596_vm8, %v2587_v17, %v2589_v42  ;;  %v8396_v14 = vpop.f32.mrf.mxu1 }
 0x37e   :  { %2703 = vmatpush.msra.mxu3 %v2600_v32  ;;  %2726 = vmatpush.msrb.mxu0 %v2601_v30  ;;  %v8398_v43 = vpop.f32.mrf.mxu3 }
 0x37f   :  { %6154 = vmatmul.msk.f32.vlgmr.msra.gmra.mxu3 %vm738_vm2, %v6146_v41  ;;  %v8414_v30 = vpop.f32.mrf.mxu2 }
 0x381   :  { %6139 = vmatmul.msk.f32.gmra.mxu0 %vm738_vm2, %v8193_v16 }
 0x382   :  { %6141 = vmatmul.msk.f32.gmra.mxu1 %vm738_vm2, %v8193_v16  ;;  %v2857_v16 = vmul.f32 %v8393_v58, %v7631_v8 }
 0x383   :  { %6153 = vmatmul.msk.f32.gmra.mxu2 %vm738_vm2, %v6147_v15 }
 0x384   :  { %v2834_v42 = vpop.permute.xlu1 %2833 }
 0x385   :  { %v8402_v17 = vsel %vm956_vm4, %v8256_v6, %v2834_v42  ;;  %v8404_v62 = vmul.f32 0.0, %v2834_v42  ;;  %v8419_v6 = vpop.f32.mrf.mxu0  ;;  %v8424_v42 = vpop.f32.mrf.mxu1 }
 0x386   :  { %9583 = vst [vmem:[#allocation67_spill] sm:$0xff] %v8402_v17  ;;  %v2858_v36 = vmul.f32 %v8402_v17, %v7633_v10 }
 0x387   :  { %9584 = vst [vmem:[#allocation68_spill] sm:$0xff] %v8404_v62  ;;  %2888 = vrot.lane.b32.xlu1 %v8404_v62, %s6639_s21  ;;  %6155 = vmatmul.msk.f32.gmra.mxu3 %vm738_vm2, %v6147_v15 }
 0x388   :  { %v6465_v32 = vpack.i.bf16 %v2858_v36, %v2857_v16  ;;  %9585 = vst [vmem:[#allocation69_spill] sm:$0xff] %v8424_v42  ;;  %v8426_v16 = vpop.f32.mrf.mxu3  ;;  %v8432_v36 = vpop.f32.mrf.mxu2 }
 0x389   :  { %6148 = vmatmul.msk.f32.vlgmr.msra.gmra.mxu0 %vm738_vm2, %v6146_v41  ;;  %9586 = vst [vmem:[#allocation70_spill] sm:$0xff] %v8432_v36 }
 0x38a   :  { %6150 = vmatmul.msk.f32.vlgmr.msra.gmra.mxu1 %vm738_vm2, %v6146_v41  ;;  %6466 = vrot.lane.b32.xlu0 %v6465_v32, %s6639_s21 }
 0x38b   :  { %6160 = vmatmul.msk.f32.vlgmr.msrb.gmra.mxu2 %vm738_vm2, %v6146_v41 }
 0x38c   :  { %v2595_v8 = vpop.permute.xlu1 %2594 }
 0x38d   :  { %v2604_v10 = vsel %vm2596_vm8, %v6454_v29, %v2595_v8  ;;  %v8434_v32 = vpop.f32.mrf.mxu0  ;;  %v8437_v29 = vpop.f32.mrf.mxu1 }
 0x38e   :  { %2795 = vmatpush.msrb.mxu3 %v2604_v10  ;;  %9587 = vst [vmem:[#allocation71_spill] sm:$0xff] %v8437_v29 }
 0x38f   :  { %6162 = vmatmul.msk.f32.vlgmr.msrb.gmra.mxu3 %vm738_vm2, %v6146_v41 }
 0x390   :  { %v8439_v4 = vpop.f32.mrf.mxu3  ;;  %v8443_v8 = vpop.f32.mrf.mxu2 }
 0x391   :  { %6149 = vmatmul.msk.f32.gmra.mxu0 %vm738_vm2, %v6147_v15  ;;  %9588 = vst [vmem:[#allocation72_spill] sm:$0xff] %v8439_v4 }
 0x392   :  { %6151 = vmatmul.msk.f32.gmra.mxu1 %vm738_vm2, %v6147_v15  ;;  %9589 = vst [vmem:[#allocation73_spill] sm:$0xff] %v8443_v8 }
 0x393   :  { %6161 = vmatmul.msk.f32.gmra.mxu2 %vm738_vm2, %v6147_v15 }
 0x395   :  { %v8445_v10 = vpop.f32.mrf.mxu0  ;;  %v8448_v60 = vpop.f32.mrf.mxu1 }
 0x397   :  { %6163 = vmatmul.msk.f32.gmra.mxu3 %vm738_vm2, %v6147_v15 }
 0x398   :  { %v8451_v31 = vpop.f32.mrf.mxu3  ;;  %v8453_v62 = vpop.f32.mrf.mxu2 }
 0x399   :  { %6156 = vmatmul.msk.f32.vlgmr.msrb.gmra.mxu0 %vm738_vm2, %v6146_v41  ;;  %9590 = vst [vmem:[#allocation74_spill] sm:$0xff] %v8451_v31  ;;  %v8474_v31 = vld [vmem:[%s9448_s2 + $0x80] sm:$0xff] }
 0x39a   :  { %6158 = vmatmul.msk.f32.vlgmr.msrb.gmra.mxu1 %vm738_vm2, %v6146_v41 }
 0x39d   :  { %v8455_v17 = vpop.f32.mrf.mxu0  ;;  %v8457_v58 = vpop.f32.mrf.mxu1 }
 0x3a0   :  { %v8459_v39 = vpop.f32.mrf.mxu3  ;;  %v8461_v41 = vpop.f32.mrf.mxu2 }
 0x3a1   :  { %6157 = vmatmul.msk.f32.gmra.mxu0 %vm738_vm2, %v6147_v15  ;;  %9591 = vst [vmem:[#allocation75_spill] sm:$0xff] %v8459_v39 }
 0x3a2   :  { %6159 = vmatmul.msk.f32.gmra.mxu1 %vm738_vm2, %v6147_v15 }
 0x3a5   :  { %v8463_v1 = vpop.f32.mrf.mxu0  ;;  %v8465_v7 = vpop.f32.mrf.mxu1 }
 0x3a6   :  { %9592 = vst [vmem:[#allocation76_spill] sm:$0xff] %v8465_v7 }
 0x3a8   :  { %v8467_v45 = vpop.f32.mrf.mxu3  ;;  %v8469_v15 = vpop.f32.mrf.mxu2 }
 0x3a9   :  { %9593 = vst [vmem:[#allocation77_spill] sm:$0xff] %v8469_v15 }
 0x3ad   :  { %v8477_v38 = vpop.f32.mrf.mxu0  ;;  %v8479_v19 = vpop.f32.mrf.mxu1 }
 0x3ae   :  { %9594 = vst [vmem:[#allocation78_spill] sm:$0xff] %v8479_v19 }
 0x3b0   :  { %v8483_v7 = vpop.f32.mrf.mxu3  ;;  %v8490_v15 = vpop.f32.mrf.mxu2 }
 0x3b1   :  { %9595 = vst [vmem:[#allocation79_spill] sm:$0xff] %v8483_v7 }
 0x3b2   :  { %9596 = vst [vmem:[#allocation80_spill] sm:$0xff] %v8490_v15 }
 0x3b8   :  { %v8498_v19 = vpop.f32.mrf.mxu3  ;;  %v8500_v53 = vpop.f32.mrf.mxu2 }
 0x3b9   :  { %9597 = vst [vmem:[#allocation81_spill] sm:$0xff] %v8498_v19 }
 0x3ba   :  { %9598 = vst [vmem:[#allocation82_spill] sm:$0xff] %v8500_v53 }
 0x3bb   :  { %v6462_v44 = vpop.permute.xlu2 %6461 }
 0x3bc   :  { %v6464_v36 = vunpack.i.h.bf16 %v6462_v44  ;;  %v6463_v4 = vunpack.i.l.bf16 %v6462_v44  ;;  %v8488_v44 = vld [vmem:[%s9448_s2 + $0x88] sm:$0xff] }
 0x3be   :  { %v2890_v8 = vsel %vm663_vm0, %v6463_v4, %v6464_v36  ;;  %v8494_v4 = vpop.f32.mrf.mxu0 }
 0x3bf   :  { %2927 = vmatpush.msra.mxu0 %v2890_v8  ;;  %v8496_v8 = vpop.f32.mrf.mxu1 }
 0x3c0   :  { %6166 = vmatmul.msk.f32.vlgmr.msra.gmra.mxu0 %vm738_vm2, %v8474_v31  ;;  %v8506_v28 = vpop.f32.mrf.mxu3  ;;  %v8508_v54 = vpop.f32.mrf.mxu2 }
 0x3c1   :  { %9599 = vst [vmem:[#allocation83_spill] sm:$0xff] %v8506_v28 }
 0x3c6   :  { %v8502_v48 = vpop.f32.mrf.mxu0 }
 0x3c7   :  { %v8504_v7 = vpop.f32.mrf.mxu1 }
 0x3c8   :  { %6167 = vmatmul.msk.f32.gmra.mxu0 %vm738_vm2, %v8488_v44  ;;  %v8514_v9 = vpop.f32.mrf.mxu3  ;;  %v8516_v49 = vpop.f32.mrf.mxu2 }
 0x3c9   :  { %9602 = vst [vmem:[#allocation86_spill] sm:$0xff] %v8514_v9 }
 0x3ca   :  { %9603 = vst [vmem:[#allocation87_spill] sm:$0xff] %v8516_v49 }
 0x3ce   :  { %v8510_v15 = vpop.f32.mrf.mxu0 }
 0x3cf   :  { %9600 = vst [vmem:[#allocation84_spill] sm:$0xff] %v8510_v15  ;;  %v8512_v42 = vpop.f32.mrf.mxu1 }
 0x3d0   :  { %9601 = vst [vmem:[#allocation85_spill] sm:$0xff] %v8512_v42  ;;  %v8524_v15 = vpop.f32.mrf.mxu3 }
 0x3d1   :  { %9606 = vst [vmem:[#allocation90_spill] sm:$0xff] %v8524_v15 }
 0x3d2   :  { %v2883_v49 = vpop.permute.xlu2 %2882 }
 0x3d6   :  { %v8518_v37 = vpop.f32.mrf.mxu0 }
 0x3d7   :  { %9604 = vst [vmem:[#allocation88_spill] sm:$0xff] %v8518_v37  ;;  %v8522_v28 = vpop.f32.mrf.mxu1 }
 0x3d8   :  { %9605 = vst [vmem:[#allocation89_spill] sm:$0xff] %v8522_v28 }
 0x3e4   :  { %v6457_v29 = vpop.permute.xlu0 %6456 }
 0x3e5   :  { %v6459_v19 = vunpack.i.h.bf16 %v6457_v29  ;;  %v6458_v25 = vunpack.i.l.bf16 %v6457_v29 }
 0x3e7   :  { %v2891_v56 = vsel %vm663_vm0, %v6464_v36, %v6458_v25  ;;  %v2892_v12 = vsel %vm663_vm0, %v6458_v25, %v6459_v19  ;;  %v8538_v25 = vpop.f32.mrf.mxu0 }
 0x3e8   :  { %2950 = vmatpush.msra.mxu1 %v2891_v56  ;;  %2973 = vmatpush.msra.mxu2 %v2892_v12  ;;  %v8536_v12 = vpop.f32.mrf.mxu2  ;;  %v8546_v56 = vpop.f32.mrf.mxu3 }
 0x3e9   :  { %6168 = vmatmul.msk.f32.vlgmr.msra.gmra.mxu1 %vm738_vm2, %v8474_v31  ;;  %6170 = vmatmul.msk.f32.vlgmr.msra.gmra.mxu2 %vm738_vm2, %v8474_v31  ;;  %9607 = vst [vmem:[#allocation91_spill] sm:$0xff] %v8536_v12 }
 0x3ea   :  { %v2881_v29 = vpop.permute.xlu1 %2880  ;;  %9608 = vst [vmem:[#allocation92_spill] sm:$0xff] %v8546_v56 }
 0x3eb   :  { %v2893_v42 = vsel %vm663_vm0, %v6459_v19, %v2881_v29  ;;  %v2894_v36 = vsel %vm663_vm0, %v2881_v29, %v2883_v49  ;;  %v8544_v19 = vpop.f32.mrf.mxu1 }
 0x3ec   :  { %2996 = vmatpush.msra.mxu3 %v2893_v42  ;;  %3019 = vmatpush.msrb.mxu0 %v2894_v36 }
 0x3ed   :  { %6172 = vmatmul.msk.f32.vlgmr.msra.gmra.mxu3 %vm738_vm2, %v8474_v31  ;;  %6174 = vmatmul.msk.f32.vlgmr.msrb.gmra.mxu0 %vm738_vm2, %v8474_v31 }
 0x3ef   :  { %v2386_v29 = vpop.f32.mrf.mxu0 }
 0x3f0   :  { %v8552_v42 = vpop.f32.mrf.mxu2  ;;  %v8556_v9 = vpop.f32.mrf.mxu3 }
 0x3f1   :  { %6169 = vmatmul.msk.f32.gmra.mxu1 %vm738_vm2, %v8488_v44  ;;  %6171 = vmatmul.msk.f32.gmra.mxu2 %vm738_vm2, %v8488_v44  ;;  %9609 = vst [vmem:[#allocation93_spill] sm:$0xff] %v8552_v42 }
 0x3f2   :  { %9610 = vst [vmem:[#allocation94_spill] sm:$0xff] %v8556_v9 }
 0x3f3   :  { %v8554_v36 = vpop.f32.mrf.mxu1 }
 0x3f5   :  { %6173 = vmatmul.msk.f32.gmra.mxu3 %vm738_vm2, %v8488_v44  ;;  %6175 = vmatmul.msk.f32.gmra.mxu0 %vm738_vm2, %v8488_v44 }
 0x3f8   :  { %v8563_v42 = vpop.f32.mrf.mxu2 }
 0x3f9   :  { %v2889_v37 = vpop.permute.xlu1 %2888  ;;  %9611 = vst [vmem:[#allocation95_spill] sm:$0xff] %v8563_v42 }
 0x3fc   :  { %v6467_v15 = vpop.permute.xlu0 %6466 }
 0x3fd   :  { %v6469_v12 = vunpack.i.h.bf16 %v6467_v15  ;;  %v6468_v28 = vunpack.i.l.bf16 %v6467_v15  ;;  %v8569_v15 = vpop.f32.mrf.mxu0 }
 0x3fe   :  { %9612 = vst [vmem:[#allocation96_spill] sm:$0xff] %v8569_v15 }
 0x3ff   :  { %v2895_v53 = vsel %vm663_vm0, %v2883_v49, %v6468_v28  ;;  %v2896_v56 = vsel %vm663_vm0, %v6468_v28, %v6469_v12  ;;  %v2897_v39 = vsel %vm663_vm0, %v6469_v12, %v2889_v37  ;;  %v8571_v49 = vpop.f32.mrf.mxu1  ;;  %v8573_v28 = vpop.f32.mrf.mxu3 }
 0x400   :  { %3042 = vmatpush.msrb.mxu1 %v2895_v53  ;;  %3065 = vmatpush.msrb.mxu2 %v2896_v56  ;;  %9613 = vst [vmem:[#allocation97_spill] sm:$0xff] %v8571_v49  ;;  %v8581_v37 = vpop.f32.mrf.mxu2 }
 0x401   :  { %3088 = vmatpush.msrb.mxu3 %v2897_v39  ;;  %6176 = vmatmul.msk.f32.vlgmr.msrb.gmra.mxu1 %vm738_vm2, %v8474_v31  ;;  %9614 = vst [vmem:[#allocation98_spill] sm:$0xff] %v8573_v28 }
 0x402   :  { %6178 = vmatmul.msk.f32.vlgmr.msrb.gmra.mxu2 %vm738_vm2, %v8474_v31  ;;  %6180 = vmatmul.msk.f32.vlgmr.msrb.gmra.mxu3 %vm738_vm2, %v8474_v31  ;;  %9615 = vst [vmem:[#allocation99_spill] sm:$0xff] %v8581_v37 }
 0x405   :  { %v8583_v39 = vpop.f32.mrf.mxu0 }
 0x406   :  { %9616 = vst [vmem:[#allocation100_spill] sm:$0xff] %v8583_v39 }
 0x407   :  { %v8585_v31 = vpop.f32.mrf.mxu1  ;;  %v8587_v53 = vpop.f32.mrf.mxu3 }
 0x408   :  { %9617 = vst [vmem:[#allocation101_spill] sm:$0xff] %v8585_v31  ;;  %v8589_v12 = vpop.f32.mrf.mxu2 }
 0x409   :  { %6177 = vmatmul.msk.f32.gmra.mxu1 %vm738_vm2, %v8488_v44  ;;  %9618 = vst [vmem:[#allocation102_spill] sm:$0xff] %v8587_v53  ;;  %v1000_v53 = vadd.f32 %v8219_v11, %v8179_v20 }
 0x40a   :  { %6179 = vmatmul.msk.f32.gmra.mxu2 %vm738_vm2, %v8488_v44  ;;  %6181 = vmatmul.msk.f32.gmra.mxu3 %vm738_vm2, %v8488_v44  ;;  %9619 = vst [vmem:[#allocation103_spill] sm:$0xff] %v8589_v12 }
 0x40d   :  { %v2636_v56 = vpop.f32.mrf.mxu0 }
 0x40f   :  { %v8591_v49 = vpop.f32.mrf.mxu1  ;;  %v8593_v9 = vpop.f32.mrf.mxu3 }
 0x410   :  { %9620 = vst [vmem:[#allocation104_spill] sm:$0xff] %v8591_v49  ;;  %v8595_v28 = vpop.f32.mrf.mxu2  ;;  %v1459_v49 = vadd.f32 %v8254_v27, %v1000_v53 }
 0x411   :  { %9621 = vst [vmem:[#allocation105_spill] sm:$0xff] %v8593_v9  ;;  %v997_v9 = vadd.f32 %v8215_v24, %v8157_v5 }
 0x412   :  { %9622 = vst [vmem:[#allocation106_spill] sm:$0xff] %v8595_v28 }
 0x415   :  { %v2639_v15 = vpop.f32.mrf.mxu0 }
 0x417   :  { %v8597_v42 = vpop.f32.mrf.mxu1  ;;  %v8599_v44 = vpop.f32.mrf.mxu3 }
 0x418   :  { %9623 = vst [vmem:[#allocation107_spill] sm:$0xff] %v8597_v42  ;;  %v8601_v37 = vpop.f32.mrf.mxu2 }
 0x419   :  { %9624 = vst [vmem:[#allocation108_spill] sm:$0xff] %v8599_v44  ;;  %v1451_v44 = vadd.f32 %v8241_v46, %v997_v9 }
 0x41a   :  { %9625 = vst [vmem:[#allocation109_spill] sm:$0xff] %v8601_v37 }
 0x41b   :  { %v1746_v20 = vadd.f32 %v8362_v33, %v1451_v44 }
 0x41d   :  { %v8603_v39 = vpop.f32.mrf.mxu0  ;;  %v1955_v24 = vadd.f32 %v8445_v10, %v1746_v20 }
 0x41e   :  { %9626 = vst [vmem:[#allocation110_spill] sm:$0xff] %v8603_v39 }
 0x41f   :  { %v8605_v31 = vpop.f32.mrf.mxu1  ;;  %v8609_v12 = vpop.f32.mrf.mxu3  ;;  %v2257_v46 = vadd.f32 %v8494_v4, %v1955_v24  ;;  %v8649_v4 = vld [vmem:[%s9449_s5] sm:$0xff] }
 0x420   :  { %9627 = vst [vmem:[#allocation111_spill] sm:$0xff] %v8605_v31  ;;  %v8613_v28 = vpop.f32.mrf.mxu2  ;;  %v1754_v31 = vadd.f32 %v8388_v21, %v1459_v49 }
 0x421   :  { %9628 = vst [vmem:[#allocation112_spill] sm:$0xff] %v8609_v12  ;;  %v2550_v49 = vadd.f32 %v8538_v25, %v2257_v46 }
 0x422   :  { %9629 = vst [vmem:[#allocation113_spill] sm:$0xff] %v8613_v28  ;;  %v1963_v11 = vadd.f32 %v8455_v17, %v1754_v31 }
 0x423   :  { %v2803_v17 = vadd.f32 %v2636_v56, %v2550_v49  ;;  %v1023_v56 = vadd.f32 %v8260_v2, %v8221_v61  ;;  %v1089_v2 = vadd.f32 %v8223_v57, %v8204_v3  ;;  %v1066_v3 = vadd.f32 %v8269_v63, %v8186_v59 }
 0x424   :  { %v2265_v27 = vadd.f32 %v8502_v48, %v1963_v11  ;;  %v1020_v11 = vadd.f32 %v8245_v34, %v8217_v0  ;;  %v1043_v34 = vadd.f32 %v8250_v26, %v8174_v13 }
 0x425   :  { %v8616_v42 = vpop.f32.mrf.mxu0  ;;  %v1460_v24 = vadd.f32 %v8396_v14, %v1023_v56 }
 0x426   :  { %v2558_v21 = vadd.f32 %v2386_v29, %v2265_v27  ;;  %v1046_v27 = vadd.f32 %v8276_v47, %v8198_v22  ;;  %v1452_v61 = vadd.f32 %v8366_v35, %v1020_v11  ;;  %v1455_v22 = vadd.f32 %v8283_v52, %v1089_v2  ;;  %v9634_v11 = vld [vmem:[#allocation88_spill] sm:$0xff] }
 0x427   :  { %v8619_v37 = vpop.f32.mrf.mxu1  ;;  %v8622_v39 = vpop.f32.mrf.mxu3  ;;  %v1453_v57 = vadd.f32 %v8379_v51, %v1043_v34 }
 0x428   :  { %9630 = vst [vmem:[#allocation114_spill] sm:$0xff] %v8622_v39  ;;  %v8626_v12 = vpop.f32.mrf.mxu2  ;;  %v2811_v28 = vadd.f32 %v2639_v15, %v2558_v21  ;;  %v1461_v47 = vadd.f32 %v8414_v30, %v1046_v27  ;;  %v1747_v14 = vadd.f32 %v8448_v60, %v1452_v61  ;;  %v1750_v52 = vadd.f32 %v8419_v6, %v1455_v22  ;;  %v9641_v22 = vld [vmem:[#allocation60_spill] sm:$0xff] }
 0x429   :  { %v1748_v59 = vadd.f32 %v8453_v62, %v1453_v57  ;;  %v9633_v62 = vld [vmem:[#allocation82_spill] sm:$0xff] }
 0x42a   :  { %v1956_v60 = vadd.f32 %v8496_v8, %v1747_v14  ;;  %v9631_v8 = vld [vmem:[#allocation107_spill] sm:$0xff] }
 0x42c   :  { %v2258_v6 = vadd.f32 %v8544_v19, %v1956_v60  ;;  %v9639_v19 = vld [vmem:[#allocation100_spill] sm:$0xff] }
 0x42f   :  { %v8630_v53 = vpop.f32.mrf.mxu1  ;;  %v8633_v9 = vpop.f32.mrf.mxu3 }
 0x430   :  { %v8636_v44 = vpop.f32.mrf.mxu2 }
 0x437   :  { %v8643_v48 = vpop.f32.mrf.mxu3  ;;  %v2662_v10 = vpop.f32.mrf.mxu1 }
 0x438   :  { %v8653_v25 = vpop.f32.mrf.mxu2 }
 0x43d   :  { %v2929_v5 = vpop.f32.mrf.mxu0 }
 0x43e   :  { %v8640_v39 = vadd.f32 %v2929_v5, %v2803_v17  ;;  %v1092_v5 = vadd.f32 %v8231_v50, %v8213_v40  ;;  %v1755_v50 = vadd.f32 %v8457_v58, %v1460_v24  ;;  %v1069_v40 = vadd.f32 %v8288_v23, %v8206_v18 }
 0x43f   :  { %v8655_v29 = vpop.f32.mrf.mxu3  ;;  %v8657_v15 = vpop.f32.mrf.mxu1  ;;  %v1756_v18 = vadd.f32 %v8461_v41, %v1461_v47  ;;  %v1454_v58 = vadd.f32 %v8398_v43, %v1066_v3  ;;  %v1959_v41 = vadd.f32 %v8463_v1, %v1750_v52  ;;  %v9632_v43 = vld [vmem:[#allocation75_spill] sm:$0xff]  ;;  %v1957_v17 = vadd.f32 %v9633_v62, %v1748_v59  ;;  %v9638_v1 = vld [vmem:[#allocation84_spill] sm:$0xff]  ;;  %v9640_v47 = vld [vmem:[#allocation50_spill] sm:$0xff] }
 0x440   :  { %v8668_v20 = vpop.f32.mrf.mxu2  ;;  %v1463_v0 = vadd.f32 %v8330_v55, %v1092_v5  ;;  %v1964_v13 = vadd.f32 %v8504_v7, %v1755_v50  ;;  %v1462_v55 = vadd.f32 %v8426_v16, %v1069_v40  ;;  %v9635_v5 = vld [vmem:[#allocation104_spill] sm:$0xff]  ;;  %v1115_v14 = vadd.f32 %v9641_v22, %v9640_v47  ;;  %v9642_v3 = vld [vmem:[#allocation83_spill] sm:$0xff] }
 0x441   :  { %v1965_v16 = vadd.f32 %v8508_v54, %v1756_v18  ;;  %v9637_v54 = vld [vmem:[#allocation95_spill] sm:$0xff]  ;;  %v2261_v34 = vadd.f32 %v9638_v1, %v1959_v41  ;;  %v9645_v52 = vld [vmem:[#allocation96_spill] sm:$0xff] }
 0x442   :  { %v1758_v26 = vadd.f32 %v8434_v32, %v1463_v0  ;;  %v2266_v30 = vadd.f32 %v8554_v36, %v1964_v13  ;;  %v1757_v7 = vadd.f32 %v8467_v45, %v1462_v55  ;;  %v2551_v36 = vadd.f32 %v9635_v5, %v2258_v6  ;;  %v9636_v45 = vld [vmem:[#allocation86_spill] sm:$0xff]  ;;  %v9644_v55 = vld [vmem:[#allocation109_spill] sm:$0xff]  ;;  %v9653_v5 = vld [vmem:[#allocation112_spill] sm:$0xff] }
 0x443   :  { %v2267_v2 = vadd.f32 %v9637_v54, %v1965_v16  ;;  %v2554_v60 = vadd.f32 %v9645_v52, %v2261_v34  ;;  %v9649_v6 = vld [vmem:[#allocation106_spill] sm:$0xff]  ;;  %v9655_v54 = vld [vmem:[#allocation61_spill] sm:$0xff] }
 0x444   :  { %v1967_v51 = vadd.f32 %v8477_v38, %v1758_v26  ;;  %v2559_v49 = vadd.f32 %v9631_v8, %v2266_v30  ;;  %v1966_v27 = vadd.f32 %v9636_v45, %v1757_v7  ;;  %v2804_v50 = vadd.f32 %v8630_v53, %v2551_v36  ;;  %v9643_v26 = vld [vmem:[#allocation93_spill] sm:$0xff]  ;;  %v9646_v53 = vld [vmem:[#allocation48_spill] sm:$0xff]  ;;  %v9648_v7 = vld [vmem:[#allocation98_spill] sm:$0xff] }
 0x445   :  { %v2932_v33 = vpop.f32.mrf.mxu0  ;;  %v2560_v18 = vadd.f32 %v9644_v55, %v2267_v2 }
 0x446   :  { %v8638_v31 = vadd.f32 %v2932_v33, %v2811_v28  ;;  %v8662_v28 = vld [vmem:[%s9449_s5 + $0x8] sm:$0xff]  ;;  %v1749_v33 = vadd.f32 %v9632_v43, %v1454_v58  ;;  %v2269_v38 = vadd.f32 %v9634_v11, %v1967_v51  ;;  %v2812_v24 = vadd.f32 %v2662_v10, %v2559_v49  ;;  %v9650_v43 = vld [vmem:[#allocation110_spill] sm:$0xff] }
 0x447   :  { %v8677_v46 = vpop.f32.mrf.mxu3  ;;  %v8679_v21 = vpop.f32.mrf.mxu1  ;;  %v2259_v10 = vadd.f32 %v9643_v26, %v1957_v17  ;;  %v9647_v51 = vld [vmem:[#allocation56_spill] sm:$0xff]  ;;  %v2268_v16 = vadd.f32 %v9648_v7, %v1966_v27  ;;  %v2813_v49 = vadd.f32 %v8653_v25, %v2560_v18  ;;  %v9652_v17 = vld [vmem:[#allocation94_spill] sm:$0xff]  ;;  %v9654_v27 = vld [vmem:[#allocation51_spill] sm:$0xff]  ;;  %v3309_v18 = vmul.f32 %v8640_v39, %v8640_v39 }
 0x448   :  { %3139 = vmatpush.msra.mxu0 %v8638_v31  ;;  %v8696_v35 = vpop.f32.mrf.mxu2  ;;  %v2562_v0 = vadd.f32 %v9639_v19, %v2269_v38  ;;  %v1958_v57 = vadd.f32 %v9642_v3, %v1749_v33  ;;  %v1112_v30 = vadd.f32 %v9647_v51, %v9646_v53  ;;  %v2807_v33 = vadd.f32 %v9650_v43, %v2554_v60  ;;  %v9657_v19 = vld [vmem:[#allocation108_spill] sm:$0xff]  ;;  %v9661_v3 = vld [vmem:[#allocation65_spill] sm:$0xff]  ;;  %v9662_v26 = vld [vmem:[#allocation78_spill] sm:$0xff] }
 0x449   :  { %v2552_v8 = vadd.f32 %v9649_v6, %v2259_v10  ;;  %v2561_v36 = vadd.f32 %v9653_v5, %v2268_v16  ;;  %v1158_v2 = vadd.f32 %v9655_v54, %v9654_v27  ;;  %v3317_v34 = vmul.f32 %v8638_v31, %v8638_v31  ;;  %v9663_v60 = vld [vmem:[#allocation49_spill] sm:$0xff]  ;;  %v9665_v51 = vld [vmem:[#allocation76_spill] sm:$0xff]  ;;  %v9667_v6 = vld [vmem:[#allocation74_spill] sm:$0xff] }
 0x44a   :  { %3140 = vmatpush.msra.mxu0 %v8640_v39  ;;  %v2815_v58 = vadd.f32 %v8616_v42, %v2562_v0  ;;  %v9651_v42 = vld [vmem:[#allocation71_spill] sm:$0xff]  ;;  %v2260_v11 = vadd.f32 %v9652_v17, %v1958_v57  ;;  %v9666_v16 = vld [vmem:[#allocation73_spill] sm:$0xff]  ;;  %v9672_v5 = vld [vmem:[#allocation80_spill] sm:$0xff] }
 0x44b   :  { %6182 = vmatmul.msk.f32.vlgmr.msra.gmra.mxu0 %vm3118_vm9, %v8649_v4  ;;  %v9674_v54 = vld [vmem:[#allocation79_spill] sm:$0xff] }
 0x44c   :  { %v2553_v0 = vadd.f32 %v9657_v19, %v2260_v11  ;;  %v9671_v11 = vld [vmem:[#allocation85_spill] sm:$0xff] }
 0x44f   :  { %v8706_v63 = vpop.f32.mrf.mxu3 }
 0x453   :  { %6183 = vmatmul.msk.f32.gmra.mxu0 %vm3118_vm9, %v8662_v28 }
 0x466   :  { %v2952_v23 = vpop.f32.mrf.mxu1 }
 0x467   :  { %v8733_v59 = vadd.f32 %v2952_v23, %v2804_v50  ;;  %v1464_v23 = vadd.f32 %v9651_v42, %v1115_v14  ;;  %v2814_v50 = vadd.f32 %v8655_v29, %v2561_v36  ;;  %v9660_v14 = vld [vmem:[#allocation53_spill] sm:$0xff]  ;;  %v2806_v29 = vadd.f32 %v8643_v48, %v2553_v0 }
 0x468   :  { %v1161_v57 = vadd.f32 %v9661_v3, %v9660_v14  ;;  %v9677_v0 = vld [vmem:[#allocation97_spill] sm:$0xff]  ;;  %v9679_v14 = vld [vmem:[#allocation92_spill] sm:$0xff] }
 0x469   :  { %v1759_v10 = vadd.f32 %v9662_v26, %v1464_v23 }
 0x46a   :  { %v3021_v32 = vpop.f32.mrf.mxu0 }
 0x46b   :  { %v8751_v45 = vadd.f32 %v3021_v32, %v2807_v33  ;;  %v9659_v32 = vld [vmem:[#allocation64_spill] sm:$0xff]  ;;  %v9669_v33 = vld [vmem:[#allocation89_spill] sm:$0xff] }
 0x46c   :  { %v2975_v56 = vpop.f32.mrf.mxu2  ;;  %v1968_v42 = vadd.f32 %v9669_v33, %v1759_v10  ;;  %v9681_v10 = vld [vmem:[#allocation111_spill] sm:$0xff] }
 0x46d   :  { %v3313_v7 = vmul.f32 %v8751_v45, %v8751_v45 }
 0x46e   :  { %v2955_v61 = vpop.f32.mrf.mxu1 }
 0x46f   :  { %v8724_v40 = vadd.f32 %v2955_v61, %v2812_v24  ;;  %v2805_v24 = vadd.f32 %v8636_v44, %v2552_v8  ;;  %v9656_v61 = vld [vmem:[#allocation69_spill] sm:$0xff]  ;;  %v9658_v44 = vld [vmem:[#allocation52_spill] sm:$0xff]  ;;  %v1466_v8 = vadd.f32 %v9667_v6, %v1161_v57  ;;  %v9680_v57 = vld [vmem:[#allocation90_spill] sm:$0xff] }
 0x470   :  { %v2998_v13 = vpop.f32.mrf.mxu3  ;;  %v1456_v1 = vadd.f32 %v9656_v61, %v1112_v30  ;;  %v1138_v22 = vadd.f32 %v9659_v32, %v9658_v44  ;;  %v9678_v32 = vld [vmem:[#allocation91_spill] sm:$0xff]  ;;  %v9685_v6 = vld [vmem:[#allocation102_spill] sm:$0xff] }
 0x471   :  { %3162 = vmatpush.msra.mxu1 %v8724_v40  ;;  %v8763_v47 = vadd.f32 %v2975_v56, %v2805_v24  ;;  %v8787_v48 = vadd.f32 %v2998_v13, %v2806_v29  ;;  %v9670_v13 = vld [vmem:[#allocation70_spill] sm:$0xff]  ;;  %v9673_v24 = vld [vmem:[#allocation81_spill] sm:$0xff] }
 0x472   :  { %v3024_v41 = vpop.f32.mrf.mxu0  ;;  %v1751_v30 = vadd.f32 %v9665_v51, %v1456_v1  ;;  %v1761_v27 = vadd.f32 %v9673_v24, %v1466_v8 }
 0x473   :  { %v8742_v62 = vadd.f32 %v3024_v41, %v2815_v58  ;;  %3163 = vmatpush.msra.mxu1 %v8733_v59  ;;  %v9664_v58 = vld [vmem:[#allocation57_spill] sm:$0xff]  ;;  %v1465_v41 = vadd.f32 %v9666_v16, %v1138_v22 }
 0x474   :  { %v2978_v38 = vpop.f32.mrf.mxu2  ;;  %6184 = vmatmul.msk.f32.vlgmr.msra.gmra.mxu1 %vm3118_vm9, %v8649_v4  ;;  %v1135_v53 = vadd.f32 %v9664_v58, %v9663_v60  ;;  %v1970_v3 = vadd.f32 %v9679_v14, %v1761_v27  ;;  %v9682_v60 = vld [vmem:[#allocation87_spill] sm:$0xff]  ;;  %v9684_v16 = vld [vmem:[#allocation105_spill] sm:$0xff] }
 0x475   :  { %v8753_v25 = vadd.f32 %v2978_v38, %v2813_v49  ;;  %3231 = vmatpush.msrb.mxu0 %v8742_v62  ;;  %v3321_v56 = vmul.f32 %v8742_v62, %v8742_v62  ;;  %v9668_v49 = vld [vmem:[#allocation72_spill] sm:$0xff]  ;;  %v1960_v38 = vadd.f32 %v9671_v11, %v1751_v30  ;;  %v1760_v36 = vadd.f32 %v9672_v5, %v1465_v41  ;;  %v9683_v30 = vld [vmem:[#allocation103_spill] sm:$0xff] }
 0x476   :  { %v1458_v43 = vadd.f32 %v9668_v49, %v1158_v2  ;;  %v1457_v23 = vadd.f32 %v9670_v13, %v1135_v53  ;;  %v9675_v2 = vld [vmem:[#allocation101_spill] sm:$0xff]  ;;  %v2272_v41 = vadd.f32 %v9684_v16, %v1970_v3  ;;  %v9687_v13 = vld [vmem:[#allocation114_spill] sm:$0xff] }
 0x477   :  { %3185 = vmatpush.msra.mxu2 %v8753_v25  ;;  %3232 = vmatpush.msrb.mxu0 %v8751_v45  ;;  %v2270_v1 = vadd.f32 %v9675_v2, %v1968_v42  ;;  %v1969_v22 = vadd.f32 %v9678_v32, %v1760_v36  ;;  %v3318_v42 = vmul.f32 %v8724_v40, %v8724_v40 }
 0x478   :  { %v3001_v55 = vpop.f32.mrf.mxu3  ;;  %6190 = vmatmul.msk.f32.vlgmr.msrb.gmra.mxu0 %vm3118_vm9, %v8649_v4  ;;  %v1753_v61 = vadd.f32 %v9674_v54, %v1458_v43  ;;  %v2565_v33 = vadd.f32 %v8633_v9, %v2272_v41  ;;  %v3310_v36 = vmul.f32 %v8733_v59, %v8733_v59 }
 0x479   :  { %3339 = vmatpush.msra.mxu0 %v3317_v34  ;;  %v8777_v52 = vadd.f32 %v3001_v55, %v2814_v50  ;;  %3186 = vmatpush.msra.mxu2 %v8763_v47  ;;  %v9676_v34 = vld [vmem:[#allocation77_spill] sm:$0xff]  ;;  %v2262_v50 = vadd.f32 %v9677_v0, %v1960_v38  ;;  %v2563_v44 = vadd.f32 %v8619_v37, %v2270_v1 }
 0x47a   :  { %6186 = vmatmul.msk.f32.vlgmr.msra.gmra.mxu2 %vm3118_vm9, %v8649_v4  ;;  %v1752_v19 = vadd.f32 %v9676_v34, %v1457_v23  ;;  %v1962_v26 = vadd.f32 %v9680_v57, %v1753_v61  ;;  %v2818_v5 = vadd.f32 %v8706_v63, %v2565_v33  ;;  %v3312_v34 = vmul.f32 %v8787_v48, %v8787_v48 }
 0x47b   :  { %3340 = vmatpush.msra.mxu0 %v3309_v18  ;;  %3208 = vmatpush.msra.mxu3 %v8777_v52  ;;  %v2555_v55 = vadd.f32 %v9681_v10, %v2262_v50  ;;  %v2816_v18 = vadd.f32 %v8679_v21, %v2563_v44  ;;  %v9686_v21 = vld [vmem:[#allocation99_spill] sm:$0xff]  ;;  %v3311_v0 = vmul.f32 %v8763_v47, %v8763_v47 }
 0x47c   :  { %6185 = vmatmul.msk.f32.gmra.mxu1 %vm3118_vm9, %v8662_v28  ;;  %v1961_v58 = vadd.f32 %v9682_v60, %v1752_v19  ;;  %v2264_v8 = vadd.f32 %v9685_v6, %v1962_v26 }
 0x47d   :  { %3431 = vmatpush.msrb.mxu0 %v3321_v56  ;;  %3209 = vmatpush.msra.mxu3 %v8787_v48  ;;  %v2808_v37 = vadd.f32 %v8657_v15, %v2555_v55 }
 0x47e   :  { %v3044_v17 = vpop.f32.mrf.mxu1  ;;  %6188 = vmatmul.msk.f32.vlgmr.msra.gmra.mxu3 %vm3118_vm9, %v8649_v4  ;;  %v2263_v43 = vadd.f32 %v9686_v21, %v1961_v58  ;;  %v2557_v23 = vadd.f32 %v9687_v13, %v2264_v8 }
 0x47f   :  { %3432 = vmatpush.msrb.mxu0 %v3313_v7  ;;  %v2271_v7 = vadd.f32 %v9683_v30, %v1969_v22  ;;  %v8828_v49 = vadd.f32 %v3044_v17, %v2808_v37  ;;  %v9688_v17 = vld [vmem:[#allocation113_spill] sm:$0xff] }
 0x480   :  { %6191 = vmatmul.msk.f32.gmra.mxu0 %vm3118_vm9, %v8662_v28  ;;  %v2556_v11 = vadd.f32 %v9688_v17, %v2263_v43  ;;  %v2810_v54 = vadd.f32 %v8677_v46, %v2557_v23  ;;  %v3319_v46 = vmul.f32 %v8753_v25, %v8753_v25 }
 0x481   :  { %v2564_v15 = vadd.f32 %v8626_v12, %v2271_v7  ;;  %v3314_v63 = vmul.f32 %v8828_v49, %v8828_v49 }
 0x482   :  { %6187 = vmatmul.msk.f32.gmra.mxu2 %vm3118_vm9, %v8662_v28  ;;  %v2809_v27 = vadd.f32 %v8668_v20, %v2556_v11  ;;  %v3320_v20 = vmul.f32 %v8777_v52, %v8777_v52 }
 0x483   :  { %v2817_v38 = vadd.f32 %v8696_v35, %v2564_v15 }
 0x485   :  { %v3067_v29 = vpop.f32.mrf.mxu2  ;;  %v3090_v56 = vpop.f32.mrf.mxu3 }
 0x486   :  { %v3047_v53 = vpop.f32.mrf.mxu1  ;;  %6189 = vmatmul.msk.f32.gmra.mxu3 %vm3118_vm9, %v8662_v28  ;;  %v8857_v2 = vadd.f32 %v3067_v29, %v2809_v27  ;;  %v8859_v1 = vadd.f32 %v3090_v56, %v2810_v54 }
 0x487   :  { %v8823_v51 = vadd.f32 %v3047_v53, %v2816_v18 }
 0x488   :  { %6198 = vmatmul.msk.f32.vlgmr.msra.gmra.mxu0 %vm3118_vm9, %v8649_v4  ;;  %v3316_v44 = vmul.f32 %v8859_v1, %v8859_v1  ;;  %v3315_v32 = vmul.f32 %v8857_v2, %v8857_v2 }
 0x489   :  { %3254 = vmatpush.msrb.mxu1 %v8823_v51  ;;  %v3322_v12 = vmul.f32 %v8823_v51, %v8823_v51 }
 0x48b   :  { %3255 = vmatpush.msrb.mxu1 %v8828_v49 }
 0x48c   :  { %6192 = vmatmul.msk.f32.vlgmr.msrb.gmra.mxu1 %vm3118_vm9, %v8649_v4 }
 0x48d   :  { %3362 = vmatpush.msra.mxu1 %v3318_v42  ;;  %v3070_v9 = vpop.f32.mrf.mxu2  ;;  %v3093_v24 = vpop.f32.mrf.mxu3 }
 0x48e   :  { %v8851_v61 = vadd.f32 %v3070_v9, %v2817_v38  ;;  %v8853_v35 = vadd.f32 %v3093_v24, %v2818_v5 }
 0x48f   :  { %3363 = vmatpush.msra.mxu1 %v3310_v36 }
 0x490   :  { %9689 = vst [vmem:[#allocation107_spill] sm:$0xff] %v8851_v61  ;;  %3277 = vmatpush.msrb.mxu2 %v8851_v61  ;;  %3300 = vmatpush.msrb.mxu3 %v8853_v35  ;;  %v3324_v19 = vmul.f32 %v8853_v35, %v8853_v35  ;;  %v3323_v50 = vmul.f32 %v8851_v61, %v8851_v61 }
 0x491   :  { %9690 = vst [vmem:[#allocation75_spill] sm:$0xff] %v8853_v35  ;;  %3454 = vmatpush.msrb.mxu1 %v3322_v12  ;;  %6199 = vmatmul.msk.f32.gmra.mxu0 %vm3118_vm9, %v8662_v28 }
 0x492   :  { %3278 = vmatpush.msrb.mxu2 %v8857_v2  ;;  %3301 = vmatpush.msrb.mxu3 %v8859_v1 }
 0x493   :  { %3455 = vmatpush.msrb.mxu1 %v3314_v63  ;;  %6194 = vmatmul.msk.f32.vlgmr.msrb.gmra.mxu2 %vm3118_vm9, %v8649_v4 }
 0x494   :  { %3408 = vmatpush.msra.mxu3 %v3320_v20  ;;  %3385 = vmatpush.msra.mxu2 %v3319_v46 }
 0x495   :  { %6196 = vmatmul.msk.f32.vlgmr.msrb.gmra.mxu3 %vm3118_vm9, %v8649_v4  ;;  %6193 = vmatmul.msk.f32.gmra.mxu1 %vm3118_vm9, %v8662_v28 }
 0x496   :  { %3409 = vmatpush.msra.mxu3 %v3312_v34  ;;  %3386 = vmatpush.msra.mxu2 %v3311_v0  ;;  %v6648_v34 = vmov 0  }
 0x497   :  { %6470 = vset.pattern.permute.xlu2 %v6648_v34  ;;  %6631 = vset.pattern.permute.xlu0 %v6648_v34 }
 0x498   :  { %3500 = vmatpush.msrb.mxu3 %v3324_v19  ;;  %3477 = vmatpush.msrb.mxu2 %v3323_v50 }
 0x499   :  { %6206 = vmatmul.msk.f32.vlgmr.msrb.gmra.mxu0 %vm3118_vm9, %v8649_v4  ;;  %6632 = vset.pattern.permute.xlu1 %v6648_v34 }
 0x49a   :  { %3501 = vmatpush.msrb.mxu3 %v3316_v44  ;;  %3478 = vmatpush.msrb.mxu2 %v3315_v32 }
 0x49b   :  { %6195 = vmatmul.msk.f32.gmra.mxu2 %vm3118_vm9, %v8662_v28 }
 0x49d   :  { %6197 = vmatmul.msk.f32.gmra.mxu3 %vm3118_vm9, %v8662_v28  ;;  %6200 = vmatmul.msk.f32.vlgmr.msra.gmra.mxu1 %vm3118_vm9, %v8649_v4 }
 0x4a1   :  { %6207 = vmatmul.msk.f32.gmra.mxu0 %vm3118_vm9, %v8662_v28 }
 0x4a3   :  { %6202 = vmatmul.msk.f32.vlgmr.msra.gmra.mxu2 %vm3118_vm9, %v8649_v4 }
 0x4a5   :  { %6204 = vmatmul.msk.f32.vlgmr.msra.gmra.mxu3 %vm3118_vm9, %v8649_v4  ;;  %6201 = vmatmul.msk.f32.gmra.mxu1 %vm3118_vm9, %v8662_v28 }
 0x4ab   :  { %6203 = vmatmul.msk.f32.gmra.mxu2 %vm3118_vm9, %v8662_v28 }
 0x4ad   :  { %6205 = vmatmul.msk.f32.gmra.mxu3 %vm3118_vm9, %v8662_v28  ;;  %6208 = vmatmul.msk.f32.vlgmr.msrb.gmra.mxu1 %vm3118_vm9, %v8649_v4 }
 0x4b3   :  { %6210 = vmatmul.msk.f32.vlgmr.msrb.gmra.mxu2 %vm3118_vm9, %v8649_v4 }
 0x4b5   :  { %6212 = vmatmul.msk.f32.vlgmr.msrb.gmra.mxu3 %vm3118_vm9, %v8649_v4  ;;  %6209 = vmatmul.msk.f32.gmra.mxu1 %vm3118_vm9, %v8662_v28 }
 0x4bb   :  { %6211 = vmatmul.msk.f32.gmra.mxu2 %vm3118_vm9, %v8662_v28 }
 0x4bd   :  { %6213 = vmatmul.msk.f32.gmra.mxu3 %vm3118_vm9, %v8662_v28 }
 0x4c8   :  { %v3142_v22 = vpop.f32.mrf.mxu0 }
 0x4d0   :  { %v8921_v3 = vpop.f32.mrf.mxu0 }
 0x4f1   :  { %v3165_v14 = vpop.f32.mrf.mxu1 }
 0x4f2   :  { %v3509_v10 = vadd.f32 %v3165_v14, %v3142_v22 }
 0x4f5   :  { %v3234_v18 = vpop.f32.mrf.mxu0 }
 0x4f9   :  { %v8923_v57 = vpop.f32.mrf.mxu1 }
 0x4fd   :  { %v3188_v26 = vpop.f32.mrf.mxu2  ;;  %v8929_v37 = vpop.f32.mrf.mxu0 }
 0x4fe   :  { %v3510_v4 = vadd.f32 %v3509_v10, %v3188_v26 }
 0x501   :  { %v3211_v55 = vpop.f32.mrf.mxu3 }
 0x502   :  { %v3511_v56 = vadd.f32 %v3510_v4, %v3211_v55 }
 0x504   :  { %v3512_v53 = vadd.f32 %v3511_v56, %v3234_v18 }
 0x505   :  { %v8925_v60 = vpop.f32.mrf.mxu2  ;;  %v3342_v8 = vpop.f32.mrf.mxu0 }
 0x509   :  { %v3257_v29 = vpop.f32.mrf.mxu1  ;;  %v8927_v58 = vpop.f32.mrf.mxu3 }
 0x50a   :  { %v3513_v28 = vadd.f32 %v3512_v53, %v3257_v29  ;;  %v3114_v29 = vld [vmem:[%s9450_s6] sm:$0xff] }
 0x50e   :  { %v8937_v15 = vpop.f32.mrf.mxu0 }
 0x512   :  { %v8931_v7 = vpop.f32.mrf.mxu1 }
 0x516   :  { %v3280_v30 = vpop.f32.mrf.mxu2  ;;  %v3434_v36 = vpop.f32.mrf.mxu0 }
 0x517   :  { %v3514_v16 = vadd.f32 %v3513_v28, %v3280_v30 }
 0x518   :  { %v3303_v41 = vpop.f32.mrf.mxu3 }
 0x519   :  { %v3515_v6 = vadd.f32 %v3514_v16, %v3303_v41  ;;  %v3116_v16 = vld [vmem:[%s9451_s7] sm:$0xff] }
 0x51a   :  { %v3365_v43 = vpop.f32.mrf.mxu1 }
 0x51b   :  { %3516 = vadd.xlane.f32.xlu0 %v3515_v6  ;;  %v3529_v13 = vadd.f32 %v3365_v43, %v3342_v8 }
 0x51e   :  { %v8933_v21 = vpop.f32.mrf.mxu2 }
 0x520   :  { %v8935_v33 = vpop.f32.mrf.mxu3 }
 0x522   :  { %v8939_v17 = vpop.f32.mrf.mxu1 }
 0x526   :  { %v3388_v42 = vpop.f32.mrf.mxu2 }
 0x527   :  { %v3530_v11 = vadd.f32 %v3529_v13, %v3388_v42 }
 0x528   :  { %v3411_v23 = vpop.f32.mrf.mxu3 }
 0x529   :  { %v3531_v38 = vadd.f32 %v3530_v11, %v3411_v23 }
 0x52a   :  { %v3457_v24 = vpop.f32.mrf.mxu1 }
 0x52b   :  { %v3532_v9 = vadd.f32 %v3531_v38, %v3434_v36 }
 0x52d   :  { %v3533_v27 = vadd.f32 %v3532_v9, %v3457_v24 }
 0x52e   :  { %v8941_v5 = vpop.f32.mrf.mxu2 }
 0x530   :  { %v8943_v12 = vpop.f32.mrf.mxu3 }
 0x536   :  { %v3480_v54 = vpop.f32.mrf.mxu2 }
 0x537   :  { %v3534_v63 = vadd.f32 %v3533_v27, %v3480_v54 }
 0x538   :  { %v3503_v20 = vpop.f32.mrf.mxu3 }
 0x539   :  { %v3535_v46 = vadd.f32 %v3534_v63, %v3503_v20 }
 0x53b   :  { %3536 = vadd.xlane.f32.xlu1 %v3535_v46  ;;  %v9691_v46 = vld [vmem:[#allocation3_spill] sm:$0xff] }
 0x58e   :  { %v3517_v19 = vpop.xlane.xlu0 %3516 }
 0x58f   :  { %v3527_v0 = vmul.f32 0.00048828125, %v3517_v19  ;;  %v9692_v19 = vld [vmem:[#allocation4_spill] sm:$0xff] }
 0x591   :  { %v3549_v44 = vmul.f32 %v3527_v0, %v3527_v0 }
 0x5ae   :  { %v3537_v50 = vpop.xlane.xlu1 %3536 }
 0x5af   :  { %v3547_v32 = vmul.f32 0.00048828125, %v3537_v50  ;;  %v9693_v50 = vld [vmem:[#allocation8_spill] sm:$0xff] }
 0x5b1   :  { %v3551_v22 = vsub.f32 %v3547_v32, %v3549_v44  ;;  %v9694_v32 = vld [vmem:[#allocation7_spill] sm:$0xff] }
 0x5b3   :  { %v3553_v14 = vadd.f32 1e-05, %v3551_v22 }
 0x5b5   :  { %6633 = vrsqrt.f32 %v3553_v14  ;;  %vm3561_vm11 = vweird.f32 %v3553_v14 }
 0x5bb   :  { %v6634_v26 = vpop.eup %6633 }
 0x5bc   :  { %v3556_v10 = vmul.f32 %v6634_v26, %v3553_v14  ;;  %vm3562_vm10 = vweird.f32 %v6634_v26 }
 0x5bd   :  { %vm3563_vm12 = vmor %vm3561_vm11, %vm3562_vm10 }
 0x5be   :  { %v3557_v55 = vmul.f32 %v6634_v26, %v3556_v10 }
 0x5c0   :  { %v3558_v18 = vmul.f32 0.5, %v3557_v55  ;;  %v9695_v55 = vld [vmem:[#allocation12_spill] sm:$0xff] }
 0x5c2   :  { %v3559_v4 = vsub.f32 1.5, %v3558_v18 }
 0x5c4   :  { %v3560_v56 = vmul.f32 %v6634_v26, %v3559_v4  ;;  %v9696_v4 = vld [vmem:[#allocation13_spill] sm:$0xff] }
 0x5c6   :  { %v3564_v53 = vsel %vm3563_vm12, %v6634_v26, %v3560_v56 }
 0x5c7   :  { %v3575_v28 = vmul.f32 %v3564_v53, %v3114_v29 }
 0x5c9   :  { %3583 = vperm.xlu2 %6470, %v3575_v28   ;;  %v3577_v30 = vmul.f32 %v3575_v28, %v3527_v0 }
 0x5cb   :  { %v3579_v41 = vsub.f32 %v3116_v16, %v3577_v30 }
 0x5d1   :  { %3609 = vperm.xlu2 %6470, %v3579_v41   ;;  %v9697_v41 = vld [vmem:[#allocation15_spill] sm:$0xff] }
 0x623   :  { %v3584_v6 = vpop.permute.xlu2 %3583 }
 0x624   :  { %v3592_v8 = vmul.f32 %v3584_v6, %v8733_v59  ;;  %v3593_v43 = vmul.f32 %v3584_v6, %v8763_v47  ;;  %v3595_v42 = vmul.f32 %v3584_v6, %v8751_v45  ;;  %v3597_v13 = vmul.f32 %v3584_v6, %v8857_v2 }
 0x625   :  { %v3598_v23 = vmul.f32 %v3584_v6, %v8859_v1  ;;  %v3594_v54 = vmul.f32 %v3584_v6, %v8787_v48  ;;  %v3591_v26 = vmul.f32 %v3584_v6, %v8640_v39  ;;  %v3596_v10 = vmul.f32 %v3584_v6, %v8828_v49 }
 0x62b   :  { %v3610_v11 = vpop.permute.xlu2 %3609 }
 0x62c   :  { %v3618_v38 = vadd.f32 %v3610_v11, %v3592_v8  ;;  %v3619_v36 = vadd.f32 %v3610_v11, %v3593_v43  ;;  %v3621_v9 = vadd.f32 %v3610_v11, %v3595_v42  ;;  %v3623_v24 = vadd.f32 %v3610_v11, %v3597_v13  ;;  %v9698_v8 = vld [vmem:[#allocation19_spill] sm:$0xff]  ;;  %v9699_v42 = vld [vmem:[#allocation18_spill] sm:$0xff] }
 0x62d   :  { %v3624_v27 = vadd.f32 %v3610_v11, %v3598_v23  ;;  %v3620_v2 = vadd.f32 %v3610_v11, %v3594_v54  ;;  %v3617_v53 = vadd.f32 %v3610_v11, %v3591_v26  ;;  %v3622_v28 = vadd.f32 %v3610_v11, %v3596_v10  ;;  %v9700_v23 = vld [vmem:[#allocation14_spill] sm:$0xff] }
 0x62e   :  { %v8957_v63 = vmax.f32 %v3618_v38, 0.0  ;;  %v8959_v20 = vmax.f32 %v3619_v36, 0.0  ;;  %v8961_v59 = vmax.f32 %v3621_v9, 0.0  ;;  %v8963_v47 = vmax.f32 %v3623_v24, 0.0  ;;  %v9701_v9 = vld [vmem:[#allocation25_spill] sm:$0xff]  ;;  %v9708_v10 = vld [vmem:[#allocation26_spill] sm:$0xff] }
 0x62f   :  { %v8965_v45 = vmax.f32 %v3624_v27, 0.0  ;;  %v8980_v14 = vmax.f32 %v3620_v2, 0.0  ;;  %v8994_v49 = vmax.f32 %v3617_v53, 0.0  ;;  %v8996_v6 = vmax.f32 %v3622_v28, 0.0  ;;  %v9702_v27 = vld [vmem:[#allocation20_spill] sm:$0xff]  ;;  %v9711_v53 = vld [vmem:[#allocation11_spill] sm:$0xff] }
 0x630   :  { %v6471_v1 = vpack.i.bf16 %v8959_v20, %v8957_v63  ;;  %v3660_v34 = vmul.f32 %v8957_v63, %v9691_v46  ;;  %v3661_v48 = vmul.f32 %v8959_v20, %v9692_v19  ;;  %3689 = vrot.lane.b32.xlu0 %v8961_v59, %s6640_s1  ;;  %v3665_v44 = vmul.f32 %v8963_v47, %v9693_v50  ;;  %v9706_v50 = vld [vmem:[#allocation5_spill] sm:$0xff] }
 0x631   :  { %v3666_v22 = vmul.f32 %v8965_v45, %v9694_v32  ;;  %v4084_v18 = vmul.f32 %v8957_v63, %v9695_v55  ;;  %v4085_v29 = vmul.f32 %v8959_v20, %v9696_v4  ;;  %v6476_v30 = vpack.i.bf16 0.0, %v8980_v14 }
 0x632   :  { %6472 = vrot.lane.b32.xlu2 %v6471_v1, %s6640_s1  ;;  %v6491_v0 = vpack.i.bf16 %v3661_v48, %v3660_v34  ;;  %v4086_v39 = vmul.f32 %v8980_v14, %v9697_v41  ;;  %v4089_v43 = vmul.f32 %v8963_v47, %v9698_v8  ;;  %v4090_v13 = vmul.f32 %v8965_v45, %v9699_v42  ;;  %v9703_v1 = vld [vmem:[#allocation24_spill] sm:$0xff]  ;;  %v9704_v34 = vld [vmem:[#allocation23_spill] sm:$0xff]  ;;  %v9714_v8 = vld [vmem:[#allocation33_spill] sm:$0xff] }
 0x633   :  { %v6506_v56 = vpack.i.bf16 %v3666_v22, %v3665_v44  ;;  %v6511_v16 = vpack.i.bf16 %v4085_v29, %v4084_v18  ;;  %v6481_v38 = vpack.i.bf16 %v8996_v6, %v8994_v49  ;;  %v4311_v24 = vmul.f32 %v8980_v14, %v9701_v9  ;;  %v9705_v48 = vld [vmem:[#allocation28_spill] sm:$0xff]  ;;  %v9707_v22 = vld [vmem:[#allocation6_spill] sm:$0xff]  ;;  %v9710_v29 = vld [vmem:[#allocation31_spill] sm:$0xff] }
 0x634   :  { %6492 = vrot.lane.b32.xlu1 %v6491_v0, %s6642_s4  ;;  %v6516_v11 = vpack.i.bf16 %v9700_v23, %v4086_v39  ;;  %v6526_v36 = vpack.i.bf16 %v4090_v13, %v4089_v43  ;;  %v4087_v54 = vmul.f32 %v8961_v59, %v9702_v27  ;;  %v6486_v2 = vpack.i.bf16 %v8965_v45, %v8963_v47  ;;  %v9709_v18 = vld [vmem:[#allocation30_spill] sm:$0xff]  ;;  %v9713_v41 = vld [vmem:[#allocation35_spill] sm:$0xff] }
 0x635   :  { %v6536_v46 = vpack.i.bf16 %v9703_v1, %v4311_v24  ;;  %v4308_v19 = vmul.f32 %v8994_v49, %v9704_v34  ;;  %v4313_v0 = vmul.f32 %v8996_v6, %v9705_v48  ;;  %v3662_v44 = vmul.f32 %v8980_v14, %v9706_v50  ;;  %v9717_v24 = vld [vmem:[#allocation41_spill] sm:$0xff] }
 0x636   :  { %v4312_v55 = vmul.f32 %v8961_v59, %v9708_v10  ;;  %v4716_v4 = vmul.f32 %v8959_v20, %v9709_v18  ;;  %v3659_v28 = vmul.f32 %v8994_v49, %v9711_v53  ;;  %v4715_v39 = vmul.f32 %v8957_v63, %v9713_v41  ;;  %v9719_v1 = vld [vmem:[#allocation9_spill] sm:$0xff]  ;;  %v9724_v10 = vld [vmem:[#allocation46_spill] sm:$0xff]  ;;  %v9728_v41 = vld [vmem:[#allocation43_spill] sm:$0xff] }
 0x637   :  { %v6541_v32 = vpack.i.bf16 %v4313_v0, %v4308_v19  ;;  %v6496_v26 = vpack.i.bf16 %v9707_v22, %v3662_v44  ;;  %v4720_v43 = vmul.f32 %v8963_v47, %v9714_v8  ;;  %v4942_v27 = vmul.f32 %v8980_v14, %v9717_v24  ;;  %v9720_v19 = vld [vmem:[#allocation39_spill] sm:$0xff]  ;;  %v9721_v0 = vld [vmem:[#allocation42_spill] sm:$0xff]  ;;  %v9722_v44 = vld [vmem:[#allocation16_spill] sm:$0xff] }
 0x638   :  { %6507 = vrot.lane.b32.xlu0 %v6506_v56, %s6642_s4  ;;  %v4717_v56 = vmul.f32 %v8980_v14, %v9710_v29  ;;  %v4939_v48 = vmul.f32 %v8994_v49, %v9720_v19  ;;  %v4943_v50 = vmul.f32 %v8961_v59, %v9721_v0  ;;  %v9723_v22 = vld [vmem:[#allocation17_spill] sm:$0xff]  ;;  %v9725_v29 = vld [vmem:[#allocation47_spill] sm:$0xff]  ;;  %v9726_v53 = vld [vmem:[#allocation22_spill] sm:$0xff] }
 0x639   :  { %v6561_v23 = vpack.i.bf16 %v4720_v43, %v4715_v39  ;;  %v4944_v39 = vmul.f32 %v8996_v6, %v9728_v41  ;;  %v6596_v43 = vpack.i.bf16 %v8994_v49, %v8961_v59  ;;  %v9735_v19 = vld [vmem:[#allocation55_spill] sm:$0xff]  ;;  %v9736_v0 = vld [vmem:[#allocation66_spill] sm:$0xff] }
 0x63a   :  { %6477 = vrot.lane.b32.xlu2 %v6476_v30, %s6640_s1  ;;  %v9712_v30 = vld [vmem:[#allocation10_spill] sm:$0xff]  ;;  %v6551_v42 = vpack.i.bf16 %v4717_v56, %v4716_v4  ;;  %v6576_v18 = vpack.i.bf16 %v4939_v48, %v4943_v50  ;;  %v5381_v48 = vmul.f32 %v8957_v63, %v9735_v19  ;;  %v5386_v50 = vmul.f32 %v8963_v47, %v9736_v0 }
 0x63b   :  { %v9742_v0 = vld [vmem:[#allocation54_spill] sm:$0xff] }
 0x63c   :  { %6512 = vrot.lane.b32.xlu1 %v6511_v16, %s6644_s26  ;;  %v3664_v16 = vmul.f32 %v8996_v6, %v9712_v30  ;;  %v9727_v30 = vld [vmem:[#allocation21_spill] sm:$0xff] }
 0x63e   :  { %v6501_v13 = vpack.i.bf16 %v3664_v16, %v3659_v28  ;;  %v4309_v28 = vmul.f32 %v8957_v63, %v9726_v53  ;;  %v4310_v16 = vmul.f32 %v8959_v20, %v9727_v30  ;;  %v9740_v53 = vld [vmem:[#allocation44_spill] sm:$0xff]  ;;  %v9741_v30 = vld [vmem:[#allocation45_spill] sm:$0xff] }
 0x640   :  { %6517 = vrot.lane.b32.xlu0 %v6516_v11, %s6644_s26  ;;  %v9715_v11 = vld [vmem:[#allocation36_spill] sm:$0xff]  ;;  %v6531_v8 = vpack.i.bf16 %v4310_v16, %v4309_v28  ;;  %v4940_v28 = vmul.f32 %v8957_v63, %v9740_v53  ;;  %v4945_v16 = vmul.f32 %v8963_v47, %v9741_v30 }
 0x642   :  { %6482 = vrot.lane.b32.xlu2 %v6481_v38, %s6640_s1  ;;  %v4721_v38 = vmul.f32 %v8965_v45, %v9715_v11 }
 0x644   :  { %6527 = vrot.lane.b32.xlu1 %v6526_v36, %s6644_s26  ;;  %v9716_v36 = vld [vmem:[#allocation38_spill] sm:$0xff] }
 0x645   :  { %v4941_v9 = vmul.f32 %v8959_v20, %v9716_v36 }
 0x647   :  { %v6571_v34 = vpack.i.bf16 %v4942_v27, %v4941_v9  ;;  %v9731_v9 = vld [vmem:[#allocation58_spill] sm:$0xff]  ;;  %v9732_v27 = vld [vmem:[#allocation59_spill] sm:$0xff] }
 0x648   :  { %4112 = vrot.lane.b32.xlu0 %v4087_v54, %s6644_s26  ;;  %v9718_v54 = vld [vmem:[#allocation37_spill] sm:$0xff]  ;;  %v5382_v24 = vmul.f32 %v8959_v20, %v9731_v9 }
 0x64a   :  { %6487 = vrot.lane.b32.xlu2 %v6486_v2, %s6640_s1  ;;  %v6566_v2 = vpack.i.bf16 %v9718_v54, %v4721_v38  ;;  %v6601_v38 = vpack.i.bf16 %v8963_v47, %v8957_v63  ;;  %v5383_v54 = vmul.f32 %v8980_v14, %v9732_v27 }
 0x64c   :  { %6537 = vrot.lane.b32.xlu1 %v6536_v46, %s6645_s27  ;;  %v3663_v46 = vmul.f32 %v8961_v59, %v9719_v1 }
 0x650   :  { %6542 = vrot.lane.b32.xlu0 %v6541_v32, %s6645_s27  ;;  %v4083_v32 = vmul.f32 %v8994_v49, %v9722_v44  ;;  %v6611_v44 = vpack.i.bf16 %v5383_v54, %v5382_v24 }
 0x652   :  { %6497 = vrot.lane.b32.xlu2 %v6496_v26, %s6642_s4  ;;  %v4088_v26 = vmul.f32 %v8996_v6, %v9723_v22  ;;  %v6621_v22 = vpack.i.bf16 %v5386_v50, %v5381_v48  ;;  %v5380_v50 = vmul.f32 %v8994_v49, %v9742_v0 }
 0x654   :  { %4337 = vrot.lane.b32.xlu1 %v4312_v55, %s6645_s27  ;;  %v4946_v55 = vmul.f32 %v8965_v45, %v9724_v10  ;;  %v6521_v4 = vpack.i.bf16 %v4088_v26, %v4083_v32  ;;  %v9737_v26 = vld [vmem:[#allocation67_spill] sm:$0xff] }
 0x655   :  { %v5387_v10 = vmul.f32 %v8965_v45, %v9737_v26 }
 0x656   :  { %v6586_v56 = vpack.i.bf16 %v9725_v29, %v4946_v55  ;;  %v9738_v55 = vld [vmem:[#allocation68_spill] sm:$0xff] }
 0x658   :  { %6552 = vrot.lane.b32.xlu0 %v6551_v42, %s6643_s22  ;;  %v9729_v42 = vld [vmem:[#allocation29_spill] sm:$0xff] }
 0x65a   :  { %6502 = vrot.lane.b32.xlu2 %v6501_v13, %s6642_s4  ;;  %v4314_v13 = vmul.f32 %v8963_v47, %v9729_v42  ;;  %v6581_v42 = vpack.i.bf16 %v4945_v16, %v4940_v28 }
 0x65c   :  { %6562 = vrot.lane.b32.xlu1 %v6561_v23, %s6643_s22  ;;  %v9730_v23 = vld [vmem:[#allocation27_spill] sm:$0xff] }
 0x65d   :  { %v4315_v11 = vmul.f32 %v8965_v45, %v9730_v23 }
 0x65f   :  { %v6546_v36 = vpack.i.bf16 %v4315_v11, %v4314_v13  ;;  %v3518_v11 = vadd.f32 %v8923_v57, %v8921_v3  ;;  %v6606_v57 = vpack.i.bf16 0.0, %v8965_v45 }
 0x660   :  { %6567 = vrot.lane.b32.xlu0 %v6566_v2, %s6643_s22  ;;  %v9733_v2 = vld [vmem:[#allocation34_spill] sm:$0xff] }
 0x661   :  { %v4714_v1 = vmul.f32 %v8994_v49, %v9733_v2  ;;  %v3519_v9 = vadd.f32 %v3518_v11, %v8925_v60 }
 0x662   :  { %3895 = vrot.lane.b32.xlu2 %v3663_v46, %s6642_s4  ;;  %v9734_v46 = vld [vmem:[#allocation32_spill] sm:$0xff] }
 0x663   :  { %v3520_v2 = vadd.f32 %v3519_v9, %v8927_v58 }
 0x664   :  { %6572 = vrot.lane.b32.xlu1 %v6571_v34, %s6641_s20  ;;  %v4718_v34 = vmul.f32 %v8961_v59, %v9734_v46 }
 0x665   :  { %v3521_v60 = vadd.f32 %v3520_v2, %v8929_v37 }
 0x666   :  { %v6556_v32 = vpack.i.bf16 %v4714_v1, %v4718_v34 }
 0x667   :  { %v3522_v37 = vadd.f32 %v3521_v60, %v8931_v7 }
 0x668   :  { %6577 = vrot.lane.b32.xlu0 %v6576_v18, %s6641_s20  ;;  %v6626_v18 = vpack.i.bf16 %v9738_v55, %v5387_v10 }
 0x66a   :  { %6522 = vrot.lane.b32.xlu2 %v6521_v4, %s6644_s26  ;;  %v9739_v4 = vld [vmem:[#allocation40_spill] sm:$0xff] }
 0x66b   :  { %v4719_v29 = vmul.f32 %v8996_v6, %v9739_v4 }
 0x66c   :  { %6587 = vrot.lane.b32.xlu1 %v6586_v56, %s6641_s20 }
 0x670   :  { %4969 = vrot.lane.b32.xlu0 %v4944_v39, %s6641_s20 }
 0x672   :  { %6532 = vrot.lane.b32.xlu2 %v6531_v8, %s6645_s27  ;;  %v6214_v8 = vld [vmem:[%s9452_s3 + $0x8] sm:$0xff] }
 0x674   :  { %6597 = vrot.lane.b32.xlu1 %v6596_v43, %s6646_s29 }
 0x678   :  { %6602 = vrot.lane.b32.xlu0 %v6601_v38, %s6646_s29 }
 0x67a   :  { %6547 = vrot.lane.b32.xlu2 %v6546_v36, %s6645_s27  ;;  %v6591_v36 = vpack.i.bf16 %v8980_v14, %v8959_v20 }
 0x67c   :  { %5185 = vrot.lane.b32.xlu1 %v8996_v6, %s6646_s29 }
 0x680   :  { %6612 = vrot.lane.b32.xlu0 %v6611_v44, %s6639_s21  ;;  %v9743_v44 = vld [vmem:[#allocation62_spill] sm:$0xff] }
 0x682   :  { %6557 = vrot.lane.b32.xlu2 %v6556_v32, %s6643_s22  ;;  %v5384_v32 = vmul.f32 %v8961_v59, %v9743_v44 }
 0x684   :  { %6622 = vrot.lane.b32.xlu1 %v6621_v22, %s6639_s21  ;;  %v6616_v53 = vpack.i.bf16 %v5380_v50, %v5384_v32 }
 0x688   :  { %6627 = vrot.lane.b32.xlu0 %v6626_v18, %s6639_s21 }
 0x68a   :  { %4744 = vrot.lane.b32.xlu2 %v4719_v29, %s6643_s22 }
 0x68c   :  { %v6473_v56 = vpop.permute.xlu2 %6472 }
 0x68d   :  { %v6475_v41 = vunpack.i.h.bf16 %v6473_v56  ;;  %v6474_v39 = vunpack.i.l.bf16 %v6473_v56  ;;  %v3523_v56 = vadd.f32 %v3522_v37, %v8933_v21 }
 0x68f   :  { %v3699_v43 = vsel %vm721_vm1, %v6474_v39, %v6475_v41  ;;  %v3524_v21 = vadd.f32 %v3523_v56, %v8935_v33 }
 0x690   :  { %3771 = vmatpush.msra.mxu2 %v3699_v43 }
 0x691   :  { %6217 = vmatmul.msk.f32.vlgmr.msra.gmra.mxu2 %vm738_vm2, %v6214_v8 }
 0x692   :  { %6582 = vrot.lane.b32.xlu2 %v6581_v42, %s6641_s20  ;;  %v3667_v42 = vld [vmem:[%s9452_s3] sm:$0xff] }
 0x694   :  { %v6478_v13 = vpop.permute.xlu2 %6477 }
 0x695   :  { %v6479_v23 = vunpack.i.l.bf16 %v6478_v13  ;;  %v6480_v27 = vunpack.i.h.bf16 %v6478_v13 }
 0x697   :  { %v3700_v38 = vsel %vm721_vm1, %v6475_v41, %v6479_v23 }
 0x698   :  { %3791 = vmatpush.msra.mxu3 %v3700_v38 }
 0x699   :  { %6218 = vmatmul.msk.f32.vlgmr.msra.gmra.mxu3 %vm738_vm2, %v6214_v8 }
 0x69a   :  { %6592 = vrot.lane.b32.xlu2 %v6591_v36, %s6646_s29 }
 0x69c   :  { %v6483_v24 = vpop.permute.xlu2 %6482 }
 0x69d   :  { %v6484_v54 = vunpack.i.l.bf16 %v6483_v24  ;;  %v6485_v46 = vunpack.i.h.bf16 %v6483_v24 }
 0x69f   :  { %v3697_v1 = vsel %vm721_vm1, %v6480_v27, %v6484_v54  ;;  %v3698_v3 = vsel %vm721_vm1, %v6484_v54, %v6474_v39 }
 0x6a0   :  { %3731 = vmatpush.msra.mxu0 %v3697_v1  ;;  %3751 = vmatpush.msra.mxu1 %v3698_v3 }
 0x6a1   :  { %6215 = vmatmul.msk.f32.vlgmr.msra.gmra.mxu0 %vm738_vm2, %v6214_v8  ;;  %6216 = vmatmul.msk.f32.vlgmr.msra.gmra.mxu1 %vm738_vm2, %v6214_v8 }
 0x6a2   :  { %6607 = vrot.lane.b32.xlu2 %v6606_v57, %s6646_s29  ;;  %v3690_v34 = vpop.permute.xlu0 %3689 }
 0x6a3   :  { %v3701_v58 = vsel %vm721_vm1, %v6479_v23, %v3690_v34  ;;  %v3702_v19 = vsel %vm721_vm1, %v3690_v34, %v6485_v46  ;;  %v9744_v23 = vld [vmem:[#allocation63_spill] sm:$0xff] }
 0x6a4   :  { %v6488_v48 = vpop.permute.xlu2 %6487  ;;  %3811 = vmatpush.msrb.mxu0 %v3701_v58  ;;  %3831 = vmatpush.msrb.mxu1 %v3702_v19  ;;  %v5385_v11 = vmul.f32 %v8996_v6, %v9744_v23 }
 0x6a5   :  { %v6490_v22 = vunpack.i.h.bf16 %v6488_v48  ;;  %v6489_v26 = vunpack.i.l.bf16 %v6488_v48 }
 0x6a6   :  { %v6493_v10 = vpop.permute.xlu1 %6492 }
 0x6a7   :  { %v6495_v55 = vunpack.i.h.bf16 %v6493_v10  ;;  %v6494_v18 = vunpack.i.l.bf16 %v6493_v10  ;;  %v3703_v4 = vsel %vm721_vm1, %v6485_v46, %v6489_v26  ;;  %v3704_v29 = vsel %vm721_vm1, %v6489_v26, %v6490_v22  ;;  %v6231_v22 = vld [vmem:[%s9452_s3 + $0x10] sm:$0xff] }
 0x6a8   :  { %3851 = vmatpush.msrb.mxu2 %v3703_v4  ;;  %3871 = vmatpush.msrb.mxu3 %v3704_v29  ;;  %v3538_v29 = vadd.f32 %v8939_v17, %v8937_v15 }
 0x6a9   :  { %6221 = vmatmul.msk.f32.vlgmr.msrb.gmra.mxu2 %vm738_vm2, %v6214_v8  ;;  %6222 = vmatmul.msk.f32.vlgmr.msrb.gmra.mxu3 %vm738_vm2, %v6214_v8  ;;  %v3905_v28 = vsel %vm956_vm4, %v6494_v18, %v6495_v55 }
 0x6aa   :  { %3977 = vmatpush.msra.mxu2 %v3905_v28  ;;  %6617 = vrot.lane.b32.xlu2 %v6616_v53, %s6639_s21  ;;  %v6508_v7 = vpop.permute.xlu0 %6507 }
 0x6ab   :  { %6219 = vmatmul.msk.f32.vlgmr.msrb.gmra.mxu0 %vm738_vm2, %v6214_v8  ;;  %6220 = vmatmul.msk.f32.vlgmr.msrb.gmra.mxu1 %vm738_vm2, %v6214_v8  ;;  %v6510_v16 = vunpack.i.h.bf16 %v6508_v7  ;;  %v6509_v41 = vunpack.i.l.bf16 %v6508_v7 }
 0x6ac   :  { %v6498_v30 = vpop.permute.xlu2 %6497 }
 0x6ad   :  { %v6499_v39 = vunpack.i.l.bf16 %v6498_v30  ;;  %v3910_v33 = vsel %vm956_vm4, %v6509_v41, %v6510_v16  ;;  %v6500_v24 = vunpack.i.h.bf16 %v6498_v30 }
 0x6ae   :  { %v6513_v43 = vpop.permute.xlu1 %6512  ;;  %3525 = vadd.xlane.f32.xlu1 %v3524_v21  ;;  %v3539_v21 = vadd.f32 %v3538_v29, %v8941_v5 }
 0x6af   :  { %v3906_v13 = vsel %vm956_vm4, %v6495_v55, %v6499_v39  ;;  %v6515_v38 = vunpack.i.h.bf16 %v6513_v43  ;;  %v6514_v2 = vunpack.i.l.bf16 %v6513_v43 }
 0x6b0   :  { %3997 = vmatpush.msra.mxu3 %v3906_v13  ;;  %v3540_v5 = vadd.f32 %v3539_v21, %v8943_v12  ;;  %v6258_v21 = vld [vmem:[%s9452_s3 + $0x28] sm:$0xff] }
 0x6b1   :  { %6225 = vmatmul.msk.f32.vlgmr.msra.gmra.mxu2 %vm738_vm2, %v3667_v42  ;;  %6226 = vmatmul.msk.f32.vlgmr.msra.gmra.mxu3 %vm738_vm2, %v3667_v42  ;;  %v4122_v48 = vsel %vm1244_vm6, %v6514_v2, %v6515_v38 }
 0x6b2   :  { %4077 = vmatpush.msrb.mxu3 %v3910_v33  ;;  %5410 = vrot.lane.b32.xlu2 %v5385_v11, %s6639_s21  ;;  %v6518_v8 = vpop.permute.xlu0 %6517 }
 0x6b3   :  { %v6519_v36 = vunpack.i.l.bf16 %v6518_v8  ;;  %v6520_v55 = vunpack.i.h.bf16 %v6518_v8 }
 0x6b4   :  { %v6503_v9 = vpop.permute.xlu2 %6502 }
 0x6b5   :  { %v6505_v27 = vunpack.i.h.bf16 %v6503_v9  ;;  %v6504_v54 = vunpack.i.l.bf16 %v6503_v9  ;;  %v4123_v3 = vsel %vm1244_vm6, %v6515_v38, %v6519_v36 }
 0x6b6   :  { %v6528_v1 = vpop.permute.xlu1 %6527  ;;  %4214 = vmatpush.msra.mxu3 %v4123_v3 }
 0x6b7   :  { %v6530_v57 = vunpack.i.h.bf16 %v6528_v1  ;;  %v6529_v60 = vunpack.i.l.bf16 %v6528_v1  ;;  %v3903_v46 = vsel %vm956_vm4, %v6500_v24, %v6504_v54  ;;  %v3904_v34 = vsel %vm956_vm4, %v6504_v54, %v6494_v18  ;;  %v3460_v24 = vpop.f32.mrf.mxu1  ;;  %v3483_v54 = vpop.f32.mrf.mxu2 }
 0x6b8   :  { %3937 = vmatpush.msra.mxu0 %v3903_v46  ;;  %3957 = vmatpush.msra.mxu1 %v3904_v34  ;;  %v3909_v58 = vsel %vm956_vm4, %v6505_v27, %v6509_v41 }
 0x6b9   :  { %4057 = vmatpush.msrb.mxu2 %v3909_v58  ;;  %6223 = vmatmul.msk.f32.vlgmr.msra.gmra.mxu0 %vm738_vm2, %v3667_v42  ;;  %v4127_v19 = vsel %vm1244_vm6, %v6529_v60, %v6530_v57  ;;  %v3506_v58 = vpop.f32.mrf.mxu3 }
 0x6ba   :  { %6224 = vmatmul.msk.f32.vlgmr.msra.gmra.mxu1 %vm738_vm2, %v3667_v42  ;;  %6229 = vmatmul.msk.f32.vlgmr.msrb.gmra.mxu2 %vm738_vm2, %v3667_v42  ;;  %v4113_v0 = vpop.permute.xlu0 %4112 }
 0x6bb   :  { %6230 = vmatmul.msk.f32.vlgmr.msrb.gmra.mxu3 %vm738_vm2, %v3667_v42  ;;  %4194 = vmatpush.msra.mxu2 %v4122_v48  ;;  %v4124_v16 = vsel %vm1244_vm6, %v6519_v36, %v4113_v0  ;;  %v6240_v36 = vld [vmem:[%s9452_s3 + $0x18] sm:$0xff] }
 0x6bc   :  { %4294 = vmatpush.msrb.mxu3 %v4127_v19  ;;  %v3896_v50 = vpop.permute.xlu2 %3895 }
 0x6bd   :  { %v3907_v44 = vsel %vm956_vm4, %v6499_v39, %v3896_v50  ;;  %v3908_v32 = vsel %vm956_vm4, %v3896_v50, %v6505_v27 }
 0x6be   :  { %4017 = vmatpush.msrb.mxu0 %v3907_v44  ;;  %4037 = vmatpush.msrb.mxu1 %v3908_v32  ;;  %v6538_v26 = vpop.permute.xlu1 %6537 }
 0x6bf   :  { %v6540_v41 = vunpack.i.h.bf16 %v6538_v26  ;;  %v6539_v13 = vunpack.i.l.bf16 %v6538_v26 }
 0x6c1   :  { %6227 = vmatmul.msk.f32.vlgmr.msrb.gmra.mxu0 %vm738_vm2, %v3667_v42 }
 0x6c2   :  { %6228 = vmatmul.msk.f32.vlgmr.msrb.gmra.mxu1 %vm738_vm2, %v3667_v42  ;;  %6234 = vmatmul.msk.f32.vlgmr.msra.gmra.mxu2 %vm738_vm2, %v6231_v22  ;;  %v6543_v37 = vpop.permute.xlu0 %6542  ;;  %v3437_v42 = vpop.f32.mrf.mxu0 }
 0x6c3   :  { %6235 = vmatmul.msk.f32.vlgmr.msra.gmra.mxu3 %vm738_vm2, %v6231_v22  ;;  %v6544_v56 = vunpack.i.l.bf16 %v6543_v37  ;;  %v6545_v8 = vunpack.i.h.bf16 %v6543_v37  ;;  %v3541_v9 = vadd.f32 %v3540_v5, %v3437_v42 }
 0x6c4   :  { %v6523_v10 = vpop.permute.xlu2 %6522 }
 0x6c5   :  { %v6525_v18 = vunpack.i.h.bf16 %v6523_v10  ;;  %v6524_v4 = vunpack.i.l.bf16 %v6523_v10  ;;  %v4345_v15 = vsel %vm1539_vm7, %v6540_v41, %v6544_v56  ;;  %v3542_v1 = vadd.f32 %v3541_v9, %v3460_v24 }
 0x6c6   :  { %v4338_v23 = vpop.permute.xlu1 %4337 }
 0x6c7   :  { %v4120_v53 = vsel %vm1244_vm6, %v6520_v55, %v6524_v4  ;;  %v4121_v28 = vsel %vm1244_vm6, %v6524_v4, %v6514_v2  ;;  %v4126_v7 = vsel %vm1244_vm6, %v6525_v18, %v6529_v60  ;;  %v4125_v30 = vsel %vm1244_vm6, %v4113_v0, %v6525_v18 }
 0x6c8   :  { %4154 = vmatpush.msra.mxu0 %v4120_v53  ;;  %4174 = vmatpush.msra.mxu1 %v4121_v28  ;;  %v4349_v12 = vsel %vm1539_vm7, %v6539_v13, %v4338_v23  ;;  %v4350_v27 = vsel %vm1539_vm7, %v4338_v23, %v6545_v8  ;;  %v3543_v60 = vadd.f32 %v3542_v1, %v3483_v54 }
 0x6c9   :  { %4274 = vmatpush.msrb.mxu2 %v4126_v7  ;;  %6232 = vmatmul.msk.f32.vlgmr.msra.gmra.mxu0 %vm738_vm2, %v6231_v22 }
 0x6ca   :  { %6233 = vmatmul.msk.f32.vlgmr.msra.gmra.mxu1 %vm738_vm2, %v6231_v22  ;;  %4234 = vmatpush.msrb.mxu0 %v4124_v16  ;;  %v6553_v19 = vpop.permute.xlu0 %6552  ;;  %v3544_v48 = vadd.f32 %v3543_v60, %v3506_v58 }
 0x6cb   :  { %4254 = vmatpush.msrb.mxu1 %v4125_v30  ;;  %6238 = vmatmul.msk.f32.vlgmr.msrb.gmra.mxu2 %vm738_vm2, %v6231_v22  ;;  %v6555_v50 = vunpack.i.h.bf16 %v6553_v19  ;;  %v6554_v44 = vunpack.i.l.bf16 %v6553_v19 }
 0x6cc   :  { %6239 = vmatmul.msk.f32.vlgmr.msrb.gmra.mxu3 %vm738_vm2, %v6231_v22  ;;  %4379 = vmatpush.msra.mxu0 %v4345_v15  ;;  %v6533_v17 = vpop.permute.xlu2 %6532 }
 0x6cd   :  { %v6535_v39 = vunpack.i.h.bf16 %v6533_v17  ;;  %v6534_v43 = vunpack.i.l.bf16 %v6533_v17 }
 0x6ce   :  { %v6563_v32 = vpop.permute.xlu1 %6562 }
 0x6cf   :  { %v4346_v11 = vsel %vm1539_vm7, %v6544_v56, %v6534_v43  ;;  %v4347_v33 = vsel %vm1539_vm7, %v6534_v43, %v6535_v39  ;;  %v4348_v38 = vsel %vm1539_vm7, %v6535_v39, %v6539_v13  ;;  %v6564_v26 = vunpack.i.l.bf16 %v6563_v32 }
 0x6d0   :  { %4399 = vmatpush.msra.mxu1 %v4346_v11  ;;  %4419 = vmatpush.msra.mxu2 %v4347_v33  ;;  %v6565_v55 = vunpack.i.h.bf16 %v6563_v32 }
 0x6d1   :  { %4439 = vmatpush.msra.mxu3 %v4348_v38  ;;  %6236 = vmatmul.msk.f32.vlgmr.msrb.gmra.mxu0 %vm738_vm2, %v6231_v22 }
 0x6d2   :  { %6237 = vmatmul.msk.f32.vlgmr.msrb.gmra.mxu1 %vm738_vm2, %v6231_v22  ;;  %4459 = vmatpush.msrb.mxu0 %v4349_v12 }
 0x6d3   :  { %6243 = vmatmul.msk.f32.vlgmr.msra.gmra.mxu2 %vm738_vm2, %v6240_v36  ;;  %4479 = vmatpush.msrb.mxu1 %v4350_v27 }
 0x6d4   :  { %6244 = vmatmul.msk.f32.vlgmr.msra.gmra.mxu3 %vm738_vm2, %v6240_v36  ;;  %v6548_v2 = vpop.permute.xlu2 %6547 }
 0x6d5   :  { %v6550_v3 = vunpack.i.h.bf16 %v6548_v2  ;;  %v6549_v57 = vunpack.i.l.bf16 %v6548_v2  ;;  %v6267_v2 = vld [vmem:[%s9452_s3 + $0x30] sm:$0xff] }
 0x6d6   :  { %v6573_v18 = vpop.permute.xlu1 %6572 }
 0x6d7   :  { %v4351_v46 = vsel %vm1539_vm7, %v6545_v8, %v6549_v57  ;;  %v4352_v34 = vsel %vm1539_vm7, %v6549_v57, %v6550_v3  ;;  %v6575_v53 = vunpack.i.h.bf16 %v6573_v18  ;;  %v6574_v28 = vunpack.i.l.bf16 %v6573_v18 }
 0x6d8   :  { %4499 = vmatpush.msrb.mxu2 %v4351_v46  ;;  %4519 = vmatpush.msrb.mxu3 %v4352_v34 }
 0x6d9   :  { %6241 = vmatmul.msk.f32.vlgmr.msra.gmra.mxu0 %vm738_vm2, %v6240_v36  ;;  %v4979_v15 = vsel %vm1188_vm3, %v6574_v28, %v6575_v53 }
 0x6da   :  { %4592 = vmatpush.msra.mxu2 %v8959_v20  ;;  %6242 = vmatmul.msk.f32.vlgmr.msra.gmra.mxu1 %vm738_vm2, %v6240_v36 }
 0x6db   :  { %4552 = vmatpush.msra.mxu0 %v8994_v49  ;;  %6247 = vmatmul.msk.f32.vlgmr.msrb.gmra.mxu2 %vm738_vm2, %v6240_v36  ;;  %v6249_v49 = vld [vmem:[%s9452_s3 + $0x20] sm:$0xff] }
 0x6dc   :  { %4572 = vmatpush.msra.mxu1 %v8957_v63  ;;  %6248 = vmatmul.msk.f32.vlgmr.msrb.gmra.mxu3 %vm738_vm2, %v6240_v36  ;;  %v6558_v0 = vpop.permute.xlu2 %6557  ;;  %v6568_v63 = vpop.permute.xlu0 %6567 }
 0x6dd   :  { %4672 = vmatpush.msrb.mxu2 %v8963_v47  ;;  %4612 = vmatpush.msra.mxu3 %v8980_v14  ;;  %v6559_v20 = vunpack.i.l.bf16 %v6558_v0  ;;  %v6560_v14 = vunpack.i.h.bf16 %v6558_v0  ;;  %v6569_v37 = vunpack.i.l.bf16 %v6568_v63  ;;  %v6570_v10 = vunpack.i.h.bf16 %v6568_v63 }
 0x6de   :  { %3545 = vadd.xlane.f32.xlu2 %v3544_v48  ;;  %v6588_v5 = vpop.permute.xlu1 %6587 }
 0x6df   :  { %4692 = vmatpush.msrb.mxu3 %v8965_v45  ;;  %v4755_v47 = vsel %vm1483_vm5, %v6555_v50, %v6559_v20  ;;  %v4754_v45 = vsel %vm1483_vm5, %v6554_v44, %v6555_v50  ;;  %v4758_v4 = vsel %vm1483_vm5, %v6565_v55, %v6569_v37  ;;  %v4759_v56 = vsel %vm1483_vm5, %v6569_v37, %v6570_v10  ;;  %v6276_v37 = vld [vmem:[%s9452_s3 + $0x38] sm:$0xff] }
 0x6e0   :  { %v6590_v23 = vunpack.i.h.bf16 %v6588_v5  ;;  %v6589_v11 = vunpack.i.l.bf16 %v6588_v5 }
 0x6e1   :  { %6245 = vmatmul.msk.f32.vlgmr.msrb.gmra.mxu0 %vm738_vm2, %v6240_v36 }
 0x6e2   :  { %6246 = vmatmul.msk.f32.vlgmr.msrb.gmra.mxu1 %vm738_vm2, %v6240_v36  ;;  %4632 = vmatpush.msrb.mxu0 %v8961_v59  ;;  %v4752_v59 = vsel %vm1483_vm5, %v6560_v14, %v6564_v26  ;;  %v4984_v9 = vsel %vm1188_vm3, %v6589_v11, %v6590_v23 }
 0x6e3   :  { %6252 = vmatmul.msk.f32.vlgmr.msra.gmra.mxu2 %vm738_vm2, %v6249_v49  ;;  %4652 = vmatpush.msrb.mxu1 %v8996_v6  ;;  %v4753_v6 = vsel %vm1483_vm5, %v6564_v26, %v6554_v44 }
 0x6e4   :  { %6253 = vmatmul.msk.f32.vlgmr.msra.gmra.mxu3 %vm738_vm2, %v6249_v49  ;;  %4826 = vmatpush.msra.mxu2 %v4754_v45  ;;  %v4745_v22 = vpop.permute.xlu2 %4744  ;;  %v6578_v29 = vpop.permute.xlu0 %6577 }
 0x6e5   :  { %4846 = vmatpush.msra.mxu3 %v4755_v47  ;;  %v6579_v30 = vunpack.i.l.bf16 %v6578_v29  ;;  %v4756_v16 = vsel %vm1483_vm5, %v6559_v20, %v4745_v22  ;;  %v4757_v41 = vsel %vm1483_vm5, %v4745_v22, %v6565_v55  ;;  %v6580_v42 = vunpack.i.h.bf16 %v6578_v29 }
 0x6e6   :  { %v6598_v12 = vpop.permute.xlu1 %6597 }
 0x6e7   :  { %v4980_v17 = vsel %vm1188_vm3, %v6575_v53, %v6579_v30  ;;  %v6599_v3 = vunpack.i.l.bf16 %v6598_v12  ;;  %v6600_v19 = vunpack.i.h.bf16 %v6598_v12 }
 0x6e9   :  { %6250 = vmatmul.msk.f32.vlgmr.msra.gmra.mxu0 %vm738_vm2, %v6249_v49 }
 0x6ea   :  { %6251 = vmatmul.msk.f32.vlgmr.msra.gmra.mxu1 %vm738_vm2, %v6249_v49  ;;  %4786 = vmatpush.msra.mxu0 %v4752_v59 }
 0x6eb   :  { %6256 = vmatmul.msk.f32.vlgmr.msrb.gmra.mxu2 %vm738_vm2, %v6249_v49  ;;  %4806 = vmatpush.msra.mxu1 %v4753_v6 }
 0x6ec   :  { %6257 = vmatmul.msk.f32.vlgmr.msrb.gmra.mxu3 %vm738_vm2, %v6249_v49  ;;  %4906 = vmatpush.msrb.mxu2 %v4758_v4  ;;  %v6583_v7 = vpop.permute.xlu2 %6582  ;;  %v4970_v43 = vpop.permute.xlu0 %4969 }
 0x6ed   :  { %4926 = vmatpush.msrb.mxu3 %v4759_v56  ;;  %v6584_v39 = vunpack.i.l.bf16 %v6583_v7  ;;  %v6585_v13 = vunpack.i.h.bf16 %v6583_v7  ;;  %v4981_v1 = vsel %vm1188_vm3, %v6579_v30, %v4970_v43 }
 0x6ee   :  { %v5186_v50 = vpop.permute.xlu1 %5185 }
 0x6ef   :  { %v4977_v8 = vsel %vm1188_vm3, %v6580_v42, %v6584_v39  ;;  %v4978_v38 = vsel %vm1188_vm3, %v6584_v39, %v6574_v28  ;;  %v4983_v36 = vsel %vm1188_vm3, %v6585_v13, %v6589_v11  ;;  %v4982_v57 = vsel %vm1188_vm3, %v4970_v43, %v6585_v13 }
 0x6f0   :  { %v5197_v10 = vsel %vm2596_vm8, %v6599_v3, %v5186_v50 }
 0x6f1   :  { %6254 = vmatmul.msk.f32.vlgmr.msrb.gmra.mxu0 %vm738_vm2, %v6249_v49 }
 0x6f2   :  { %6255 = vmatmul.msk.f32.vlgmr.msrb.gmra.mxu1 %vm738_vm2, %v6249_v49  ;;  %4866 = vmatpush.msrb.mxu0 %v4756_v16 }
 0x6f3   :  { %6261 = vmatmul.msk.f32.vlgmr.msra.gmra.mxu2 %vm738_vm2, %v6258_v21  ;;  %4886 = vmatpush.msrb.mxu1 %v4757_v41 }
 0x6f4   :  { %6262 = vmatmul.msk.f32.vlgmr.msra.gmra.mxu3 %vm738_vm2, %v6258_v21  ;;  %5051 = vmatpush.msra.mxu2 %v4979_v15  ;;  %v6593_v33 = vpop.permute.xlu2 %6592  ;;  %v6603_v54 = vpop.permute.xlu0 %6602 }
 0x6f5   :  { %5071 = vmatpush.msra.mxu3 %v4980_v17  ;;  %v6595_v24 = vunpack.i.h.bf16 %v6593_v33  ;;  %v6594_v27 = vunpack.i.l.bf16 %v6593_v33  ;;  %v6604_v58 = vunpack.i.l.bf16 %v6603_v54  ;;  %v6605_v20 = vunpack.i.h.bf16 %v6603_v54  ;;  %v6285_v17 = vld [vmem:[%s9452_s3 + $0x40] sm:$0xff] }
 0x6f6   :  { %v6623_v59 = vpop.permute.xlu1 %6622 }
 0x6f7   :  { %v5195_v46 = vsel %vm2596_vm8, %v6594_v27, %v6595_v24  ;;  %v5196_v34 = vsel %vm2596_vm8, %v6595_v24, %v6599_v3  ;;  %v5193_v44 = vsel %vm2596_vm8, %v6600_v19, %v6604_v58  ;;  %v5194_v32 = vsel %vm2596_vm8, %v6604_v58, %v6594_v27 }
 0x6f8   :  { %v5198_v55 = vsel %vm2596_vm8, %v5186_v50, %v6605_v20  ;;  %v6624_v56 = vunpack.i.l.bf16 %v6623_v59  ;;  %v6625_v7 = vunpack.i.h.bf16 %v6623_v59 }
 0x6f9   :  { %6259 = vmatmul.msk.f32.vlgmr.msra.gmra.mxu0 %vm738_vm2, %v6258_v21 }
 0x6fa   :  { %6260 = vmatmul.msk.f32.vlgmr.msra.gmra.mxu1 %vm738_vm2, %v6258_v21  ;;  %5011 = vmatpush.msra.mxu0 %v4977_v8 }
 0x6fb   :  { %6265 = vmatmul.msk.f32.vlgmr.msrb.gmra.mxu2 %vm738_vm2, %v6258_v21  ;;  %5031 = vmatpush.msra.mxu1 %v4978_v38 }
 0x6fc   :  { %6266 = vmatmul.msk.f32.vlgmr.msrb.gmra.mxu3 %vm738_vm2, %v6258_v21  ;;  %5131 = vmatpush.msrb.mxu2 %v4983_v36  ;;  %v6608_v60 = vpop.permute.xlu2 %6607  ;;  %v6613_v49 = vpop.permute.xlu0 %6612 }
 0x6fd   :  { %5151 = vmatpush.msrb.mxu3 %v4984_v9  ;;  %v6609_v48 = vunpack.i.l.bf16 %v6608_v60  ;;  %v6610_v0 = vunpack.i.h.bf16 %v6608_v60  ;;  %v6615_v14 = vunpack.i.h.bf16 %v6613_v49  ;;  %v6614_v22 = vunpack.i.l.bf16 %v6613_v49 }
 0x6ff   :  { %v5199_v63 = vsel %vm2596_vm8, %v6605_v20, %v6609_v48  ;;  %v5200_v47 = vsel %vm2596_vm8, %v6609_v48, %v6610_v0  ;;  %v5420_v6 = vsel %vm663_vm0, %v6614_v22, %v6615_v14 }
 0x701   :  { %6263 = vmatmul.msk.f32.vlgmr.msrb.gmra.mxu0 %vm738_vm2, %v6258_v21 }
 0x702   :  { %6264 = vmatmul.msk.f32.vlgmr.msrb.gmra.mxu1 %vm738_vm2, %v6258_v21  ;;  %5091 = vmatpush.msrb.mxu0 %v4981_v1  ;;  %v5419_v21 = vsel %vm663_vm0, %v6624_v56, %v6614_v22 }
 0x703   :  { %6270 = vmatmul.msk.f32.vlgmr.msra.gmra.mxu2 %vm738_vm2, %v6267_v2  ;;  %5111 = vmatpush.msrb.mxu1 %v4982_v57 }
 0x704   :  { %6271 = vmatmul.msk.f32.vlgmr.msra.gmra.mxu3 %vm738_vm2, %v6267_v2  ;;  %5267 = vmatpush.msra.mxu2 %v5195_v46  ;;  %v6618_v45 = vpop.permute.xlu2 %6617  ;;  %v6628_v18 = vpop.permute.xlu0 %6627 }
 0x705   :  { %5287 = vmatpush.msra.mxu3 %v5196_v34  ;;  %v6619_v26 = vunpack.i.l.bf16 %v6618_v45  ;;  %v6620_v29 = vunpack.i.h.bf16 %v6618_v45  ;;  %v6629_v53 = vunpack.i.l.bf16 %v6628_v18  ;;  %v6630_v28 = vunpack.i.h.bf16 %v6628_v18 }
 0x707   :  { %v5421_v4 = vsel %vm663_vm0, %v6615_v14, %v6619_v26  ;;  %v5418_v30 = vsel %vm663_vm0, %v6620_v29, %v6624_v56  ;;  %v5424_v16 = vsel %vm663_vm0, %v6625_v7, %v6629_v53  ;;  %v5425_v41 = vsel %vm663_vm0, %v6629_v53, %v6630_v28 }
 0x709   :  { %6268 = vmatmul.msk.f32.vlgmr.msra.gmra.mxu0 %vm738_vm2, %v6267_v2 }
 0x70a   :  { %6269 = vmatmul.msk.f32.vlgmr.msra.gmra.mxu1 %vm738_vm2, %v6267_v2  ;;  %5227 = vmatpush.msra.mxu0 %v5193_v44 }
 0x70b   :  { %6274 = vmatmul.msk.f32.vlgmr.msrb.gmra.mxu2 %vm738_vm2, %v6267_v2  ;;  %5247 = vmatpush.msra.mxu1 %v5194_v32 }
 0x70c   :  { %6275 = vmatmul.msk.f32.vlgmr.msrb.gmra.mxu3 %vm738_vm2, %v6267_v2  ;;  %5347 = vmatpush.msrb.mxu2 %v5199_v63  ;;  %v5411_v15 = vpop.permute.xlu2 %5410 }
 0x70d   :  { %5367 = vmatpush.msrb.mxu3 %v5200_v47  ;;  %v5422_v5 = vsel %vm663_vm0, %v6619_v26, %v5411_v15  ;;  %v5423_v43 = vsel %vm663_vm0, %v5411_v15, %v6625_v7 }
 0x711   :  { %6272 = vmatmul.msk.f32.vlgmr.msrb.gmra.mxu0 %vm738_vm2, %v6267_v2 }
 0x712   :  { %6273 = vmatmul.msk.f32.vlgmr.msrb.gmra.mxu1 %vm738_vm2, %v6267_v2  ;;  %5307 = vmatpush.msrb.mxu0 %v5197_v10 }
 0x713   :  { %6279 = vmatmul.msk.f32.vlgmr.msra.gmra.mxu2 %vm738_vm2, %v6276_v37  ;;  %5327 = vmatpush.msrb.mxu1 %v5198_v55 }
 0x714   :  { %6280 = vmatmul.msk.f32.vlgmr.msra.gmra.mxu3 %vm738_vm2, %v6276_v37  ;;  %5492 = vmatpush.msra.mxu2 %v5420_v6  ;;  %v3773_v42 = vpop.f32.mrf.mxu2 }
 0x715   :  { %5512 = vmatpush.msra.mxu3 %v5421_v4 }
 0x719   :  { %6277 = vmatmul.msk.f32.vlgmr.msra.gmra.mxu0 %vm738_vm2, %v6276_v37 }
 0x71a   :  { %6278 = vmatmul.msk.f32.vlgmr.msra.gmra.mxu1 %vm738_vm2, %v6276_v37  ;;  %5452 = vmatpush.msra.mxu0 %v5418_v30 }
 0x71b   :  { %6283 = vmatmul.msk.f32.vlgmr.msrb.gmra.mxu2 %vm738_vm2, %v6276_v37  ;;  %5472 = vmatpush.msra.mxu1 %v5419_v21 }
 0x71c   :  { %6284 = vmatmul.msk.f32.vlgmr.msrb.gmra.mxu3 %vm738_vm2, %v6276_v37  ;;  %5572 = vmatpush.msrb.mxu2 %v5424_v16  ;;  %v3793_v13 = vpop.f32.mrf.mxu3 }
 0x71d   :  { %5592 = vmatpush.msrb.mxu3 %v5425_v41 }
 0x71e   :  { %v3733_v39 = vpop.f32.mrf.mxu0  ;;  %v3753_v23 = vpop.f32.mrf.mxu1 }
 0x721   :  { %6281 = vmatmul.msk.f32.vlgmr.msrb.gmra.mxu0 %vm738_vm2, %v6276_v37 }
 0x722   :  { %6282 = vmatmul.msk.f32.vlgmr.msrb.gmra.mxu1 %vm738_vm2, %v6276_v37  ;;  %5532 = vmatpush.msrb.mxu0 %v5422_v5 }
 0x723   :  { %6288 = vmatmul.msk.f32.vlgmr.msra.gmra.mxu2 %vm738_vm2, %v6285_v17  ;;  %5552 = vmatpush.msrb.mxu1 %v5423_v43 }
 0x724   :  { %6289 = vmatmul.msk.f32.vlgmr.msra.gmra.mxu3 %vm738_vm2, %v6285_v17 }
 0x728   :  { %v3813_v11 = vpop.f32.mrf.mxu0  ;;  %v3833_v38 = vpop.f32.mrf.mxu1 }
 0x729   :  { %6286 = vmatmul.msk.f32.vlgmr.msra.gmra.mxu0 %vm738_vm2, %v6285_v17 }
 0x72a   :  { %6287 = vmatmul.msk.f32.vlgmr.msra.gmra.mxu1 %vm738_vm2, %v6285_v17 }
 0x72b   :  { %6292 = vmatmul.msk.f32.vlgmr.msrb.gmra.mxu2 %vm738_vm2, %v6285_v17 }
 0x72c   :  { %6293 = vmatmul.msk.f32.vlgmr.msrb.gmra.mxu3 %vm738_vm2, %v6285_v17  ;;  %v3853_v33 = vpop.f32.mrf.mxu2  ;;  %v3873_v8 = vpop.f32.mrf.mxu3 }
 0x731   :  { %6290 = vmatmul.msk.f32.vlgmr.msrb.gmra.mxu0 %vm738_vm2, %v6285_v17 }
 0x732   :  { %6291 = vmatmul.msk.f32.vlgmr.msrb.gmra.mxu1 %vm738_vm2, %v6285_v17 }
 0x734   :  { %v3979_v36 = vpop.f32.mrf.mxu2  ;;  %v3999_v9 = vpop.f32.mrf.mxu3 }
 0x735   :  { %v3980_v12 = vadd.f32 %v3979_v36, %v3773_v42  ;;  %v4000_v24 = vadd.f32 %v3999_v9, %v3793_v13 }
 0x736   :  { %v3939_v27 = vpop.f32.mrf.mxu0 }
 0x737   :  { %v3940_v54 = vadd.f32 %v3939_v27, %v3733_v39  ;;  %v3959_v2 = vpop.f32.mrf.mxu1 }
 0x738   :  { %v3960_v1 = vadd.f32 %v3959_v2, %v3753_v23 }
 0x73d   :  { %v4059_v3 = vpop.f32.mrf.mxu2 }
 0x73e   :  { %v4060_v57 = vadd.f32 %v4059_v3, %v3853_v33  ;;  %v4079_v60 = vpop.f32.mrf.mxu3  ;;  %v4019_v46 = vpop.f32.mrf.mxu0 }
 0x73f   :  { %v4080_v34 = vadd.f32 %v4079_v60, %v3873_v8  ;;  %v4020_v58 = vadd.f32 %v4019_v46, %v3813_v11  ;;  %v4039_v19 = vpop.f32.mrf.mxu1 }
 0x740   :  { %v4040_v48 = vadd.f32 %v4039_v19, %v3833_v38 }
 0x745   :  { %v4196_v0 = vpop.f32.mrf.mxu2 }
 0x746   :  { %v4301_v20 = vadd.f32 %v4196_v0, %v3980_v12  ;;  %v4216_v50 = vpop.f32.mrf.mxu3  ;;  %v4156_v44 = vpop.f32.mrf.mxu0 }
 0x747   :  { %v4302_v49 = vadd.f32 %v4216_v50, %v4000_v24  ;;  %v4299_v32 = vadd.f32 %v4156_v44, %v3940_v54  ;;  %v4176_v63 = vpop.f32.mrf.mxu1 }
 0x748   :  { %v4300_v47 = vadd.f32 %v4176_v63, %v3960_v1 }
 0x74e   :  { %v4276_v45 = vpop.f32.mrf.mxu2  ;;  %v4236_v14 = vpop.f32.mrf.mxu0 }
 0x74f   :  { %v4305_v22 = vadd.f32 %v4276_v45, %v4060_v57  ;;  %v4296_v26 = vpop.f32.mrf.mxu3  ;;  %v4303_v37 = vadd.f32 %v4236_v14, %v4020_v58  ;;  %v4256_v10 = vpop.f32.mrf.mxu1 }
 0x750   :  { %v4306_v55 = vadd.f32 %v4296_v26, %v4080_v34  ;;  %v4304_v59 = vadd.f32 %v4256_v10, %v4040_v48 }
 0x756   :  { %v4421_v6 = vpop.f32.mrf.mxu2  ;;  %v4381_v18 = vpop.f32.mrf.mxu0 }
 0x757   :  { %v4526_v4 = vadd.f32 %v4421_v6, %v4301_v20  ;;  %v4441_v29 = vpop.f32.mrf.mxu3  ;;  %v4524_v56 = vadd.f32 %v4381_v18, %v4299_v32  ;;  %v4401_v53 = vpop.f32.mrf.mxu1 }
 0x758   :  { %v4527_v28 = vadd.f32 %v4441_v29, %v4302_v49  ;;  %v4525_v7 = vadd.f32 %v4401_v53, %v4300_v47 }
 0x75e   :  { %v4501_v30 = vpop.f32.mrf.mxu2  ;;  %v4461_v21 = vpop.f32.mrf.mxu0 }
 0x75f   :  { %v4530_v16 = vadd.f32 %v4501_v30, %v4305_v22  ;;  %v4521_v41 = vpop.f32.mrf.mxu3  ;;  %v4528_v15 = vadd.f32 %v4461_v21, %v4303_v37  ;;  %v4481_v17 = vpop.f32.mrf.mxu1 }
 0x760   :  { %v4531_v5 = vadd.f32 %v4521_v41, %v4306_v55  ;;  %v4529_v39 = vadd.f32 %v4481_v17, %v4304_v59 }
 0x766   :  { %v4594_v43 = vpop.f32.mrf.mxu2  ;;  %v4554_v42 = vpop.f32.mrf.mxu0 }
 0x767   :  { %v4614_v13 = vpop.f32.mrf.mxu3  ;;  %v4574_v23 = vpop.f32.mrf.mxu1  ;;  %v4699_v63 = vadd.f32 %v4594_v43, %v4526_v4  ;;  %v4697_v47 = vadd.f32 %v4554_v42, %v4524_v56 }
 0x768   :  { %v4700_v22 = vadd.f32 %v4614_v13, %v4527_v28  ;;  %v4698_v26 = vadd.f32 %v4574_v23, %v4525_v7  ;;  %v9323_v13 = vld [vmem:[%s9453_s8] sm:$0xff] }
 0x76e   :  { %v4674_v11 = vpop.f32.mrf.mxu2  ;;  %v4634_v33 = vpop.f32.mrf.mxu0 }
 0x76f   :  { %v4694_v8 = vpop.f32.mrf.mxu3  ;;  %v4654_v38 = vpop.f32.mrf.mxu1  ;;  %v4703_v4 = vadd.f32 %v4674_v11, %v4530_v16  ;;  %v4701_v56 = vadd.f32 %v4634_v33, %v4528_v15 }
 0x770   :  { %v4704_v23 = vadd.f32 %v4694_v8, %v4531_v5 }
 0x776   :  { %v4828_v36 = vpop.f32.mrf.mxu2  ;;  %v4788_v9 = vpop.f32.mrf.mxu0 }
 0x777   :  { %v4848_v12 = vpop.f32.mrf.mxu3  ;;  %v4808_v24 = vpop.f32.mrf.mxu1  ;;  %v4933_v37 = vadd.f32 %v4828_v36, %v4699_v63  ;;  %v4931_v10 = vadd.f32 %v4788_v9, %v4697_v47  ;;  %v4702_v36 = vadd.f32 %v4654_v38, %v4529_v39 }
 0x778   :  { %v4934_v55 = vadd.f32 %v4848_v12, %v4700_v22  ;;  %v4932_v59 = vadd.f32 %v4808_v24, %v4698_v26  ;;  %v3546_v63 = vpop.xlane.xlu2 %3545 }
 0x77e   :  { %v4908_v27 = vpop.f32.mrf.mxu2  ;;  %v4868_v54 = vpop.f32.mrf.mxu0 }
 0x77f   :  { %v4928_v2 = vpop.f32.mrf.mxu3  ;;  %v4888_v1 = vpop.f32.mrf.mxu1  ;;  %v4937_v24 = vadd.f32 %v4908_v27, %v4703_v4  ;;  %v4935_v16 = vadd.f32 %v4868_v54, %v4701_v56 }
 0x786   :  { %v5053_v3 = vpop.f32.mrf.mxu2  ;;  %v5013_v57 = vpop.f32.mrf.mxu0 }
 0x787   :  { %v5073_v60 = vpop.f32.mrf.mxu3  ;;  %v5033_v46 = vpop.f32.mrf.mxu1  ;;  %v5158_v6 = vadd.f32 %v5053_v3, %v4933_v37  ;;  %v5156_v18 = vadd.f32 %v5013_v57, %v4931_v10 }
 0x788   :  { %v5159_v29 = vadd.f32 %v5073_v60, %v4934_v55  ;;  %v5157_v53 = vadd.f32 %v5033_v46, %v4932_v59 }
 0x78e   :  { %v5133_v34 = vpop.f32.mrf.mxu2  ;;  %v5093_v58 = vpop.f32.mrf.mxu0 }
 0x78f   :  { %v5153_v19 = vpop.f32.mrf.mxu3  ;;  %v5113_v48 = vpop.f32.mrf.mxu1  ;;  %v5162_v15 = vadd.f32 %v5133_v34, %v4937_v24  ;;  %v5160_v5 = vadd.f32 %v5093_v58, %v4935_v16 }
 0x796   :  { %v5269_v0 = vpop.f32.mrf.mxu2  ;;  %v5229_v20 = vpop.f32.mrf.mxu0 }
 0x797   :  { %v5289_v50 = vpop.f32.mrf.mxu3  ;;  %v5249_v44 = vpop.f32.mrf.mxu1  ;;  %v5374_v30 = vadd.f32 %v5269_v0, %v5158_v6  ;;  %v5372_v21 = vadd.f32 %v5229_v20, %v5156_v18 }
 0x798   :  { %v5375_v41 = vadd.f32 %v5289_v50, %v5159_v29  ;;  %v5373_v17 = vadd.f32 %v5249_v44, %v5157_v53 }
 0x79e   :  { %v5349_v49 = vpop.f32.mrf.mxu2  ;;  %v5309_v32 = vpop.f32.mrf.mxu0 }
 0x79f   :  { %v5369_v45 = vpop.f32.mrf.mxu3  ;;  %v5329_v14 = vpop.f32.mrf.mxu1  ;;  %v5378_v33 = vadd.f32 %v5349_v49, %v5162_v15  ;;  %v5376_v8 = vadd.f32 %v5309_v32, %v5160_v5 }
 0x7a0   :  { %v3526_v32 = vpop.xlane.xlu1 %3525 }
 0x7a1   :  { %v3528_v47 = vmul.f32 0.00048828125, %v3526_v32 }
 0x7a6   :  { %v5494_v35 = vpop.f32.mrf.mxu2  ;;  %v5454_v61 = vpop.f32.mrf.mxu0 }
 0x7a7   :  { %v9316_v43 = vadd.f32 %v5494_v35, %v5374_v30  ;;  %v5514_v28 = vpop.f32.mrf.mxu3  ;;  %v9318_v7 = vadd.f32 %v5454_v61, %v5372_v21  ;;  %v5474_v42 = vpop.f32.mrf.mxu1  ;;  %v4938_v61 = vadd.f32 %v4928_v2, %v4704_v23  ;;  %v4936_v35 = vadd.f32 %v4888_v1, %v4702_v36 }
 0x7a8   :  { %v9325_v9 = vadd.f32 %v5514_v28, %v5375_v41  ;;  %v9327_v12 = vadd.f32 %v5474_v42, %v5373_v17 }
 0x7a9   :  { %5666 = vmatpush.msra.mxu2 %v9316_v43  ;;  %5626 = vmatpush.msra.mxu0 %v9318_v7  ;;  %v5163_v39 = vadd.f32 %v5153_v19, %v4938_v61  ;;  %v5161_v11 = vadd.f32 %v5113_v48, %v4936_v35  ;;  %v5773_v58 = vmul.f32 %v9316_v43, %v9316_v43 }
 0x7aa   :  { %5686 = vmatpush.msra.mxu3 %v9325_v9  ;;  %6296 = vmatmul.msk.f32.vlgmr.msra.gmra.mxu2 %vm738_vm2, %v9323_v13  ;;  %v5774_v19 = vmul.f32 %v9325_v9, %v9325_v9  ;;  %v5772_v20 = vmul.f32 %v9327_v12, %v9327_v12  ;;  %v5771_v49 = vmul.f32 %v9318_v7, %v9318_v7 }
 0x7ab   :  { %5646 = vmatpush.msra.mxu1 %v9327_v12  ;;  %6297 = vmatmul.msk.f32.vlgmr.msra.gmra.mxu3 %vm738_vm2, %v9323_v13  ;;  %v5379_v38 = vadd.f32 %v5369_v45, %v5163_v39  ;;  %v5377_v27 = vadd.f32 %v5329_v14, %v5161_v11  ;;  %v3548_v45 = vmul.f32 0.00048828125, %v3546_v63  ;;  %v3550_v14 = vmul.f32 %v3528_v47, %v3528_v47 }
 0x7ac   :  { %6294 = vmatmul.msk.f32.vlgmr.msra.gmra.mxu0 %vm738_vm2, %v9323_v13  ;;  %6295 = vmatmul.msk.f32.vlgmr.msra.gmra.mxu1 %vm738_vm2, %v9323_v13 }
 0x7ad   :  { %v3552_v22 = vsub.f32 %v3548_v45, %v3550_v14 }
 0x7ae   :  { %v5574_v54 = vpop.f32.mrf.mxu2  ;;  %v5534_v2 = vpop.f32.mrf.mxu0 }
 0x7af   :  { %v9341_v1 = vadd.f32 %v5574_v54, %v5378_v33  ;;  %v5594_v3 = vpop.f32.mrf.mxu3  ;;  %v9343_v57 = vadd.f32 %v5534_v2, %v5376_v8  ;;  %v5554_v60 = vpop.f32.mrf.mxu1  ;;  %v3554_v10 = vadd.f32 1e-05, %v3552_v22 }
 0x7b0   :  { %v9345_v46 = vadd.f32 %v5594_v3, %v5379_v38  ;;  %v9347_v34 = vadd.f32 %v5554_v60, %v5377_v27 }
 0x7b1   :  { %v5777_v48 = vmul.f32 %v9341_v1, %v9341_v1  ;;  %5746 = vmatpush.msrb.mxu2 %v9341_v1  ;;  %5706 = vmatpush.msrb.mxu0 %v9343_v57  ;;  %v5775_v50 = vmul.f32 %v9343_v57, %v9343_v57  ;;  %6635 = vrsqrt.f32 %v3554_v10  ;;  %vm3571_vm14 = vweird.f32 %v3554_v10 }
 0x7b2   :  { %v5778_v0 = vmul.f32 %v9345_v46, %v9345_v46  ;;  %5766 = vmatpush.msrb.mxu3 %v9345_v46  ;;  %6300 = vmatmul.msk.f32.vlgmr.msrb.gmra.mxu2 %vm738_vm2, %v9323_v13  ;;  %v5776_v44 = vmul.f32 %v9347_v34, %v9347_v34 }
 0x7b3   :  { %5834 = vmatpush.msra.mxu2 %v5773_v58  ;;  %5726 = vmatpush.msrb.mxu1 %v9347_v34 }
 0x7b4   :  { %5854 = vmatpush.msra.mxu3 %v5774_v19  ;;  %6298 = vmatmul.msk.f32.vlgmr.msrb.gmra.mxu0 %vm738_vm2, %v9323_v13  ;;  %v3115_v19 = vld [vmem:[%s9450_s6 + $0x8] sm:$0xff] }
 0x7b5   :  { %6301 = vmatmul.msk.f32.vlgmr.msrb.gmra.mxu3 %vm738_vm2, %v9323_v13  ;;  %5914 = vmatpush.msrb.mxu2 %v5777_v48 }
 0x7b6   :  { %5934 = vmatpush.msrb.mxu3 %v5778_v0  ;;  %5814 = vmatpush.msra.mxu1 %v5772_v20 }
 0x7b7   :  { %5794 = vmatpush.msra.mxu0 %v5771_v49  ;;  %6299 = vmatmul.msk.f32.vlgmr.msrb.gmra.mxu1 %vm738_vm2, %v9323_v13  ;;  %v6636_v30 = vpop.eup %6635 }
 0x7b8   :  { %5894 = vmatpush.msrb.mxu1 %v5776_v44  ;;  %v3566_v56 = vmul.f32 %v6636_v30, %v3554_v10  ;;  %vm3572_vm13 = vweird.f32 %v6636_v30 }
 0x7b9   :  { %5874 = vmatpush.msrb.mxu0 %v5775_v50  ;;  %vm3573_vm15 = vmor %vm3571_vm14, %vm3572_vm13  ;;  %v3117_v50 = vld [vmem:[%s9451_s7 + $0x8] sm:$0xff] }
 0x7ba   :  { %6304 = vmatmul.msk.f32.vlgmr.msra.gmra.mxu2 %vm738_vm2, %v9323_v13  ;;  %v3567_v23 = vmul.f32 %v6636_v30, %v3566_v56 }
 0x7bc   :  { %6302 = vmatmul.msk.f32.vlgmr.msra.gmra.mxu0 %vm738_vm2, %v9323_v13  ;;  %v3568_v35 = vmul.f32 0.5, %v3567_v23 }
 0x7bd   :  { %6305 = vmatmul.msk.f32.vlgmr.msra.gmra.mxu3 %vm738_vm2, %v9323_v13 }
 0x7be   :  { %v3569_v11 = vsub.f32 1.5, %v3568_v35 }
 0x7bf   :  { %6303 = vmatmul.msk.f32.vlgmr.msra.gmra.mxu1 %vm738_vm2, %v9323_v13 }
 0x7c0   :  { %v3570_v3 = vmul.f32 %v6636_v30, %v3569_v11 }
 0x7c2   :  { %6308 = vmatmul.msk.f32.vlgmr.msrb.gmra.mxu2 %vm738_vm2, %v9323_v13  ;;  %v3574_v48 = vsel %vm3573_vm15, %v6636_v30, %v3570_v3 }
 0x7c3   :  { %v3576_v0 = vmul.f32 %v3574_v48, %v3115_v19  ;;  %v9746_v19 = vld [vmem:[#allocation75_spill] sm:$0xff] }
 0x7c4   :  { %6306 = vmatmul.msk.f32.vlgmr.msrb.gmra.mxu0 %vm738_vm2, %v9323_v13 }
 0x7c5   :  { %6309 = vmatmul.msk.f32.vlgmr.msrb.gmra.mxu3 %vm738_vm2, %v9323_v13  ;;  %v3578_v20 = vmul.f32 %v3576_v0, %v3528_v47 }
 0x7c7   :  { %6307 = vmatmul.msk.f32.vlgmr.msrb.gmra.mxu1 %vm738_vm2, %v9323_v13  ;;  %v3580_v44 = vsub.f32 %v3117_v50, %v3578_v20 }
 0x829   :  { %v5628_v26 = vpop.f32.mrf.mxu0  ;;  %v5648_v37 = vpop.f32.mrf.mxu1 }
 0x82a   :  { %v5939_v55 = vadd.f32 %v5648_v37, %v5628_v26 }
 0x82d   :  { %v5668_v59 = vpop.f32.mrf.mxu2 }
 0x82e   :  { %v5940_v6 = vadd.f32 %v5939_v55, %v5668_v59  ;;  %v5688_v18 = vpop.f32.mrf.mxu3 }
 0x830   :  { %v5941_v29 = vadd.f32 %v5940_v6, %v5688_v18  ;;  %v5606_v18 = vld [vmem:[%s9454_s9] sm:$0xff] }
 0x831   :  { %v5708_v53 = vpop.f32.mrf.mxu0 }
 0x832   :  { %v5942_v21 = vadd.f32 %v5941_v29, %v5708_v53 }
 0x834   :  { %v5728_v41 = vpop.f32.mrf.mxu1 }
 0x835   :  { %v5748_v17 = vpop.f32.mrf.mxu2  ;;  %v5943_v4 = vadd.f32 %v5942_v21, %v5728_v41  ;;  %v5607_v21 = vld [vmem:[%s9455_s10] sm:$0xff] }
 0x837   :  { %v5944_v42 = vadd.f32 %v5943_v4, %v5748_v17 }
 0x838   :  { %v5768_v28 = vpop.f32.mrf.mxu3 }
 0x839   :  { %v5945_v13 = vadd.f32 %v5944_v42, %v5768_v28  ;;  %v5796_v36 = vpop.f32.mrf.mxu0 }
 0x83b   :  { %5946 = vadd.xlane.f32.xlu0 %v5945_v13 }
 0x83c   :  { %v5816_v24 = vpop.f32.mrf.mxu1 }
 0x83d   :  { %v5949_v16 = vadd.f32 %v5816_v24, %v5796_v36  ;;  %v5836_v61 = vpop.f32.mrf.mxu2 }
 0x83f   :  { %v5950_v15 = vadd.f32 %v5949_v16, %v5836_v61  ;;  %v9745_v16 = vld [vmem:[#allocation107_spill] sm:$0xff] }
 0x840   :  { %v5856_v5 = vpop.f32.mrf.mxu3 }
 0x841   :  { %v5951_v39 = vadd.f32 %v5950_v15, %v5856_v5  ;;  %v5876_v33 = vpop.f32.mrf.mxu0 }
 0x843   :  { %v5952_v8 = vadd.f32 %v5951_v39, %v5876_v33 }
 0x844   :  { %v5896_v38 = vpop.f32.mrf.mxu1 }
 0x845   :  { %v5916_v27 = vpop.f32.mrf.mxu2  ;;  %v5953_v54 = vadd.f32 %v5952_v8, %v5896_v38 }
 0x847   :  { %v5954_v60 = vadd.f32 %v5953_v54, %v5916_v27 }
 0x848   :  { %v5936_v2 = vpop.f32.mrf.mxu3 }
 0x849   :  { %v5955_v58 = vadd.f32 %v5954_v60, %v5936_v2 }
 0x84b   :  { %5956 = vadd.xlane.f32.xlu1 %v5955_v58 }
 0x84f   :  { %3588 = vperm.xlu0 %6631, %v3576_v0  }
 0x864   :  { %3614 = vperm.xlu1 %6632, %v3580_v44  }
 0x8ae   :  { %v5947_v49 = vpop.xlane.xlu0 %5946 }
 0x8af   :  { %v5948_v32 = vmul.f32 0.00048828125, %v5947_v49 }
 0x8b1   :  { %v5959_v45 = vmul.f32 %v5948_v32, %v5948_v32 }
 0x8be   :  { %v5957_v63 = vpop.xlane.xlu1 %5956 }
 0x8bf   :  { %v5958_v14 = vmul.f32 0.00048828125, %v5957_v63 }
 0x8c1   :  { %v5960_v22 = vsub.f32 %v5958_v14, %v5959_v45  ;;  %v3589_v4 = vpop.permute.xlu0 %3588 }
 0x8c2   :  { %v3599_v28 = vmul.f32 %v3589_v4, %v8638_v31  ;;  %v3600_v42 = vmul.f32 %v3589_v4, %v8724_v40  ;;  %v3601_v13 = vmul.f32 %v3589_v4, %v8753_v25  ;;  %v3602_v23 = vmul.f32 %v3589_v4, %v8777_v52 }
 0x8c3   :  { %v5961_v26 = vadd.f32 1e-05, %v5960_v22  ;;  %v3603_v36 = vmul.f32 %v3589_v4, %v8742_v62  ;;  %v3604_v24 = vmul.f32 %v3589_v4, %v8823_v51  ;;  %v3605_v61 = vmul.f32 %v3589_v4, %v9745_v16 }
 0x8c5   :  { %6637 = vrsqrt.f32 %v5961_v26  ;;  %vm5968_vm1 = vweird.f32 %v5961_v26 }
 0x8cb   :  { %v6638_v37 = vpop.eup %6637 }
 0x8cc   :  { %v5963_v10 = vmul.f32 %v6638_v37, %v5961_v26  ;;  %vm5969_vm0 = vweird.f32 %v6638_v37 }
 0x8cd   :  { %vm5970_vm2 = vmor %vm5968_vm1, %vm5969_vm0 }
 0x8ce   :  { %v5964_v55 = vmul.f32 %v6638_v37, %v5963_v10 }
 0x8d0   :  { %v5965_v59 = vmul.f32 0.5, %v5964_v55 }
 0x8d2   :  { %v5966_v6 = vsub.f32 1.5, %v5965_v59 }
 0x8d4   :  { %v5967_v47 = vmul.f32 %v6638_v37, %v5966_v6 }
 0x8d6   :  { %v5971_v29 = vsel %vm5970_vm2, %v6638_v37, %v5967_v47  ;;  %v3615_v56 = vpop.permute.xlu1 %3614 }
 0x8d7   :  { %v5972_v53 = vmul.f32 %v5971_v29, %v5606_v18  ;;  %v3625_v35 = vadd.f32 %v3615_v56, %v3599_v28  ;;  %v3626_v15 = vadd.f32 %v3615_v56, %v3600_v42  ;;  %v3627_v5 = vadd.f32 %v3615_v56, %v3601_v13 }
 0x8d8   :  { %v3628_v25 = vadd.f32 %v3615_v56, %v3602_v23  ;;  %v3629_v2 = vadd.f32 %v3615_v56, %v3603_v36  ;;  %v3630_v48 = vadd.f32 %v3615_v56, %v3604_v24 }
 0x8d9   :  { %5977 = vperm.xlu2 %6470, %v5972_v53   ;;  %v5973_v30 = vmul.f32 %v5972_v53, %v5948_v32 }
 0x8db   :  { %v5974_v41 = vsub.f32 %v5607_v21, %v5973_v30 }
 0x8e1   :  { %5990 = vperm.xlu2 %6470, %v5974_v41  }
 0x933   :  { %v5978_v17 = vpop.permute.xlu2 %5977 }
 0x934   :  { %v5980_v39 = vmul.f32 %v5978_v17, %v9318_v7  ;;  %v5981_v11 = vmul.f32 %v5978_v17, %v9327_v12  ;;  %v5982_v31 = vmul.f32 %v5978_v17, %v9316_v43  ;;  %v5983_v40 = vmul.f32 %v5978_v17, %v9325_v9 }
 0x935   :  { %v5984_v52 = vmul.f32 %v5978_v17, %v9343_v57  ;;  %v5985_v62 = vmul.f32 %v5978_v17, %v9347_v34  ;;  %v5986_v51 = vmul.f32 %v5978_v17, %v9341_v1  ;;  %v5987_v7 = vmul.f32 %v5978_v17, %v9345_v46 }
 0x936   :  { %v3606_v57 = vmul.f32 %v3589_v4, %v9746_v19  ;;  %v3631_v1 = vadd.f32 %v3615_v56, %v3605_v61 }
 0x938   :  { %v3632_v50 = vadd.f32 %v3615_v56, %v3606_v57 }
 0x93b   :  { %v5991_v33 = vpop.permute.xlu2 %5990 }
 0x93c   :  { %v5993_v8 = vadd.f32 %v5991_v33, %v5980_v39  ;;  %v5994_v38 = vadd.f32 %v5991_v33, %v5981_v11  ;;  %v5995_v27 = vadd.f32 %v5991_v33, %v5982_v31  ;;  %v5996_v54 = vadd.f32 %v5991_v33, %v5983_v40 }
 0x93d   :  { %v5997_v12 = vadd.f32 %v5991_v33, %v5984_v52  ;;  %v5998_v3 = vadd.f32 %v5991_v33, %v5985_v62  ;;  %v5999_v43 = vadd.f32 %v5991_v33, %v5986_v51  ;;  %v6000_v34 = vadd.f32 %v5991_v33, %v5987_v7 }
 0x93e   :  { %v6001_v60 = vadd.f32 %v5993_v8, %v3625_v35  ;;  %v6002_v9 = vadd.f32 %v5994_v38, %v3626_v15  ;;  %v6003_v58 = vadd.f32 %v5995_v27, %v3627_v5  ;;  %v6004_v0 = vadd.f32 %v5996_v54, %v3628_v25 }
 0x93f   :  { %v6005_v20 = vadd.f32 %v5997_v12, %v3629_v2  ;;  %v6006_v44 = vadd.f32 %v5998_v3, %v3630_v48  ;;  %v6007_v46 = vadd.f32 %v5999_v43, %v3631_v1  ;;  %v6008_v49 = vadd.f32 %v6000_v34, %v3632_v50 }
 0x940   :  { %6009 = vst [vmem:[%s9456_s11] sm:$0xff] %v6001_v60 }
 0x941   :  { %6010 = vst [vmem:[%s9456_s11 + $0x8] sm:$0xff] %v6002_v9 }
 0x942   :  { %6011 = vst [vmem:[%s9456_s11 + $0x10] sm:$0xff] %v6003_v58 }
 0x943   :  { %6012 = vst [vmem:[%s9456_s11 + $0x18] sm:$0xff] %v6004_v0 }
 0x944   :  { %6013 = vst [vmem:[%s9456_s11 + $0x20] sm:$0xff] %v6005_v20 }
 0x945   :  { %6014 = vst [vmem:[%s9456_s11 + $0x28] sm:$0xff] %v6006_v44 }
 0x946   :  { %6015 = vst [vmem:[%s9456_s11 + $0x30] sm:$0xff] %v6007_v46 }
 0x947   :  { %6016 = vst [vmem:[%s9456_s11 + $0x38] sm:$0xff] %v6008_v49 }

</bundles_post_ra>
